<compile_context>
chip_gen: v6e
topology: v6e:2x2x1
jax: 0.10.0
libtpu: 0.0.40
codegen_flags: <defaults>
</compile_context>

<pallas_src>
import functools

import jax
import jax.numpy as jnp
from jax.experimental import pallas as pl
from jax.experimental.pallas import tpu as pltpu


# -----------------------------------------------------------------------------
# Small helpers (all static Python math)
# -----------------------------------------------------------------------------
def round_up(v, m):
    return (v + m - 1) // m * m


def _pick_tm(M, cap=512):
    """M tile + padded M.  Prefer >=2 tiles (v7x dual-TC) when M is not tiny."""
    Mp = round_up(M, 8)
    if Mp <= 64:
        return Mp, Mp
    if Mp <= 2 * cap:
        tm = round_up((Mp + 1) // 2, 8)
        return tm, round_up(Mp, tm)
    return cap, round_up(Mp, cap)


def _pick_tile(Dp, cap):
    """Tile for an already-128-padded dim Dp, capped at `cap`."""
    if Dp <= cap:
        return Dp
    for t in (512, 384, 256, 128):
        if t <= cap and Dp % t == 0:
            return t
    return 128


def _pad_gemm_weight(w2d):
    """(K, N) f32 -> (Kp, Np) bf16, padded once at init time."""
    K, N = w2d.shape
    Kp, Np = round_up(K, 128), round_up(N, 128)
    return jnp.zeros((Kp, Np), jnp.bfloat16).at[:K, :N].set(w2d.astype(jnp.bfloat16))


# -----------------------------------------------------------------------------
# Pallas kernel 1: tiled GEMM + bias + activation (the conv hot path)
# -----------------------------------------------------------------------------
def _gemm_bias_act_kernel(x_ref, w_ref, b_ref, o_ref, acc_ref, *, activation):
    k = pl.program_id(2)

    @pl.when(k == 0)
    def _():
        acc_ref[...] = jnp.zeros_like(acc_ref)

    acc_ref[...] += jnp.dot(x_ref[...], w_ref[...],
                            preferred_element_type=jnp.float32)

    @pl.when(k == pl.num_programs(2) - 1)
    def _():
        acc = acc_ref[...] + b_ref[...]          # (tm, tn) + (1, tn), f32 epilogue
        if activation == "relu":
            acc = jnp.maximum(acc, 0.0)
        elif activation == "leaky_relu":
            acc = jnp.where(acc > 0.0, acc, 0.2 * acc)
        elif activation == "sigmoid":
            acc = jax.nn.sigmoid(acc)
        elif activation == "tanh":
            acc = jnp.tanh(acc)
        o_ref[...] = acc.astype(o_ref.dtype)


def gemm_bias_act(x, w_p, b, activation="none", out_dtype=jnp.bfloat16):
    """x: (M, K) any float; w_p: (Kp, Np) pre-padded bf16; b: (N,) f32 unpadded."""
    M, K = x.shape
    Kp, Np = w_p.shape
    N = b.shape[0]
    tm, Mp = _pick_tm(M)
    tk = _pick_tile(Kp, 512)
    tn = _pick_tile(Np, 256)

    if x.dtype == jnp.bfloat16 and (M, K) == (Mp, Kp):
        x_p = x
    else:
        x_p = jnp.zeros((Mp, Kp), jnp.bfloat16).at[:M, :K].set(
            x.astype(jnp.bfloat16))
    b_p = jnp.zeros((1, Np), jnp.float32).at[0, :N].set(b.astype(jnp.float32))

    out = pl.pallas_call(
        functools.partial(_gemm_bias_act_kernel, activation=activation),
        out_shape=jax.ShapeDtypeStruct((Mp, Np), out_dtype),
        grid=(Mp // tm, Np // tn, Kp // tk),
        in_specs=[
            pl.BlockSpec((tm, tk), lambda i, j, k: (i, k)),
            pl.BlockSpec((tk, tn), lambda i, j, k: (k, j)),
            pl.BlockSpec((1, tn), lambda i, j, k: (0, j)),
        ],
        out_specs=pl.BlockSpec((tm, tn), lambda i, j, k: (i, j)),
        scratch_shapes=[pltpu.VMEM((tm, tn), jnp.float32)],
        compiler_params=pltpu.CompilerParams(
            dimension_semantics=("parallel", "parallel", "arbitrary")),
    )(x_p, w_p, b_p)
    return out[:M, :N]


# -----------------------------------------------------------------------------
# Pallas kernel 2: ConvLSTM recurrent step
#   acc = im2col(h) @ Wh; epilogue: g = acc + xgates (precomputed, incl. bias);
#   gates [i|f|g|o] sliced out of the packed 4*hidden block;
#   c' = sig(f)*c + sig(i)*tanh(g); h' = sig(o)*tanh(c')  (h' emitted bf16)
# TODO(synk): gate chunk order [i|f|g|o] assumed; permute if porting real weights.
# -----------------------------------------------------------------------------
def _lstm_step_kernel(colsh_ref, wh_ref, xg_ref, c_ref,
                      h_out_ref, c_out_ref, acc_ref, *, hidden):
    k = pl.program_id(1)

    @pl.when(k == 0)
    def _():
        acc_ref[...] = jnp.zeros_like(acc_ref)

    acc_ref[...] += jnp.dot(colsh_ref[...], wh_ref[...],
                            preferred_element_type=jnp.float32)

    @pl.when(k == pl.num_programs(1) - 1)
    def _():
        g = acc_ref[...] + xg_ref[...]                    # (tm, Np4) f32
        i_g = jax.nn.sigmoid(g[:, 0 * hidden:1 * hidden])
        f_g = jax.nn.sigmoid(g[:, 1 * hidden:2 * hidden])
        g_g = jnp.tanh(g[:, 2 * hidden:3 * hidden])
        o_g = jax.nn.sigmoid(g[:, 3 * hidden:4 * hidden])
        c_new = f_g * c_ref[...] + i_g * g_g
        c_out_ref[...] = c_new
        h_out_ref[...] = (o_g * jnp.tanh(c_new)).astype(h_out_ref.dtype)


def _lstm_step_call(cols_hp, wh_p, xg_t, c, tm, tk, hidden):
    Mp, Khp = cols_hp.shape
    Np4 = wh_p.shape[1]
    return pl.pallas_call(
        functools.partial(_lstm_step_kernel, hidden=hidden),
        out_shape=(jax.ShapeDtypeStruct((Mp, hidden), jnp.bfloat16),
                   jax.ShapeDtypeStruct((Mp, hidden), jnp.float32)),
        grid=(Mp // tm, Khp // tk),
        in_specs=[
            pl.BlockSpec((tm, tk), lambda m, k: (m, k)),      # im2col(h)
            pl.BlockSpec((tk, Np4), lambda m, k: (k, 0)),     # Wh
            pl.BlockSpec((tm, Np4), lambda m, k: (m, 0)),     # precomputed x-gates
            pl.BlockSpec((tm, hidden), lambda m, k: (m, 0)),  # c
        ],
        out_specs=(pl.BlockSpec((tm, hidden), lambda m, k: (m, 0)),
                   pl.BlockSpec((tm, hidden), lambda m, k: (m, 0))),
        scratch_shapes=[pltpu.VMEM((tm, Np4), jnp.float32)],
        compiler_params=pltpu.CompilerParams(
            dimension_semantics=("parallel", "arbitrary")),
    )(cols_hp, wh_p, xg_t, c)


# -----------------------------------------------------------------------------
# Pallas kernel 3: 1x1 fusing conv + sigmoid, lane/sublane-dense VPU kernel
# (K=2C, N=C are tiny; pixels are reshaped to full (rows,128) vreg slabs and
#  the channel contraction is unrolled as broadcasted FMAs; weights in SMEM.)
# -----------------------------------------------------------------------------
def _fuse_sigmoid_kernel(w_ref, b_ref, x_ref, o_ref):
    cin = x_ref.shape[0]
    cout = o_ref.shape[0]
    x = x_ref[...]                                # (cin, tr, 128) f32
    for co in range(cout):
        acc = jnp.full(x.shape[1:], b_ref[co], jnp.float32)
        for ci in range(cin):
            acc = acc + w_ref[ci, co] * x[ci]
        o_ref[co] = jax.nn.sigmoid(acc)


def fuse_sigmoid_1x1(comp_cm, w, b):
    """comp_cm: (2C, M) channels-first flattened pixels; w: (2C, C); b: (C,)."""
    cin, M = comp_cm.shape
    cout = w.shape[1]
    lanes = 128
    R = -(-M // lanes)
    tr = min(round_up(R, 8), 256)
    Rp = round_up(round_up(R, 8), tr)
    Mp = Rp * lanes
    if Mp == M:
        x_p = comp_cm.astype(jnp.float32).reshape(cin, Rp, lanes)
    else:
        x_p = jnp.zeros((cin, Mp), jnp.float32).at[:, :M].set(
            comp_cm.astype(jnp.float32)).reshape(cin, Rp, lanes)
    out = pl.pallas_call(
        _fuse_sigmoid_kernel,
        out_shape=jax.ShapeDtypeStruct((cout, Rp, lanes), jnp.float32),
        grid=(Rp // tr,),
        in_specs=[
            pl.BlockSpec(memory_space=pltpu.MemorySpace.SMEM),   # weights
            pl.BlockSpec(memory_space=pltpu.MemorySpace.SMEM),   # bias
            pl.BlockSpec((cin, tr, lanes), lambda i: (0, i, 0)),
        ],
        out_specs=pl.BlockSpec((cout, tr, lanes), lambda i: (0, i, 0)),
        compiler_params=pltpu.CompilerParams(
            dimension_semantics=("parallel",)),
    )(w.astype(jnp.float32), b.astype(jnp.float32), x_p)
    return out.reshape(cout, Mp)[:, :M]


# -----------------------------------------------------------------------------
# Conv helpers (im2col glue in plain JAX/bf16, GEMMs in Pallas)
# TODO(synk): im2col still duplicates activations k*k-fold in HBM; folding the
#             patch extraction into BlockSpec index_maps is left out.
# -----------------------------------------------------------------------------
def im2col(x, k, stride, pad):
    """x: (B, H, W, C) -> (B*Ho*Wo, k*k*C) patch matrix (keeps x dtype)."""
    B, H, W, C = x.shape
    xp = jnp.pad(x, ((0, 0), (pad, pad), (pad, pad), (0, 0)))
    Ho = (H + 2 * pad - k) // stride + 1
    Wo = (W + 2 * pad - k) // stride + 1
    patches = []
    for i in range(k):
        for j in range(k):
            patches.append(
                xp[:, i:i + stride * Ho:stride, j:j + stride * Wo:stride, :])
    cols = jnp.concatenate(patches, axis=-1)            # (B, Ho, Wo, k*k*C)
    return cols.reshape(B * Ho * Wo, k * k * C), (B, Ho, Wo)


def conv2d(x, w_p, b, *, k, stride=1, pad=0, activation="none",
           out_dtype=jnp.bfloat16):
    """x: NHWC; w_p: pre-padded (Kp, Np) bf16 GEMM weight; b: (Cout,) f32."""
    x = x.astype(jnp.bfloat16)
    cols, (B, Ho, Wo) = im2col(x, k, stride, pad)
    out = gemm_bias_act(cols, w_p, b, activation, out_dtype)
    return out.reshape(B, Ho, Wo, b.shape[0])


def conv_transpose_subpixel(x, w_p, b4, activation="relu",
                            out_dtype=jnp.bfloat16):
    """ConvTranspose2d(k=3, s=2, p=1, output_padding=1) by phase decomposition.

    One GEMM with K = 4*Cin (taps x, x_right, x_down, x_downright) and
    N = 4*Cout (one output block per sub-pixel phase), then a pixel shuffle.
    TODO(synk): weights assumed in direct-conv HWIO layout (no flip / channel
    swap); permute when porting real PyTorch ConvTranspose2d weights.
    """
    x = x.astype(jnp.bfloat16)
    B, H, W, C = x.shape
    xr = jnp.pad(x, ((0, 0), (0, 0), (0, 1), (0, 0)))[:, :, 1:, :]
    xd = jnp.pad(x, ((0, 0), (0, 1), (0, 0), (0, 0)))[:, 1:, :, :]
    xdr = jnp.pad(x, ((0, 0), (0, 1), (0, 1), (0, 0)))[:, 1:, 1:, :]
    cols = jnp.concatenate([x, xr, xd, xdr], axis=-1).reshape(B * H * W, 4 * C)
    out = gemm_bias_act(cols, w_p, b4, activation, out_dtype)   # (M, 4*Cout)
    cout = b4.shape[0] // 4
    out = out.reshape(B, H, W, 2, 2, cout)
    out = jnp.transpose(out, (0, 1, 3, 2, 4, 5)).reshape(B, 2 * H, 2 * W, cout)
    return out


def _subpixel_weight(w):
    """(3,3,Cin,Cout) direct-conv HWIO transpose-conv weight -> (4*Cin, 4*Cout)."""
    cin, cout = w.shape[2], w.shape[3]
    comb = jnp.zeros((4, cin, 4, cout), w.dtype)
    comb = comb.at[0, :, 0, :].set(w[1, 1])                      # even row, even col
    comb = comb.at[0, :, 1, :].set(w[1, 0])                      # even row, odd col
    comb = comb.at[1, :, 1, :].set(w[1, 2])
    comb = comb.at[0, :, 2, :].set(w[0, 1])                      # odd row, even col
    comb = comb.at[2, :, 2, :].set(w[2, 1])
    comb = comb.at[0, :, 3, :].set(w[0, 0])                      # odd row, odd col
    comb = comb.at[1, :, 3, :].set(w[0, 2])
    comb = comb.at[2, :, 3, :].set(w[2, 0])
    comb = comb.at[3, :, 3, :].set(w[2, 2])
    return comb.reshape(4 * cin, 4 * cout)


def convlstm_layer(seq, wx_p, wh_p, b):
    """Single ConvLSTM layer.  seq: (T, B, Hh, Ww, Cin) bf16 -> (T,B,Hh,Ww,hidden) bf16."""
    T, B, Hh, Ww, Cin = seq.shape
    hidden = b.shape[0] // 4                      # static, from bias shape
    Np4 = wh_p.shape[1]
    Khp = wh_p.shape[0]
    Kh = 9 * hidden
    M = B * Hh * Ww
    tm, Mp = _pick_tm(M)
    tk = _pick_tile(Khp, 512)

    # Hoisted input->gate GEMM for all T timesteps at once (bias fused here).
    xs = seq.reshape(T * B, Hh, Ww, Cin).astype(jnp.bfloat16)
    cols_x, _ = im2col(xs, 3, 1, 1)
    xg = gemm_bias_act(cols_x, wx_p, b, activation="none",
                       out_dtype=jnp.float32)                   # (T*M, 4*hidden)
    xg = xg.reshape(T, M, 4 * hidden)
    xg_p = jnp.zeros((T, Mp, Np4), jnp.float32).at[:, :M, :4 * hidden].set(xg)

    h0 = jnp.zeros((B, Hh, Ww, hidden), jnp.bfloat16)
    c0 = jnp.zeros((Mp, hidden), jnp.float32)

    def step(carry, xg_t):
        h, c = carry
        cols_h, _ = im2col(h, 3, 1, 1)                          # (M, Kh) bf16
        if (M, Kh) == (Mp, Khp):
            cols_hp = cols_h
        else:
            cols_hp = jnp.zeros((Mp, Khp), jnp.bfloat16).at[:M, :Kh].set(cols_h)
        h_new_p, c_new = _lstm_step_call(cols_hp, wh_p, xg_t, c, tm, tk, hidden)
        h_new = h_new_p[:M].reshape(B, Hh, Ww, hidden)
        return (h_new, c_new), h_new

    (_, _), outs = jax.lax.scan(step, (h0, c0), xg_p)
    return outs


def generator(x, gp, final_act):
    h = x
    for w_p, b4 in gp["ups"]:
        h = conv_transpose_subpixel(h, w_p, b4, activation="relu",
                                    out_dtype=jnp.bfloat16)
    return conv2d(h, gp["final_wp"], gp["final_b"], k=3, stride=1, pad=1,
                  activation=final_act, out_dtype=jnp.float32)


# -----------------------------------------------------------------------------
# warp_flow (cv2.remap, bilinear, zero border) — data-dependent gather, plain JAX
# TODO(synk): gather-based bilinear remap has no clean Pallas TPU path; kept in JAX.
# -----------------------------------------------------------------------------
def bilinear_warp(img_chw, flow_hw2):
    C, H, W = img_chw.shape
    ys, xs = jnp.meshgrid(jnp.arange(H, dtype=jnp.float32),
                          jnp.arange(W, dtype=jnp.float32), indexing="ij")
    mx = xs + flow_hw2[..., 0]
    my = ys + flow_hw2[..., 1]
    x0 = jnp.floor(mx)
    y0 = jnp.floor(my)
    wx = mx - x0
    wy = my - y0

    def sample(yc, xc):
        valid = (xc >= 0) & (xc <= W - 1) & (yc >= 0) & (yc <= H - 1)
        xi = jnp.clip(xc, 0, W - 1).astype(jnp.int32)
        yi = jnp.clip(yc, 0, H - 1).astype(jnp.int32)
        return img_chw[:, yi, xi] * valid[None].astype(img_chw.dtype)

    out = (sample(y0, x0) * ((1 - wx) * (1 - wy))[None]
           + sample(y0, x0 + 1) * (wx * (1 - wy))[None]
           + sample(y0 + 1, x0) * ((1 - wx) * wy)[None]
           + sample(y0 + 1, x0 + 1) * (wx * wy)[None])
    return out


# -----------------------------------------------------------------------------
# Parameter init: deterministic synthetic weights, pre-padded / pre-cast to
# their final bf16 GEMM tile shapes ONCE (no per-forward weight prep traffic).
# Pytree leaves are arrays only (no Python ints); true dims are carried by
# the unpadded bias shapes.
# -----------------------------------------------------------------------------
def init_params(key, in_ch, cnn_feats, lstm_feats, gframe_feats, gflow_feats):
    keys = iter(jax.random.split(key, 128))

    def w(shape, scale=0.1):
        return scale * jax.random.normal(next(keys), shape, jnp.float32)

    params = {}

    # Motion encoder CNN: Conv2d(k=4, s=2, p=1, bias=False) + LeakyReLU(0.2)
    cnn, c = [], in_ch
    for f in cnn_feats:
        wk = w((4, 4, c, f))
        cnn.append((_pad_gemm_weight(wk.reshape(16 * c, f)),
                    jnp.zeros((f,), jnp.float32)))
        c = f
    params["cnn"] = cnn

    # Stacked ConvLSTM: conv(k=3, p=1) gates, split into Wx / Wh.
    lstm, cin = [], cnn_feats[-1]
    for hid in lstm_feats:
        wx = w((3, 3, cin, 4 * hid))
        wh = w((3, 3, hid, 4 * hid))
        lstm.append((_pad_gemm_weight(wx.reshape(9 * cin, 4 * hid)),
                     _pad_gemm_weight(wh.reshape(9 * hid, 4 * hid)),
                     jnp.zeros((4 * hid,), jnp.float32)))
        cin = hid
    params["lstm"] = lstm

    def gen_params(feats, out_ch):
        ups, c2 = [], lstm_feats[-1]
        for f in feats:
            wt = w((3, 3, c2, f))
            bt = jnp.zeros((f,), jnp.float32)
            ups.append((_pad_gemm_weight(_subpixel_weight(wt)), jnp.tile(bt, 4)))
            c2 = f
        return dict(ups=ups,
                    final_wp=_pad_gemm_weight(w((3, 3, c2, out_ch)).reshape(9 * c2, out_ch)),
                    final_b=jnp.zeros((out_ch,), jnp.float32))

    params["gframe"] = gen_params(gframe_feats, in_ch)
    params["gflow"] = gen_params(gflow_feats, 2)
    params["fuse_w"] = w((2 * in_ch, in_ch))
    params["fuse_b"] = jnp.zeros((in_ch,), jnp.float32)
    return params


# -----------------------------------------------------------------------------
# Full forward
# -----------------------------------------------------------------------------
def dual_motion_gan_forward(x, params):
    """x: (B, C, T, H, W) float32.  Returns (frame, flow, prediction) in NCHW."""
    B, C, T, H, W = x.shape

    # Motion encoder CNN: fold T into batch -> one GEMM per layer, bf16 activations.
    f = jnp.transpose(x, (0, 2, 3, 4, 1)).reshape(B * T, H, W, C)   # NHWC, B*T
    for (w_p, b) in params["cnn"]:
        f = conv2d(f, w_p, b, k=4, stride=2, pad=1,
                   activation="leaky_relu", out_dtype=jnp.bfloat16)
    _, hF, wF, cF = f.shape
    seq = jnp.transpose(f.reshape(B, T, hF, wF, cF), (1, 0, 2, 3, 4))  # (T,B,h,w,C)

    # Motion encoder ConvLSTM stack: hoisted x->gate GEMM + fused recurrent kernel.
    for (wx_p, wh_p, bl) in params["lstm"]:
        seq = convlstm_layer(seq, wx_p, wh_p, bl)
    out_me = seq[-1]                                          # (B, h, w, hidden) bf16

    # Generators (sub-pixel transpose convs, bf16; final conv f32 + sigmoid/tanh).
    frame = generator(out_me, params["gframe"], final_act="sigmoid")   # (B,H,W,C)
    flow = generator(out_me, params["gflow"], final_act="tanh")        # (B,H,W,2)
    frame_nchw = jnp.transpose(frame, (0, 3, 1, 2))           # (B, C, H, W)
    flow_nchw = jnp.transpose(flow, (0, 3, 1, 2))             # (B, 2, H, W)

    # Warp last input frame with predicted flow.
    last = x[:, :, -1]                                        # (B, C, H, W)
    flow2frame = jax.vmap(bilinear_warp)(last, flow)          # (B, C, H, W)

    # Fusing layer: 1x1 conv on concat([frame, warped]) + sigmoid (dense VPU kernel).
    comp = jnp.concatenate([frame_nchw, flow2frame], axis=1)  # (B, 2C, H, W)
    comp_cm = jnp.transpose(comp, (1, 0, 2, 3)).reshape(2 * C, B * H * W)
    pred_cm = fuse_sigmoid_1x1(comp_cm, params["fuse_w"], params["fuse_b"])
    prediction = jnp.transpose(pred_cm.reshape(C, B, H, W), (1, 0, 2, 3))

    return frame_nchw, flow_nchw, prediction


# -----------------------------------------------------------------------------
# Demo
# -----------------------------------------------------------------------------
if __name__ == "__main__":
    key = jax.random.PRNGKey(0)
    k_x, k_p = jax.random.split(key)

    # Small config consistent with the module's constructor semantics.
    B, C, T, H, W = 2, 3, 3, 32, 32
    cnn_feats = (8, 16, 16, 32)        # 4 stride-2 convs -> /16 spatial
    lstm_feats = (32, 32, 32)
    gframe_feats = (32, 16, 16, 8)     # 4 x2 upsamples -> x16 spatial
    gflow_feats = (32, 16, 16, 8)

    x = jax.random.uniform(k_x, (B, C, T, H, W), jnp.float32)
    params = init_params(k_p, C, cnn_feats, lstm_feats, gframe_feats, gflow_feats)

    fwd = jax.jit(dual_motion_gan_forward)
    frame_pred, flow_pred, prediction = fwd(x, params)
    jax.block_until_ready((frame_pred, flow_pred, prediction))

    assert frame_pred.shape == (B, C, H, W)
    assert flow_pred.shape == (B, 2, H, W)
    assert prediction.shape == (B, C, H, W)
    assert bool(jnp.all(jnp.isfinite(frame_pred)))
    assert bool(jnp.all(jnp.isfinite(flow_pred)))
    assert bool(jnp.all(jnp.isfinite(prediction)))
    print("KERNEL_OK")
</pallas_src>

<mosaic_0001>
module attributes {stable_mosaic.version = 11 : i64} {
  func.func @_gemm_bias_act_kernel(%arg0: i32, %arg1: i32, %arg2: i32, %arg3: memref<512x128xbf16, #tpu.memory_space<vmem>>, %arg4: memref<128x128xbf16, #tpu.memory_space<vmem>>, %arg5: memref<1x128xf32, #tpu.memory_space<vmem>>, %arg6: memref<512x128xbf16, #tpu.memory_space<vmem>>, %arg7: memref<512x128xf32, #tpu.memory_space<vmem>>) attributes {dimension_semantics = [#tpu.dimension_semantics<parallel>, #tpu.dimension_semantics<parallel>, #tpu.dimension_semantics<arbitrary>], iteration_bounds = array<i64: 3, 1, 1>, scalar_prefetch = 0 : i64, scratch_operands = 1 : i64, tpu.core_type = #tpu.core_type<tc>, window_params = [{transform_indices = @transform_0, window_bounds = array<i64: 512, 128>}, {transform_indices = @transform_1, window_bounds = array<i64: 128, 128>}, {transform_indices = @transform_2, window_bounds = array<i64: 1, 128>}, {transform_indices = @transform_3, window_bounds = array<i64: 512, 128>}]} {
    %c0_i32 = arith.constant 0 : i32
    %0 = arith.cmpi eq, %arg2, %c0_i32 : i32
    %1 = arith.extui %0 : i1 to i32
    %c0_i32_0 = arith.constant 0 : i32
    %2 = arith.cmpi ne, %1, %c0_i32_0 : i32
    scf.if %2 {
      %cst_10 = arith.constant 0.000000e+00 : f32
      %12 = vector.broadcast %cst_10 : f32 to vector<512x128xf32>
      %c0_11 = arith.constant 0 : index
      %c0_12 = arith.constant 0 : index
      %13 = vector.load %arg7[%c0_11, %c0_12] : memref<512x128xf32, #tpu.memory_space<vmem>>, vector<512x128xf32>
      tpu.vector_store %arg7[%c0_11, %c0_12], %12 {strides = array<i32>} : memref<512x128xf32, #tpu.memory_space<vmem>>, vector<512x128xf32>,
    } else {
    }
    %c0 = arith.constant 0 : index
    %c0_1 = arith.constant 0 : index
    %3 = vector.load %arg7[%c0, %c0_1] : memref<512x128xf32, #tpu.memory_space<vmem>>, vector<512x128xf32>
    %c0_2 = arith.constant 0 : index
    %c0_3 = arith.constant 0 : index
    %4 = vector.load %arg3[%c0_2, %c0_3] : memref<512x128xbf16, #tpu.memory_space<vmem>>, vector<512x128xbf16>
    %c0_4 = arith.constant 0 : index
    %c0_5 = arith.constant 0 : index
    %5 = vector.load %arg4[%c0_4, %c0_5] : memref<128x128xbf16, #tpu.memory_space<vmem>>, vector<128x128xbf16>
    %cst = arith.constant dense<0.000000e+00> : vector<512x128xf32>
    %6 = tpu.matmul %4, %5, %cst {dimension_numbers = #tpu.dot_dimension_numbers<[1], [0], [0], [1], [0, 0, 1, 1], [], []>} : vector<512x128xbf16>, vector<128x128xbf16>, vector<512x128xf32> -> vector<512x128xf32>
    %7 = arith.addf %3, %6 : vector<512x128xf32>
    %c0_6 = arith.constant 0 : index
    %c0_7 = arith.constant 0 : index
    %8 = vector.load %arg7[%c0_6, %c0_7] : memref<512x128xf32, #tpu.memory_space<vmem>>, vector<512x128xf32>
    tpu.vector_store %arg7[%c0_6, %c0_7], %7 {strides = array<i32>} : memref<512x128xf32, #tpu.memory_space<vmem>>, vector<512x128xf32>,
    %c0_i32_8 = arith.constant 0 : i32
    %9 = arith.cmpi eq, %arg2, %c0_i32_8 : i32
    %10 = arith.extui %9 : i1 to i32
    %c0_i32_9 = arith.constant 0 : i32
    %11 = arith.cmpi ne, %10, %c0_i32_9 : i32
    scf.if %11 {
      %c0_10 = arith.constant 0 : index
      %c0_11 = arith.constant 0 : index
      %12 = vector.load %arg7[%c0_10, %c0_11] : memref<512x128xf32, #tpu.memory_space<vmem>>, vector<512x128xf32>
      %c0_12 = arith.constant 0 : index
      %c0_13 = arith.constant 0 : index
      %13 = vector.load %arg5[%c0_12, %c0_13] : memref<1x128xf32, #tpu.memory_space<vmem>>, vector<1x128xf32>
      %14 = vector.broadcast %13 : vector<1x128xf32> to vector<512x128xf32>
      %15 = arith.addf %12, %14 : vector<512x128xf32>
      %cst_14 = arith.constant 0.000000e+00 : f32
      %16 = vector.broadcast %cst_14 : f32 to vector<512x128xf32>
      %17 = arith.cmpf ogt, %15, %16 : vector<512x128xf32>
      %cst_15 = arith.constant 2.000000e-01 : f32
      %18 = vector.broadcast %cst_15 : f32 to vector<512x128xf32>
      %19 = arith.mulf %18, %15 : vector<512x128xf32>
      %20 = arith.select %17, %15, %19 : vector<512x128xi1>, vector<512x128xf32>
      %21 = arith.truncf %20 : vector<512x128xf32> to vector<512x128xbf16>
      %c0_16 = arith.constant 0 : index
      %c0_17 = arith.constant 0 : index
      %22 = vector.load %arg6[%c0_16, %c0_17] : memref<512x128xbf16, #tpu.memory_space<vmem>>, vector<512x128xbf16>
      tpu.vector_store %arg6[%c0_16, %c0_17], %21 {strides = array<i32>} : memref<512x128xbf16, #tpu.memory_space<vmem>>, vector<512x128xbf16>,
    } else {
    }
    return
  }
  func.func @transform_0(%arg0: i32, %arg1: i32, %arg2: i32) -> (i32, i32) {
    %c0_i32 = arith.constant 0 : i32
    return %arg0, %arg2 : i32, i32
  }
  func.func @transform_1(%arg0: i32, %arg1: i32, %arg2: i32) -> (i32, i32) {
    %c0_i32 = arith.constant 0 : i32
    return %arg2, %arg1 : i32, i32
  }
  func.func @transform_2(%arg0: i32, %arg1: i32, %arg2: i32) -> (i32, i32) {
    %c0_i32 = arith.constant 0 : i32
    %c0_i32_0 = arith.constant 0 : i32
    return %c0_i32, %arg1 : i32, i32
  }
  func.func @transform_3(%arg0: i32, %arg1: i32, %arg2: i32) -> (i32, i32) {
    %c0_i32 = arith.constant 0 : i32
    return %arg0, %arg1 : i32, i32
  }
}

module attributes {stable_mosaic.version = 11 : i64} {
  func.func @_gemm_bias_act_kernel(%arg0: i32, %arg1: i32, %arg2: i32, %arg3: memref<192x128xbf16, #tpu.memory_space<vmem>>, %arg4: memref<128x128xbf16, #tpu.memory_space<vmem>>, %arg5: memref<1x128xf32, #tpu.memory_space<vmem>>, %arg6: memref<192x128xbf16, #tpu.memory_space<vmem>>, %arg7: memref<192x128xf32, #tpu.memory_space<vmem>>) attributes {dimension_semantics = [#tpu.dimension_semantics<parallel>, #tpu.dimension_semantics<parallel>, #tpu.dimension_semantics<arbitrary>], iteration_bounds = array<i64: 2, 1, 1>, scalar_prefetch = 0 : i64, scratch_operands = 1 : i64, tpu.core_type = #tpu.core_type<tc>, window_params = [{transform_indices = @transform_0, window_bounds = array<i64: 192, 128>}, {transform_indices = @transform_1, window_bounds = array<i64: 128, 128>}, {transform_indices = @transform_2, window_bounds = array<i64: 1, 128>}, {transform_indices = @transform_3, window_bounds = array<i64: 192, 128>}]} {
    %c0_i32 = arith.constant 0 : i32
    %0 = arith.cmpi eq, %arg2, %c0_i32 : i32
    %1 = arith.extui %0 : i1 to i32
    %c0_i32_0 = arith.constant 0 : i32
    %2 = arith.cmpi ne, %1, %c0_i32_0 : i32
    scf.if %2 {
      %cst_10 = arith.constant 0.000000e+00 : f32
      %12 = vector.broadcast %cst_10 : f32 to vector<192x128xf32>
      %c0_11 = arith.constant 0 : index
      %c0_12 = arith.constant 0 : index
      %13 = vector.load %arg7[%c0_11, %c0_12] : memref<192x128xf32, #tpu.memory_space<vmem>>, vector<192x128xf32>
      tpu.vector_store %arg7[%c0_11, %c0_12], %12 {strides = array<i32>} : memref<192x128xf32, #tpu.memory_space<vmem>>, vector<192x128xf32>,
    } else {
    }
    %c0 = arith.constant 0 : index
    %c0_1 = arith.constant 0 : index
    %3 = vector.load %arg7[%c0, %c0_1] : memref<192x128xf32, #tpu.memory_space<vmem>>, vector<192x128xf32>
    %c0_2 = arith.constant 0 : index
    %c0_3 = arith.constant 0 : index
    %4 = vector.load %arg3[%c0_2, %c0_3] : memref<192x128xbf16, #tpu.memory_space<vmem>>, vector<192x128xbf16>
    %c0_4 = arith.constant 0 : index
    %c0_5 = arith.constant 0 : index
    %5 = vector.load %arg4[%c0_4, %c0_5] : memref<128x128xbf16, #tpu.memory_space<vmem>>, vector<128x128xbf16>
    %cst = arith.constant dense<0.000000e+00> : vector<192x128xf32>
    %6 = tpu.matmul %4, %5, %cst {dimension_numbers = #tpu.dot_dimension_numbers<[1], [0], [0], [1], [0, 0, 1, 1], [], []>} : vector<192x128xbf16>, vector<128x128xbf16>, vector<192x128xf32> -> vector<192x128xf32>
    %7 = arith.addf %3, %6 : vector<192x128xf32>
    %c0_6 = arith.constant 0 : index
    %c0_7 = arith.constant 0 : index
    %8 = vector.load %arg7[%c0_6, %c0_7] : memref<192x128xf32, #tpu.memory_space<vmem>>, vector<192x128xf32>
    tpu.vector_store %arg7[%c0_6, %c0_7], %7 {strides = array<i32>} : memref<192x128xf32, #tpu.memory_space<vmem>>, vector<192x128xf32>,
    %c0_i32_8 = arith.constant 0 : i32
    %9 = arith.cmpi eq, %arg2, %c0_i32_8 : i32
    %10 = arith.extui %9 : i1 to i32
    %c0_i32_9 = arith.constant 0 : i32
    %11 = arith.cmpi ne, %10, %c0_i32_9 : i32
    scf.if %11 {
      %c0_10 = arith.constant 0 : index
      %c0_11 = arith.constant 0 : index
      %12 = vector.load %arg7[%c0_10, %c0_11] : memref<192x128xf32, #tpu.memory_space<vmem>>, vector<192x128xf32>
      %c0_12 = arith.constant 0 : index
      %c0_13 = arith.constant 0 : index
      %13 = vector.load %arg5[%c0_12, %c0_13] : memref<1x128xf32, #tpu.memory_space<vmem>>, vector<1x128xf32>
      %14 = vector.broadcast %13 : vector<1x128xf32> to vector<192x128xf32>
      %15 = arith.addf %12, %14 : vector<192x128xf32>
      %cst_14 = arith.constant 0.000000e+00 : f32
      %16 = vector.broadcast %cst_14 : f32 to vector<192x128xf32>
      %17 = arith.cmpf ogt, %15, %16 : vector<192x128xf32>
      %cst_15 = arith.constant 2.000000e-01 : f32
      %18 = vector.broadcast %cst_15 : f32 to vector<192x128xf32>
      %19 = arith.mulf %18, %15 : vector<192x128xf32>
      %20 = arith.select %17, %15, %19 : vector<192x128xi1>, vector<192x128xf32>
      %21 = arith.truncf %20 : vector<192x128xf32> to vector<192x128xbf16>
      %c0_16 = arith.constant 0 : index
      %c0_17 = arith.constant 0 : index
      %22 = vector.load %arg6[%c0_16, %c0_17] : memref<192x128xbf16, #tpu.memory_space<vmem>>, vector<192x128xbf16>
      tpu.vector_store %arg6[%c0_16, %c0_17], %21 {strides = array<i32>} : memref<192x128xbf16, #tpu.memory_space<vmem>>, vector<192x128xbf16>,
    } else {
    }
    return
  }
  func.func @transform_0(%arg0: i32, %arg1: i32, %arg2: i32) -> (i32, i32) {
    %c0_i32 = arith.constant 0 : i32
    return %arg0, %arg2 : i32, i32
  }
  func.func @transform_1(%arg0: i32, %arg1: i32, %arg2: i32) -> (i32, i32) {
    %c0_i32 = arith.constant 0 : i32
    return %arg2, %arg1 : i32, i32
  }
  func.func @transform_2(%arg0: i32, %arg1: i32, %arg2: i32) -> (i32, i32) {
    %c0_i32 = arith.constant 0 : i32
    %c0_i32_0 = arith.constant 0 : i32
    return %c0_i32, %arg1 : i32, i32
  }
  func.func @transform_3(%arg0: i32, %arg1: i32, %arg2: i32) -> (i32, i32) {
    %c0_i32 = arith.constant 0 : i32
    return %arg0, %arg1 : i32, i32
  }
}

module attributes {stable_mosaic.version = 11 : i64} {
  func.func @_gemm_bias_act_kernel(%arg0: i32, %arg1: i32, %arg2: i32, %arg3: memref<48x256xbf16, #tpu.memory_space<vmem>>, %arg4: memref<256x128xbf16, #tpu.memory_space<vmem>>, %arg5: memref<1x128xf32, #tpu.memory_space<vmem>>, %arg6: memref<48x128xbf16, #tpu.memory_space<vmem>>, %arg7: memref<48x128xf32, #tpu.memory_space<vmem>>) attributes {dimension_semantics = [#tpu.dimension_semantics<parallel>, #tpu.dimension_semantics<parallel>, #tpu.dimension_semantics<arbitrary>], iteration_bounds = array<i64: 2, 1, 1>, scalar_prefetch = 0 : i64, scratch_operands = 1 : i64, tpu.core_type = #tpu.core_type<tc>, window_params = [{transform_indices = @transform_0, window_bounds = array<i64: 48, 256>}, {transform_indices = @transform_1, window_bounds = array<i64: 256, 128>}, {transform_indices = @transform_2, window_bounds = array<i64: 1, 128>}, {transform_indices = @transform_3, window_bounds = array<i64: 48, 128>}]} {
    %c0_i32 = arith.constant 0 : i32
    %0 = arith.cmpi eq, %arg2, %c0_i32 : i32
    %1 = arith.extui %0 : i1 to i32
    %c0_i32_0 = arith.constant 0 : i32
    %2 = arith.cmpi ne, %1, %c0_i32_0 : i32
    scf.if %2 {
      %cst_10 = arith.constant 0.000000e+00 : f32
      %12 = vector.broadcast %cst_10 : f32 to vector<48x128xf32>
      %c0_11 = arith.constant 0 : index
      %c0_12 = arith.constant 0 : index
      %13 = vector.load %arg7[%c0_11, %c0_12] : memref<48x128xf32, #tpu.memory_space<vmem>>, vector<48x128xf32>
      tpu.vector_store %arg7[%c0_11, %c0_12], %12 {strides = array<i32>} : memref<48x128xf32, #tpu.memory_space<vmem>>, vector<48x128xf32>,
    } else {
    }
    %c0 = arith.constant 0 : index
    %c0_1 = arith.constant 0 : index
    %3 = vector.load %arg7[%c0, %c0_1] : memref<48x128xf32, #tpu.memory_space<vmem>>, vector<48x128xf32>
    %c0_2 = arith.constant 0 : index
    %c0_3 = arith.constant 0 : index
    %4 = vector.load %arg3[%c0_2, %c0_3] : memref<48x256xbf16, #tpu.memory_space<vmem>>, vector<48x256xbf16>
    %c0_4 = arith.constant 0 : index
    %c0_5 = arith.constant 0 : index
    %5 = vector.load %arg4[%c0_4, %c0_5] : memref<256x128xbf16, #tpu.memory_space<vmem>>, vector<256x128xbf16>
    %cst = arith.constant dense<0.000000e+00> : vector<48x128xf32>
    %6 = tpu.matmul %4, %5, %cst {dimension_numbers = #tpu.dot_dimension_numbers<[1], [0], [0], [1], [0, 0, 1, 1], [], []>} : vector<48x256xbf16>, vector<256x128xbf16>, vector<48x128xf32> -> vector<48x128xf32>
    %7 = arith.addf %3, %6 : vector<48x128xf32>
    %c0_6 = arith.constant 0 : index
    %c0_7 = arith.constant 0 : index
    %8 = vector.load %arg7[%c0_6, %c0_7] : memref<48x128xf32, #tpu.memory_space<vmem>>, vector<48x128xf32>
    tpu.vector_store %arg7[%c0_6, %c0_7], %7 {strides = array<i32>} : memref<48x128xf32, #tpu.memory_space<vmem>>, vector<48x128xf32>,
    %c0_i32_8 = arith.constant 0 : i32
    %9 = arith.cmpi eq, %arg2, %c0_i32_8 : i32
    %10 = arith.extui %9 : i1 to i32
    %c0_i32_9 = arith.constant 0 : i32
    %11 = arith.cmpi ne, %10, %c0_i32_9 : i32
    scf.if %11 {
      %c0_10 = arith.constant 0 : index
      %c0_11 = arith.constant 0 : index
      %12 = vector.load %arg7[%c0_10, %c0_11] : memref<48x128xf32, #tpu.memory_space<vmem>>, vector<48x128xf32>
      %c0_12 = arith.constant 0 : index
      %c0_13 = arith.constant 0 : index
      %13 = vector.load %arg5[%c0_12, %c0_13] : memref<1x128xf32, #tpu.memory_space<vmem>>, vector<1x128xf32>
      %14 = vector.broadcast %13 : vector<1x128xf32> to vector<48x128xf32>
      %15 = arith.addf %12, %14 : vector<48x128xf32>
      %cst_14 = arith.constant 0.000000e+00 : f32
      %16 = vector.broadcast %cst_14 : f32 to vector<48x128xf32>
      %17 = arith.cmpf ogt, %15, %16 : vector<48x128xf32>
      %cst_15 = arith.constant 2.000000e-01 : f32
      %18 = vector.broadcast %cst_15 : f32 to vector<48x128xf32>
      %19 = arith.mulf %18, %15 : vector<48x128xf32>
      %20 = arith.select %17, %15, %19 : vector<48x128xi1>, vector<48x128xf32>
      %21 = arith.truncf %20 : vector<48x128xf32> to vector<48x128xbf16>
      %c0_16 = arith.constant 0 : index
      %c0_17 = arith.constant 0 : index
      %22 = vector.load %arg6[%c0_16, %c0_17] : memref<48x128xbf16, #tpu.memory_space<vmem>>, vector<48x128xbf16>
      tpu.vector_store %arg6[%c0_16, %c0_17], %21 {strides = array<i32>} : memref<48x128xbf16, #tpu.memory_space<vmem>>, vector<48x128xbf16>,
    } else {
    }
    return
  }
  func.func @transform_0(%arg0: i32, %arg1: i32, %arg2: i32) -> (i32, i32) {
    %c0_i32 = arith.constant 0 : i32
    return %arg0, %arg2 : i32, i32
  }
  func.func @transform_1(%arg0: i32, %arg1: i32, %arg2: i32) -> (i32, i32) {
    %c0_i32 = arith.constant 0 : i32
    return %arg2, %arg1 : i32, i32
  }
  func.func @transform_2(%arg0: i32, %arg1: i32, %arg2: i32) -> (i32, i32) {
    %c0_i32 = arith.constant 0 : i32
    %c0_i32_0 = arith.constant 0 : i32
    return %c0_i32, %arg1 : i32, i32
  }
  func.func @transform_3(%arg0: i32, %arg1: i32, %arg2: i32) -> (i32, i32) {
    %c0_i32 = arith.constant 0 : i32
    return %arg0, %arg1 : i32, i32
  }
}

module attributes {stable_mosaic.version = 11 : i64} {
  func.func @_gemm_bias_act_kernel(%arg0: i32, %arg1: i32, %arg2: i32, %arg3: memref<24x256xbf16, #tpu.memory_space<vmem>>, %arg4: memref<256x128xbf16, #tpu.memory_space<vmem>>, %arg5: memref<1x128xf32, #tpu.memory_space<vmem>>, %arg6: memref<24x128xbf16, #tpu.memory_space<vmem>>, %arg7: memref<24x128xf32, #tpu.memory_space<vmem>>) attributes {dimension_semantics = [#tpu.dimension_semantics<parallel>, #tpu.dimension_semantics<parallel>, #tpu.dimension_semantics<arbitrary>], iteration_bounds = array<i64: 1, 1, 1>, scalar_prefetch = 0 : i64, scratch_operands = 1 : i64, tpu.core_type = #tpu.core_type<tc>, window_params = [{transform_indices = @transform_0, window_bounds = array<i64: 24, 256>}, {transform_indices = @transform_1, window_bounds = array<i64: 256, 128>}, {transform_indices = @transform_2, window_bounds = array<i64: 1, 128>}, {transform_indices = @transform_3, window_bounds = array<i64: 24, 128>}]} {
    %c0_i32 = arith.constant 0 : i32
    %0 = arith.cmpi eq, %arg2, %c0_i32 : i32
    %1 = arith.extui %0 : i1 to i32
    %c0_i32_0 = arith.constant 0 : i32
    %2 = arith.cmpi ne, %1, %c0_i32_0 : i32
    scf.if %2 {
      %cst_10 = arith.constant 0.000000e+00 : f32
      %12 = vector.broadcast %cst_10 : f32 to vector<24x128xf32>
      %c0_11 = arith.constant 0 : index
      %c0_12 = arith.constant 0 : index
      %13 = vector.load %arg7[%c0_11, %c0_12] : memref<24x128xf32, #tpu.memory_space<vmem>>, vector<24x128xf32>
      tpu.vector_store %arg7[%c0_11, %c0_12], %12 {strides = array<i32>} : memref<24x128xf32, #tpu.memory_space<vmem>>, vector<24x128xf32>,
    } else {
    }
    %c0 = arith.constant 0 : index
    %c0_1 = arith.constant 0 : index
    %3 = vector.load %arg7[%c0, %c0_1] : memref<24x128xf32, #tpu.memory_space<vmem>>, vector<24x128xf32>
    %c0_2 = arith.constant 0 : index
    %c0_3 = arith.constant 0 : index
    %4 = vector.load %arg3[%c0_2, %c0_3] : memref<24x256xbf16, #tpu.memory_space<vmem>>, vector<24x256xbf16>
    %c0_4 = arith.constant 0 : index
    %c0_5 = arith.constant 0 : index
    %5 = vector.load %arg4[%c0_4, %c0_5] : memref<256x128xbf16, #tpu.memory_space<vmem>>, vector<256x128xbf16>
    %cst = arith.constant dense<0.000000e+00> : vector<24x128xf32>
    %6 = tpu.matmul %4, %5, %cst {dimension_numbers = #tpu.dot_dimension_numbers<[1], [0], [0], [1], [0, 0, 1, 1], [], []>} : vector<24x256xbf16>, vector<256x128xbf16>, vector<24x128xf32> -> vector<24x128xf32>
    %7 = arith.addf %3, %6 : vector<24x128xf32>
    %c0_6 = arith.constant 0 : index
    %c0_7 = arith.constant 0 : index
    %8 = vector.load %arg7[%c0_6, %c0_7] : memref<24x128xf32, #tpu.memory_space<vmem>>, vector<24x128xf32>
    tpu.vector_store %arg7[%c0_6, %c0_7], %7 {strides = array<i32>} : memref<24x128xf32, #tpu.memory_space<vmem>>, vector<24x128xf32>,
    %c0_i32_8 = arith.constant 0 : i32
    %9 = arith.cmpi eq, %arg2, %c0_i32_8 : i32
    %10 = arith.extui %9 : i1 to i32
    %c0_i32_9 = arith.constant 0 : i32
    %11 = arith.cmpi ne, %10, %c0_i32_9 : i32
    scf.if %11 {
      %c0_10 = arith.constant 0 : index
      %c0_11 = arith.constant 0 : index
      %12 = vector.load %arg7[%c0_10, %c0_11] : memref<24x128xf32, #tpu.memory_space<vmem>>, vector<24x128xf32>
      %c0_12 = arith.constant 0 : index
      %c0_13 = arith.constant 0 : index
      %13 = vector.load %arg5[%c0_12, %c0_13] : memref<1x128xf32, #tpu.memory_space<vmem>>, vector<1x128xf32>
      %14 = vector.broadcast %13 : vector<1x128xf32> to vector<24x128xf32>
      %15 = arith.addf %12, %14 : vector<24x128xf32>
      %cst_14 = arith.constant 0.000000e+00 : f32
      %16 = vector.broadcast %cst_14 : f32 to vector<24x128xf32>
      %17 = arith.cmpf ogt, %15, %16 : vector<24x128xf32>
      %cst_15 = arith.constant 2.000000e-01 : f32
      %18 = vector.broadcast %cst_15 : f32 to vector<24x128xf32>
      %19 = arith.mulf %18, %15 : vector<24x128xf32>
      %20 = arith.select %17, %15, %19 : vector<24x128xi1>, vector<24x128xf32>
      %21 = arith.truncf %20 : vector<24x128xf32> to vector<24x128xbf16>
      %c0_16 = arith.constant 0 : index
      %c0_17 = arith.constant 0 : index
      %22 = vector.load %arg6[%c0_16, %c0_17] : memref<24x128xbf16, #tpu.memory_space<vmem>>, vector<24x128xbf16>
      tpu.vector_store %arg6[%c0_16, %c0_17], %21 {strides = array<i32>} : memref<24x128xbf16, #tpu.memory_space<vmem>>, vector<24x128xbf16>,
    } else {
    }
    return
  }
  func.func @transform_0(%arg0: i32, %arg1: i32, %arg2: i32) -> (i32, i32) {
    %c0_i32 = arith.constant 0 : i32
    return %arg0, %arg2 : i32, i32
  }
  func.func @transform_1(%arg0: i32, %arg1: i32, %arg2: i32) -> (i32, i32) {
    %c0_i32 = arith.constant 0 : i32
    return %arg2, %arg1 : i32, i32
  }
  func.func @transform_2(%arg0: i32, %arg1: i32, %arg2: i32) -> (i32, i32) {
    %c0_i32 = arith.constant 0 : i32
    %c0_i32_0 = arith.constant 0 : i32
    return %c0_i32, %arg1 : i32, i32
  }
  func.func @transform_3(%arg0: i32, %arg1: i32, %arg2: i32) -> (i32, i32) {
    %c0_i32 = arith.constant 0 : i32
    return %arg0, %arg1 : i32, i32
  }
}

module attributes {stable_mosaic.version = 11 : i64} {
  func.func @_gemm_bias_act_kernel(%arg0: i32, %arg1: i32, %arg2: i32, %arg3: memref<24x384xbf16, #tpu.memory_space<vmem>>, %arg4: memref<384x128xbf16, #tpu.memory_space<vmem>>, %arg5: memref<1x128xf32, #tpu.memory_space<vmem>>, %arg6: memref<24x128xf32, #tpu.memory_space<vmem>>, %arg7: memref<24x128xf32, #tpu.memory_space<vmem>>) attributes {dimension_semantics = [#tpu.dimension_semantics<parallel>, #tpu.dimension_semantics<parallel>, #tpu.dimension_semantics<arbitrary>], iteration_bounds = array<i64: 1, 1, 1>, scalar_prefetch = 0 : i64, scratch_operands = 1 : i64, tpu.core_type = #tpu.core_type<tc>, window_params = [{transform_indices = @transform_0, window_bounds = array<i64: 24, 384>}, {transform_indices = @transform_1, window_bounds = array<i64: 384, 128>}, {transform_indices = @transform_2, window_bounds = array<i64: 1, 128>}, {transform_indices = @transform_3, window_bounds = array<i64: 24, 128>}]} {
    %c0_i32 = arith.constant 0 : i32
    %0 = arith.cmpi eq, %arg2, %c0_i32 : i32
    %1 = arith.extui %0 : i1 to i32
    %c0_i32_0 = arith.constant 0 : i32
    %2 = arith.cmpi ne, %1, %c0_i32_0 : i32
    scf.if %2 {
      %cst_10 = arith.constant 0.000000e+00 : f32
      %12 = vector.broadcast %cst_10 : f32 to vector<24x128xf32>
      %c0_11 = arith.constant 0 : index
      %c0_12 = arith.constant 0 : index
      %13 = vector.load %arg7[%c0_11, %c0_12] : memref<24x128xf32, #tpu.memory_space<vmem>>, vector<24x128xf32>
      tpu.vector_store %arg7[%c0_11, %c0_12], %12 {strides = array<i32>} : memref<24x128xf32, #tpu.memory_space<vmem>>, vector<24x128xf32>,
    } else {
    }
    %c0 = arith.constant 0 : index
    %c0_1 = arith.constant 0 : index
    %3 = vector.load %arg7[%c0, %c0_1] : memref<24x128xf32, #tpu.memory_space<vmem>>, vector<24x128xf32>
    %c0_2 = arith.constant 0 : index
    %c0_3 = arith.constant 0 : index
    %4 = vector.load %arg3[%c0_2, %c0_3] : memref<24x384xbf16, #tpu.memory_space<vmem>>, vector<24x384xbf16>
    %c0_4 = arith.constant 0 : index
    %c0_5 = arith.constant 0 : index
    %5 = vector.load %arg4[%c0_4, %c0_5] : memref<384x128xbf16, #tpu.memory_space<vmem>>, vector<384x128xbf16>
    %cst = arith.constant dense<0.000000e+00> : vector<24x128xf32>
    %6 = tpu.matmul %4, %5, %cst {dimension_numbers = #tpu.dot_dimension_numbers<[1], [0], [0], [1], [0, 0, 1, 1], [], []>} : vector<24x384xbf16>, vector<384x128xbf16>, vector<24x128xf32> -> vector<24x128xf32>
    %7 = arith.addf %3, %6 : vector<24x128xf32>
    %c0_6 = arith.constant 0 : index
    %c0_7 = arith.constant 0 : index
    %8 = vector.load %arg7[%c0_6, %c0_7] : memref<24x128xf32, #tpu.memory_space<vmem>>, vector<24x128xf32>
    tpu.vector_store %arg7[%c0_6, %c0_7], %7 {strides = array<i32>} : memref<24x128xf32, #tpu.memory_space<vmem>>, vector<24x128xf32>,
    %c0_i32_8 = arith.constant 0 : i32
    %9 = arith.cmpi eq, %arg2, %c0_i32_8 : i32
    %10 = arith.extui %9 : i1 to i32
    %c0_i32_9 = arith.constant 0 : i32
    %11 = arith.cmpi ne, %10, %c0_i32_9 : i32
    scf.if %11 {
      %c0_10 = arith.constant 0 : index
      %c0_11 = arith.constant 0 : index
      %12 = vector.load %arg7[%c0_10, %c0_11] : memref<24x128xf32, #tpu.memory_space<vmem>>, vector<24x128xf32>
      %c0_12 = arith.constant 0 : index
      %c0_13 = arith.constant 0 : index
      %13 = vector.load %arg5[%c0_12, %c0_13] : memref<1x128xf32, #tpu.memory_space<vmem>>, vector<1x128xf32>
      %14 = vector.broadcast %13 : vector<1x128xf32> to vector<24x128xf32>
      %15 = arith.addf %12, %14 : vector<24x128xf32>
      %c0_14 = arith.constant 0 : index
      %c0_15 = arith.constant 0 : index
      %16 = vector.load %arg6[%c0_14, %c0_15] : memref<24x128xf32, #tpu.memory_space<vmem>>, vector<24x128xf32>
      tpu.vector_store %arg6[%c0_14, %c0_15], %15 {strides = array<i32>} : memref<24x128xf32, #tpu.memory_space<vmem>>, vector<24x128xf32>,
    } else {
    }
    return
  }
  func.func @transform_0(%arg0: i32, %arg1: i32, %arg2: i32) -> (i32, i32) {
    %c0_i32 = arith.constant 0 : i32
    return %arg0, %arg2 : i32, i32
  }
  func.func @transform_1(%arg0: i32, %arg1: i32, %arg2: i32) -> (i32, i32) {
    %c0_i32 = arith.constant 0 : i32
    return %arg2, %arg1 : i32, i32
  }
  func.func @transform_2(%arg0: i32, %arg1: i32, %arg2: i32) -> (i32, i32) {
    %c0_i32 = arith.constant 0 : i32
    %c0_i32_0 = arith.constant 0 : i32
    return %c0_i32, %arg1 : i32, i32
  }
  func.func @transform_3(%arg0: i32, %arg1: i32, %arg2: i32) -> (i32, i32) {
    %c0_i32 = arith.constant 0 : i32
    return %arg0, %arg1 : i32, i32
  }
}

module attributes {stable_mosaic.version = 11 : i64} {
  func.func @_lstm_step_kernel(%arg0: i32, %arg1: i32, %arg2: memref<8x384xbf16, #tpu.memory_space<vmem>>, %arg3: memref<384x128xbf16, #tpu.memory_space<vmem>>, %arg4: memref<8x128xf32, #tpu.memory_space<vmem>>, %arg5: memref<8x32xf32, #tpu.memory_space<vmem>>, %arg6: memref<8x32xbf16, #tpu.memory_space<vmem>>, %arg7: memref<8x32xf32, #tpu.memory_space<vmem>>, %arg8: memref<8x128xf32, #tpu.memory_space<vmem>>) attributes {dimension_semantics = [#tpu.dimension_semantics<parallel>, #tpu.dimension_semantics<arbitrary>], iteration_bounds = array<i64: 1, 1>, scalar_prefetch = 0 : i64, scratch_operands = 1 : i64, tpu.core_type = #tpu.core_type<tc>, window_params = [{transform_indices = @transform_0, window_bounds = array<i64: 8, 384>}, {transform_indices = @transform_1, window_bounds = array<i64: 384, 128>}, {transform_indices = @transform_2, window_bounds = array<i64: 8, 128>}, {transform_indices = @transform_3, window_bounds = array<i64: 8, 32>}, {transform_indices = @transform_4, window_bounds = array<i64: 8, 32>}, {transform_indices = @transform_5, window_bounds = array<i64: 8, 32>}]} {
    %c0_i32 = arith.constant 0 : i32
    %0 = arith.cmpi eq, %arg1, %c0_i32 : i32
    %1 = arith.extui %0 : i1 to i32
    %c0_i32_0 = arith.constant 0 : i32
    %2 = arith.cmpi ne, %1, %c0_i32_0 : i32
    scf.if %2 {
      %cst_10 = arith.constant 0.000000e+00 : f32
      %12 = vector.broadcast %cst_10 : f32 to vector<8x128xf32>
      %c0_11 = arith.constant 0 : index
      %c0_12 = arith.constant 0 : index
      %13 = vector.load %arg8[%c0_11, %c0_12] : memref<8x128xf32, #tpu.memory_space<vmem>>, vector<8x128xf32>
      tpu.vector_store %arg8[%c0_11, %c0_12], %12 {strides = array<i32>} : memref<8x128xf32, #tpu.memory_space<vmem>>, vector<8x128xf32>,
    } else {
    }
    %c0 = arith.constant 0 : index
    %c0_1 = arith.constant 0 : index
    %3 = vector.load %arg8[%c0, %c0_1] : memref<8x128xf32, #tpu.memory_space<vmem>>, vector<8x128xf32>
    %c0_2 = arith.constant 0 : index
    %c0_3 = arith.constant 0 : index
    %4 = vector.load %arg2[%c0_2, %c0_3] : memref<8x384xbf16, #tpu.memory_space<vmem>>, vector<8x384xbf16>
    %c0_4 = arith.constant 0 : index
    %c0_5 = arith.constant 0 : index
    %5 = vector.load %arg3[%c0_4, %c0_5] : memref<384x128xbf16, #tpu.memory_space<vmem>>, vector<384x128xbf16>
    %cst = arith.constant dense<0.000000e+00> : vector<8x128xf32>
    %6 = tpu.matmul %4, %5, %cst {dimension_numbers = #tpu.dot_dimension_numbers<[1], [0], [0], [1], [0, 0, 1, 1], [], []>} : vector<8x384xbf16>, vector<384x128xbf16>, vector<8x128xf32> -> vector<8x128xf32>
    %7 = arith.addf %3, %6 : vector<8x128xf32>
    %c0_6 = arith.constant 0 : index
    %c0_7 = arith.constant 0 : index
    %8 = vector.load %arg8[%c0_6, %c0_7] : memref<8x128xf32, #tpu.memory_space<vmem>>, vector<8x128xf32>
    tpu.vector_store %arg8[%c0_6, %c0_7], %7 {strides = array<i32>} : memref<8x128xf32, #tpu.memory_space<vmem>>, vector<8x128xf32>,
    %c0_i32_8 = arith.constant 0 : i32
    %9 = arith.cmpi eq, %arg1, %c0_i32_8 : i32
    %10 = arith.extui %9 : i1 to i32
    %c0_i32_9 = arith.constant 0 : i32
    %11 = arith.cmpi ne, %10, %c0_i32_9 : i32
    scf.if %11 {
      %c0_10 = arith.constant 0 : index
      %c0_11 = arith.constant 0 : index
      %12 = vector.load %arg8[%c0_10, %c0_11] : memref<8x128xf32, #tpu.memory_space<vmem>>, vector<8x128xf32>
      %c0_12 = arith.constant 0 : index
      %c0_13 = arith.constant 0 : index
      %13 = vector.load %arg4[%c0_12, %c0_13] : memref<8x128xf32, #tpu.memory_space<vmem>>, vector<8x128xf32>
      %14 = arith.addf %12, %13 : vector<8x128xf32>
      %15 = vector.extract_strided_slice %14 {offsets = [0, 0], sizes = [8, 32], strides = [1, 1]} : vector<8x128xf32> to vector<8x32xf32>
      %16 = arith.negf %15 : vector<8x32xf32>
      %17 = math.exp %16 : vector<8x32xf32>
      %cst_14 = arith.constant 1.000000e+00 : f32
      %18 = vector.broadcast %cst_14 : f32 to vector<8x32xf32>
      %19 = arith.addf %18, %17 : vector<8x32xf32>
      %20 = arith.divf %18, %19 : vector<8x32xf32>
      %21 = vector.extract_strided_slice %14 {offsets = [0, 32], sizes = [8, 32], strides = [1, 1]} : vector<8x128xf32> to vector<8x32xf32>
      %22 = arith.negf %21 : vector<8x32xf32>
      %23 = math.exp %22 : vector<8x32xf32>
      %cst_15 = arith.constant 1.000000e+00 : f32
      %24 = vector.broadcast %cst_15 : f32 to vector<8x32xf32>
      %25 = arith.addf %24, %23 : vector<8x32xf32>
      %26 = arith.divf %24, %25 : vector<8x32xf32>
      %27 = vector.extract_strided_slice %14 {offsets = [0, 64], sizes = [8, 32], strides = [1, 1]} : vector<8x128xf32> to vector<8x32xf32>
      %28 = math.tanh %27 : vector<8x32xf32>
      %29 = vector.extract_strided_slice %14 {offsets = [0, 96], sizes = [8, 32], strides = [1, 1]} : vector<8x128xf32> to vector<8x32xf32>
      %30 = arith.negf %29 : vector<8x32xf32>
      %31 = math.exp %30 : vector<8x32xf32>
      %cst_16 = arith.constant 1.000000e+00 : f32
      %32 = vector.broadcast %cst_16 : f32 to vector<8x32xf32>
      %33 = arith.addf %32, %31 : vector<8x32xf32>
      %34 = arith.divf %32, %33 : vector<8x32xf32>
      %c0_17 = arith.constant 0 : index
      %c0_18 = arith.constant 0 : index
      %35 = vector.load %arg5[%c0_17, %c0_18] : memref<8x32xf32, #tpu.memory_space<vmem>>, vector<8x32xf32>
      %36 = arith.mulf %26, %35 : vector<8x32xf32>
      %37 = arith.mulf %20, %28 : vector<8x32xf32>
      %38 = arith.addf %36, %37 : vector<8x32xf32>
      %c0_19 = arith.constant 0 : index
      %c0_20 = arith.constant 0 : index
      %39 = vector.load %arg7[%c0_19, %c0_20] : memref<8x32xf32, #tpu.memory_space<vmem>>, vector<8x32xf32>
      tpu.vector_store %arg7[%c0_19, %c0_20], %38 {strides = array<i32>} : memref<8x32xf32, #tpu.memory_space<vmem>>, vector<8x32xf32>,
      %40 = math.tanh %38 : vector<8x32xf32>
      %41 = arith.mulf %34, %40 : vector<8x32xf32>
      %42 = arith.truncf %41 : vector<8x32xf32> to vector<8x32xbf16>
      %c0_21 = arith.constant 0 : index
      %c0_22 = arith.constant 0 : index
      %43 = vector.load %arg6[%c0_21, %c0_22] : memref<8x32xbf16, #tpu.memory_space<vmem>>, vector<8x32xbf16>
      tpu.vector_store %arg6[%c0_21, %c0_22], %42 {strides = array<i32>} : memref<8x32xbf16, #tpu.memory_space<vmem>>, vector<8x32xbf16>,
    } else {
    }
    return
  }
  func.func @transform_0(%arg0: i32, %arg1: i32) -> (i32, i32) {
    %c0_i32 = arith.constant 0 : i32
    return %arg0, %arg1 : i32, i32
  }
  func.func @transform_1(%arg0: i32, %arg1: i32) -> (i32, i32) {
    %c0_i32 = arith.constant 0 : i32
    %c0_i32_0 = arith.constant 0 : i32
    return %arg1, %c0_i32 : i32, i32
  }
  func.func @transform_2(%arg0: i32, %arg1: i32) -> (i32, i32) {
    %c0_i32 = arith.constant 0 : i32
    %c0_i32_0 = arith.constant 0 : i32
    return %arg0, %c0_i32 : i32, i32
  }
  func.func @transform_3(%arg0: i32, %arg1: i32) -> (i32, i32) {
    %c0_i32 = arith.constant 0 : i32
    %c0_i32_0 = arith.constant 0 : i32
    return %arg0, %c0_i32 : i32, i32
  }
  func.func @transform_4(%arg0: i32, %arg1: i32) -> (i32, i32) {
    %c0_i32 = arith.constant 0 : i32
    %c0_i32_0 = arith.constant 0 : i32
    return %arg0, %c0_i32 : i32, i32
  }
  func.func @transform_5(%arg0: i32, %arg1: i32) -> (i32, i32) {
    %c0_i32 = arith.constant 0 : i32
    %c0_i32_0 = arith.constant 0 : i32
    return %arg0, %c0_i32 : i32, i32
  }
}

module attributes {stable_mosaic.version = 11 : i64} {
  func.func @_gemm_bias_act_kernel(%arg0: i32, %arg1: i32, %arg2: i32, %arg3: memref<8x128xbf16, #tpu.memory_space<vmem>>, %arg4: memref<128x128xbf16, #tpu.memory_space<vmem>>, %arg5: memref<1x128xf32, #tpu.memory_space<vmem>>, %arg6: memref<8x128xbf16, #tpu.memory_space<vmem>>, %arg7: memref<8x128xf32, #tpu.memory_space<vmem>>) attributes {dimension_semantics = [#tpu.dimension_semantics<parallel>, #tpu.dimension_semantics<parallel>, #tpu.dimension_semantics<arbitrary>], iteration_bounds = array<i64: 1, 1, 1>, scalar_prefetch = 0 : i64, scratch_operands = 1 : i64, tpu.core_type = #tpu.core_type<tc>, window_params = [{transform_indices = @transform_0, window_bounds = array<i64: 8, 128>}, {transform_indices = @transform_1, window_bounds = array<i64: 128, 128>}, {transform_indices = @transform_2, window_bounds = array<i64: 1, 128>}, {transform_indices = @transform_3, window_bounds = array<i64: 8, 128>}]} {
    %c0_i32 = arith.constant 0 : i32
    %0 = arith.cmpi eq, %arg2, %c0_i32 : i32
    %1 = arith.extui %0 : i1 to i32
    %c0_i32_0 = arith.constant 0 : i32
    %2 = arith.cmpi ne, %1, %c0_i32_0 : i32
    scf.if %2 {
      %cst_10 = arith.constant 0.000000e+00 : f32
      %12 = vector.broadcast %cst_10 : f32 to vector<8x128xf32>
      %c0_11 = arith.constant 0 : index
      %c0_12 = arith.constant 0 : index
      %13 = vector.load %arg7[%c0_11, %c0_12] : memref<8x128xf32, #tpu.memory_space<vmem>>, vector<8x128xf32>
      tpu.vector_store %arg7[%c0_11, %c0_12], %12 {strides = array<i32>} : memref<8x128xf32, #tpu.memory_space<vmem>>, vector<8x128xf32>,
    } else {
    }
    %c0 = arith.constant 0 : index
    %c0_1 = arith.constant 0 : index
    %3 = vector.load %arg7[%c0, %c0_1] : memref<8x128xf32, #tpu.memory_space<vmem>>, vector<8x128xf32>
    %c0_2 = arith.constant 0 : index
    %c0_3 = arith.constant 0 : index
    %4 = vector.load %arg3[%c0_2, %c0_3] : memref<8x128xbf16, #tpu.memory_space<vmem>>, vector<8x128xbf16>
    %c0_4 = arith.constant 0 : index
    %c0_5 = arith.constant 0 : index
    %5 = vector.load %arg4[%c0_4, %c0_5] : memref<128x128xbf16, #tpu.memory_space<vmem>>, vector<128x128xbf16>
    %cst = arith.constant dense<0.000000e+00> : vector<8x128xf32>
    %6 = tpu.matmul %4, %5, %cst {dimension_numbers = #tpu.dot_dimension_numbers<[1], [0], [0], [1], [0, 0, 1, 1], [], []>} : vector<8x128xbf16>, vector<128x128xbf16>, vector<8x128xf32> -> vector<8x128xf32>
    %7 = arith.addf %3, %6 : vector<8x128xf32>
    %c0_6 = arith.constant 0 : index
    %c0_7 = arith.constant 0 : index
    %8 = vector.load %arg7[%c0_6, %c0_7] : memref<8x128xf32, #tpu.memory_space<vmem>>, vector<8x128xf32>
    tpu.vector_store %arg7[%c0_6, %c0_7], %7 {strides = array<i32>} : memref<8x128xf32, #tpu.memory_space<vmem>>, vector<8x128xf32>,
    %c0_i32_8 = arith.constant 0 : i32
    %9 = arith.cmpi eq, %arg2, %c0_i32_8 : i32
    %10 = arith.extui %9 : i1 to i32
    %c0_i32_9 = arith.constant 0 : i32
    %11 = arith.cmpi ne, %10, %c0_i32_9 : i32
    scf.if %11 {
      %c0_10 = arith.constant 0 : index
      %c0_11 = arith.constant 0 : index
      %12 = vector.load %arg7[%c0_10, %c0_11] : memref<8x128xf32, #tpu.memory_space<vmem>>, vector<8x128xf32>
      %c0_12 = arith.constant 0 : index
      %c0_13 = arith.constant 0 : index
      %13 = vector.load %arg5[%c0_12, %c0_13] : memref<1x128xf32, #tpu.memory_space<vmem>>, vector<1x128xf32>
      %14 = vector.broadcast %13 : vector<1x128xf32> to vector<8x128xf32>
      %15 = arith.addf %12, %14 : vector<8x128xf32>
      %cst_14 = arith.constant 0.000000e+00 : f32
      %16 = vector.broadcast %cst_14 : f32 to vector<8x128xf32>
      %17 = arith.maximumf %15, %16 : vector<8x128xf32>
      %18 = arith.truncf %17 : vector<8x128xf32> to vector<8x128xbf16>
      %c0_15 = arith.constant 0 : index
      %c0_16 = arith.constant 0 : index
      %19 = vector.load %arg6[%c0_15, %c0_16] : memref<8x128xbf16, #tpu.memory_space<vmem>>, vector<8x128xbf16>
      tpu.vector_store %arg6[%c0_15, %c0_16], %18 {strides = array<i32>} : memref<8x128xbf16, #tpu.memory_space<vmem>>, vector<8x128xbf16>,
    } else {
    }
    return
  }
  func.func @transform_0(%arg0: i32, %arg1: i32, %arg2: i32) -> (i32, i32) {
    %c0_i32 = arith.constant 0 : i32
    return %arg0, %arg2 : i32, i32
  }
  func.func @transform_1(%arg0: i32, %arg1: i32, %arg2: i32) -> (i32, i32) {
    %c0_i32 = arith.constant 0 : i32
    return %arg2, %arg1 : i32, i32
  }
  func.func @transform_2(%arg0: i32, %arg1: i32, %arg2: i32) -> (i32, i32) {
    %c0_i32 = arith.constant 0 : i32
    %c0_i32_0 = arith.constant 0 : i32
    return %c0_i32, %arg1 : i32, i32
  }
  func.func @transform_3(%arg0: i32, %arg1: i32, %arg2: i32) -> (i32, i32) {
    %c0_i32 = arith.constant 0 : i32
    return %arg0, %arg1 : i32, i32
  }
}

module attributes {stable_mosaic.version = 11 : i64} {
  func.func @_gemm_bias_act_kernel(%arg0: i32, %arg1: i32, %arg2: i32, %arg3: memref<32x128xbf16, #tpu.memory_space<vmem>>, %arg4: memref<128x128xbf16, #tpu.memory_space<vmem>>, %arg5: memref<1x128xf32, #tpu.memory_space<vmem>>, %arg6: memref<32x128xbf16, #tpu.memory_space<vmem>>, %arg7: memref<32x128xf32, #tpu.memory_space<vmem>>) attributes {dimension_semantics = [#tpu.dimension_semantics<parallel>, #tpu.dimension_semantics<parallel>, #tpu.dimension_semantics<arbitrary>], iteration_bounds = array<i64: 1, 1, 1>, scalar_prefetch = 0 : i64, scratch_operands = 1 : i64, tpu.core_type = #tpu.core_type<tc>, window_params = [{transform_indices = @transform_0, window_bounds = array<i64: 32, 128>}, {transform_indices = @transform_1, window_bounds = array<i64: 128, 128>}, {transform_indices = @transform_2, window_bounds = array<i64: 1, 128>}, {transform_indices = @transform_3, window_bounds = array<i64: 32, 128>}]} {
    %c0_i32 = arith.constant 0 : i32
    %0 = arith.cmpi eq, %arg2, %c0_i32 : i32
    %1 = arith.extui %0 : i1 to i32
    %c0_i32_0 = arith.constant 0 : i32
    %2 = arith.cmpi ne, %1, %c0_i32_0 : i32
    scf.if %2 {
      %cst_10 = arith.constant 0.000000e+00 : f32
      %12 = vector.broadcast %cst_10 : f32 to vector<32x128xf32>
      %c0_11 = arith.constant 0 : index
      %c0_12 = arith.constant 0 : index
      %13 = vector.load %arg7[%c0_11, %c0_12] : memref<32x128xf32, #tpu.memory_space<vmem>>, vector<32x128xf32>
      tpu.vector_store %arg7[%c0_11, %c0_12], %12 {strides = array<i32>} : memref<32x128xf32, #tpu.memory_space<vmem>>, vector<32x128xf32>,
    } else {
    }
    %c0 = arith.constant 0 : index
    %c0_1 = arith.constant 0 : index
    %3 = vector.load %arg7[%c0, %c0_1] : memref<32x128xf32, #tpu.memory_space<vmem>>, vector<32x128xf32>
    %c0_2 = arith.constant 0 : index
    %c0_3 = arith.constant 0 : index
    %4 = vector.load %arg3[%c0_2, %c0_3] : memref<32x128xbf16, #tpu.memory_space<vmem>>, vector<32x128xbf16>
    %c0_4 = arith.constant 0 : index
    %c0_5 = arith.constant 0 : index
    %5 = vector.load %arg4[%c0_4, %c0_5] : memref<128x128xbf16, #tpu.memory_space<vmem>>, vector<128x128xbf16>
    %cst = arith.constant dense<0.000000e+00> : vector<32x128xf32>
    %6 = tpu.matmul %4, %5, %cst {dimension_numbers = #tpu.dot_dimension_numbers<[1], [0], [0], [1], [0, 0, 1, 1], [], []>} : vector<32x128xbf16>, vector<128x128xbf16>, vector<32x128xf32> -> vector<32x128xf32>
    %7 = arith.addf %3, %6 : vector<32x128xf32>
    %c0_6 = arith.constant 0 : index
    %c0_7 = arith.constant 0 : index
    %8 = vector.load %arg7[%c0_6, %c0_7] : memref<32x128xf32, #tpu.memory_space<vmem>>, vector<32x128xf32>
    tpu.vector_store %arg7[%c0_6, %c0_7], %7 {strides = array<i32>} : memref<32x128xf32, #tpu.memory_space<vmem>>, vector<32x128xf32>,
    %c0_i32_8 = arith.constant 0 : i32
    %9 = arith.cmpi eq, %arg2, %c0_i32_8 : i32
    %10 = arith.extui %9 : i1 to i32
    %c0_i32_9 = arith.constant 0 : i32
    %11 = arith.cmpi ne, %10, %c0_i32_9 : i32
    scf.if %11 {
      %c0_10 = arith.constant 0 : index
      %c0_11 = arith.constant 0 : index
      %12 = vector.load %arg7[%c0_10, %c0_11] : memref<32x128xf32, #tpu.memory_space<vmem>>, vector<32x128xf32>
      %c0_12 = arith.constant 0 : index
      %c0_13 = arith.constant 0 : index
      %13 = vector.load %arg5[%c0_12, %c0_13] : memref<1x128xf32, #tpu.memory_space<vmem>>, vector<1x128xf32>
      %14 = vector.broadcast %13 : vector<1x128xf32> to vector<32x128xf32>
      %15 = arith.addf %12, %14 : vector<32x128xf32>
      %cst_14 = arith.constant 0.000000e+00 : f32
      %16 = vector.broadcast %cst_14 : f32 to vector<32x128xf32>
      %17 = arith.maximumf %15, %16 : vector<32x128xf32>
      %18 = arith.truncf %17 : vector<32x128xf32> to vector<32x128xbf16>
      %c0_15 = arith.constant 0 : index
      %c0_16 = arith.constant 0 : index
      %19 = vector.load %arg6[%c0_15, %c0_16] : memref<32x128xbf16, #tpu.memory_space<vmem>>, vector<32x128xbf16>
      tpu.vector_store %arg6[%c0_15, %c0_16], %18 {strides = array<i32>} : memref<32x128xbf16, #tpu.memory_space<vmem>>, vector<32x128xbf16>,
    } else {
    }
    return
  }
  func.func @transform_0(%arg0: i32, %arg1: i32, %arg2: i32) -> (i32, i32) {
    %c0_i32 = arith.constant 0 : i32
    return %arg0, %arg2 : i32, i32
  }
  func.func @transform_1(%arg0: i32, %arg1: i32, %arg2: i32) -> (i32, i32) {
    %c0_i32 = arith.constant 0 : i32
    return %arg2, %arg1 : i32, i32
  }
  func.func @transform_2(%arg0: i32, %arg1: i32, %arg2: i32) -> (i32, i32) {
    %c0_i32 = arith.constant 0 : i32
    %c0_i32_0 = arith.constant 0 : i32
    return %c0_i32, %arg1 : i32, i32
  }
  func.func @transform_3(%arg0: i32, %arg1: i32, %arg2: i32) -> (i32, i32) {
    %c0_i32 = arith.constant 0 : i32
    return %arg0, %arg1 : i32, i32
  }
}

module attributes {stable_mosaic.version = 11 : i64} {
  func.func @_gemm_bias_act_kernel(%arg0: i32, %arg1: i32, %arg2: i32, %arg3: memref<64x128xbf16, #tpu.memory_space<vmem>>, %arg4: memref<128x128xbf16, #tpu.memory_space<vmem>>, %arg5: memref<1x128xf32, #tpu.memory_space<vmem>>, %arg6: memref<64x128xbf16, #tpu.memory_space<vmem>>, %arg7: memref<64x128xf32, #tpu.memory_space<vmem>>) attributes {dimension_semantics = [#tpu.dimension_semantics<parallel>, #tpu.dimension_semantics<parallel>, #tpu.dimension_semantics<arbitrary>], iteration_bounds = array<i64: 2, 1, 1>, scalar_prefetch = 0 : i64, scratch_operands = 1 : i64, tpu.core_type = #tpu.core_type<tc>, window_params = [{transform_indices = @transform_0, window_bounds = array<i64: 64, 128>}, {transform_indices = @transform_1, window_bounds = array<i64: 128, 128>}, {transform_indices = @transform_2, window_bounds = array<i64: 1, 128>}, {transform_indices = @transform_3, window_bounds = array<i64: 64, 128>}]} {
    %c0_i32 = arith.constant 0 : i32
    %0 = arith.cmpi eq, %arg2, %c0_i32 : i32
    %1 = arith.extui %0 : i1 to i32
    %c0_i32_0 = arith.constant 0 : i32
    %2 = arith.cmpi ne, %1, %c0_i32_0 : i32
    scf.if %2 {
      %cst_10 = arith.constant 0.000000e+00 : f32
      %12 = vector.broadcast %cst_10 : f32 to vector<64x128xf32>
      %c0_11 = arith.constant 0 : index
      %c0_12 = arith.constant 0 : index
      %13 = vector.load %arg7[%c0_11, %c0_12] : memref<64x128xf32, #tpu.memory_space<vmem>>, vector<64x128xf32>
      tpu.vector_store %arg7[%c0_11, %c0_12], %12 {strides = array<i32>} : memref<64x128xf32, #tpu.memory_space<vmem>>, vector<64x128xf32>,
    } else {
    }
    %c0 = arith.constant 0 : index
    %c0_1 = arith.constant 0 : index
    %3 = vector.load %arg7[%c0, %c0_1] : memref<64x128xf32, #tpu.memory_space<vmem>>, vector<64x128xf32>
    %c0_2 = arith.constant 0 : index
    %c0_3 = arith.constant 0 : index
    %4 = vector.load %arg3[%c0_2, %c0_3] : memref<64x128xbf16, #tpu.memory_space<vmem>>, vector<64x128xbf16>
    %c0_4 = arith.constant 0 : index
    %c0_5 = arith.constant 0 : index
    %5 = vector.load %arg4[%c0_4, %c0_5] : memref<128x128xbf16, #tpu.memory_space<vmem>>, vector<128x128xbf16>
    %cst = arith.constant dense<0.000000e+00> : vector<64x128xf32>
    %6 = tpu.matmul %4, %5, %cst {dimension_numbers = #tpu.dot_dimension_numbers<[1], [0], [0], [1], [0, 0, 1, 1], [], []>} : vector<64x128xbf16>, vector<128x128xbf16>, vector<64x128xf32> -> vector<64x128xf32>
    %7 = arith.addf %3, %6 : vector<64x128xf32>
    %c0_6 = arith.constant 0 : index
    %c0_7 = arith.constant 0 : index
    %8 = vector.load %arg7[%c0_6, %c0_7] : memref<64x128xf32, #tpu.memory_space<vmem>>, vector<64x128xf32>
    tpu.vector_store %arg7[%c0_6, %c0_7], %7 {strides = array<i32>} : memref<64x128xf32, #tpu.memory_space<vmem>>, vector<64x128xf32>,
    %c0_i32_8 = arith.constant 0 : i32
    %9 = arith.cmpi eq, %arg2, %c0_i32_8 : i32
    %10 = arith.extui %9 : i1 to i32
    %c0_i32_9 = arith.constant 0 : i32
    %11 = arith.cmpi ne, %10, %c0_i32_9 : i32
    scf.if %11 {
      %c0_10 = arith.constant 0 : index
      %c0_11 = arith.constant 0 : index
      %12 = vector.load %arg7[%c0_10, %c0_11] : memref<64x128xf32, #tpu.memory_space<vmem>>, vector<64x128xf32>
      %c0_12 = arith.constant 0 : index
      %c0_13 = arith.constant 0 : index
      %13 = vector.load %arg5[%c0_12, %c0_13] : memref<1x128xf32, #tpu.memory_space<vmem>>, vector<1x128xf32>
      %14 = vector.broadcast %13 : vector<1x128xf32> to vector<64x128xf32>
      %15 = arith.addf %12, %14 : vector<64x128xf32>
      %cst_14 = arith.constant 0.000000e+00 : f32
      %16 = vector.broadcast %cst_14 : f32 to vector<64x128xf32>
      %17 = arith.maximumf %15, %16 : vector<64x128xf32>
      %18 = arith.truncf %17 : vector<64x128xf32> to vector<64x128xbf16>
      %c0_15 = arith.constant 0 : index
      %c0_16 = arith.constant 0 : index
      %19 = vector.load %arg6[%c0_15, %c0_16] : memref<64x128xbf16, #tpu.memory_space<vmem>>, vector<64x128xbf16>
      tpu.vector_store %arg6[%c0_15, %c0_16], %18 {strides = array<i32>} : memref<64x128xbf16, #tpu.memory_space<vmem>>, vector<64x128xbf16>,
    } else {
    }
    return
  }
  func.func @transform_0(%arg0: i32, %arg1: i32, %arg2: i32) -> (i32, i32) {
    %c0_i32 = arith.constant 0 : i32
    return %arg0, %arg2 : i32, i32
  }
  func.func @transform_1(%arg0: i32, %arg1: i32, %arg2: i32) -> (i32, i32) {
    %c0_i32 = arith.constant 0 : i32
    return %arg2, %arg1 : i32, i32
  }
  func.func @transform_2(%arg0: i32, %arg1: i32, %arg2: i32) -> (i32, i32) {
    %c0_i32 = arith.constant 0 : i32
    %c0_i32_0 = arith.constant 0 : i32
    return %c0_i32, %arg1 : i32, i32
  }
  func.func @transform_3(%arg0: i32, %arg1: i32, %arg2: i32) -> (i32, i32) {
    %c0_i32 = arith.constant 0 : i32
    return %arg0, %arg1 : i32, i32
  }
}

module attributes {stable_mosaic.version = 11 : i64} {
  func.func @_gemm_bias_act_kernel(%arg0: i32, %arg1: i32, %arg2: i32, %arg3: memref<256x128xbf16, #tpu.memory_space<vmem>>, %arg4: memref<128x128xbf16, #tpu.memory_space<vmem>>, %arg5: memref<1x128xf32, #tpu.memory_space<vmem>>, %arg6: memref<256x128xbf16, #tpu.memory_space<vmem>>, %arg7: memref<256x128xf32, #tpu.memory_space<vmem>>) attributes {dimension_semantics = [#tpu.dimension_semantics<parallel>, #tpu.dimension_semantics<parallel>, #tpu.dimension_semantics<arbitrary>], iteration_bounds = array<i64: 2, 1, 1>, scalar_prefetch = 0 : i64, scratch_operands = 1 : i64, tpu.core_type = #tpu.core_type<tc>, window_params = [{transform_indices = @transform_0, window_bounds = array<i64: 256, 128>}, {transform_indices = @transform_1, window_bounds = array<i64: 128, 128>}, {transform_indices = @transform_2, window_bounds = array<i64: 1, 128>}, {transform_indices = @transform_3, window_bounds = array<i64: 256, 128>}]} {
    %c0_i32 = arith.constant 0 : i32
    %0 = arith.cmpi eq, %arg2, %c0_i32 : i32
    %1 = arith.extui %0 : i1 to i32
    %c0_i32_0 = arith.constant 0 : i32
    %2 = arith.cmpi ne, %1, %c0_i32_0 : i32
    scf.if %2 {
      %cst_10 = arith.constant 0.000000e+00 : f32
      %12 = vector.broadcast %cst_10 : f32 to vector<256x128xf32>
      %c0_11 = arith.constant 0 : index
      %c0_12 = arith.constant 0 : index
      %13 = vector.load %arg7[%c0_11, %c0_12] : memref<256x128xf32, #tpu.memory_space<vmem>>, vector<256x128xf32>
      tpu.vector_store %arg7[%c0_11, %c0_12], %12 {strides = array<i32>} : memref<256x128xf32, #tpu.memory_space<vmem>>, vector<256x128xf32>,
    } else {
    }
    %c0 = arith.constant 0 : index
    %c0_1 = arith.constant 0 : index
    %3 = vector.load %arg7[%c0, %c0_1] : memref<256x128xf32, #tpu.memory_space<vmem>>, vector<256x128xf32>
    %c0_2 = arith.constant 0 : index
    %c0_3 = arith.constant 0 : index
    %4 = vector.load %arg3[%c0_2, %c0_3] : memref<256x128xbf16, #tpu.memory_space<vmem>>, vector<256x128xbf16>
    %c0_4 = arith.constant 0 : index
    %c0_5 = arith.constant 0 : index
    %5 = vector.load %arg4[%c0_4, %c0_5] : memref<128x128xbf16, #tpu.memory_space<vmem>>, vector<128x128xbf16>
    %cst = arith.constant dense<0.000000e+00> : vector<256x128xf32>
    %6 = tpu.matmul %4, %5, %cst {dimension_numbers = #tpu.dot_dimension_numbers<[1], [0], [0], [1], [0, 0, 1, 1], [], []>} : vector<256x128xbf16>, vector<128x128xbf16>, vector<256x128xf32> -> vector<256x128xf32>
    %7 = arith.addf %3, %6 : vector<256x128xf32>
    %c0_6 = arith.constant 0 : index
    %c0_7 = arith.constant 0 : index
    %8 = vector.load %arg7[%c0_6, %c0_7] : memref<256x128xf32, #tpu.memory_space<vmem>>, vector<256x128xf32>
    tpu.vector_store %arg7[%c0_6, %c0_7], %7 {strides = array<i32>} : memref<256x128xf32, #tpu.memory_space<vmem>>, vector<256x128xf32>,
    %c0_i32_8 = arith.constant 0 : i32
    %9 = arith.cmpi eq, %arg2, %c0_i32_8 : i32
    %10 = arith.extui %9 : i1 to i32
    %c0_i32_9 = arith.constant 0 : i32
    %11 = arith.cmpi ne, %10, %c0_i32_9 : i32
    scf.if %11 {
      %c0_10 = arith.constant 0 : index
      %c0_11 = arith.constant 0 : index
      %12 = vector.load %arg7[%c0_10, %c0_11] : memref<256x128xf32, #tpu.memory_space<vmem>>, vector<256x128xf32>
      %c0_12 = arith.constant 0 : index
      %c0_13 = arith.constant 0 : index
      %13 = vector.load %arg5[%c0_12, %c0_13] : memref<1x128xf32, #tpu.memory_space<vmem>>, vector<1x128xf32>
      %14 = vector.broadcast %13 : vector<1x128xf32> to vector<256x128xf32>
      %15 = arith.addf %12, %14 : vector<256x128xf32>
      %cst_14 = arith.constant 0.000000e+00 : f32
      %16 = vector.broadcast %cst_14 : f32 to vector<256x128xf32>
      %17 = arith.maximumf %15, %16 : vector<256x128xf32>
      %18 = arith.truncf %17 : vector<256x128xf32> to vector<256x128xbf16>
      %c0_15 = arith.constant 0 : index
      %c0_16 = arith.constant 0 : index
      %19 = vector.load %arg6[%c0_15, %c0_16] : memref<256x128xbf16, #tpu.memory_space<vmem>>, vector<256x128xbf16>
      tpu.vector_store %arg6[%c0_15, %c0_16], %18 {strides = array<i32>} : memref<256x128xbf16, #tpu.memory_space<vmem>>, vector<256x128xbf16>,
    } else {
    }
    return
  }
  func.func @transform_0(%arg0: i32, %arg1: i32, %arg2: i32) -> (i32, i32) {
    %c0_i32 = arith.constant 0 : i32
    return %arg0, %arg2 : i32, i32
  }
  func.func @transform_1(%arg0: i32, %arg1: i32, %arg2: i32) -> (i32, i32) {
    %c0_i32 = arith.constant 0 : i32
    return %arg2, %arg1 : i32, i32
  }
  func.func @transform_2(%arg0: i32, %arg1: i32, %arg2: i32) -> (i32, i32) {
    %c0_i32 = arith.constant 0 : i32
    %c0_i32_0 = arith.constant 0 : i32
    return %c0_i32, %arg1 : i32, i32
  }
  func.func @transform_3(%arg0: i32, %arg1: i32, %arg2: i32) -> (i32, i32) {
    %c0_i32 = arith.constant 0 : i32
    return %arg0, %arg1 : i32, i32
  }
}

module attributes {stable_mosaic.version = 11 : i64} {
  func.func @_gemm_bias_act_kernel(%arg0: i32, %arg1: i32, %arg2: i32, %arg3: memref<512x128xbf16, #tpu.memory_space<vmem>>, %arg4: memref<128x128xbf16, #tpu.memory_space<vmem>>, %arg5: memref<1x128xf32, #tpu.memory_space<vmem>>, %arg6: memref<512x128xf32, #tpu.memory_space<vmem>>, %arg7: memref<512x128xf32, #tpu.memory_space<vmem>>) attributes {dimension_semantics = [#tpu.dimension_semantics<parallel>, #tpu.dimension_semantics<parallel>, #tpu.dimension_semantics<arbitrary>], iteration_bounds = array<i64: 4, 1, 1>, scalar_prefetch = 0 : i64, scratch_operands = 1 : i64, tpu.core_type = #tpu.core_type<tc>, window_params = [{transform_indices = @transform_0, window_bounds = array<i64: 512, 128>}, {transform_indices = @transform_1, window_bounds = array<i64: 128, 128>}, {transform_indices = @transform_2, window_bounds = array<i64: 1, 128>}, {transform_indices = @transform_3, window_bounds = array<i64: 512, 128>}]} {
    %c0_i32 = arith.constant 0 : i32
    %0 = arith.cmpi eq, %arg2, %c0_i32 : i32
    %1 = arith.extui %0 : i1 to i32
    %c0_i32_0 = arith.constant 0 : i32
    %2 = arith.cmpi ne, %1, %c0_i32_0 : i32
    scf.if %2 {
      %cst_10 = arith.constant 0.000000e+00 : f32
      %12 = vector.broadcast %cst_10 : f32 to vector<512x128xf32>
      %c0_11 = arith.constant 0 : index
      %c0_12 = arith.constant 0 : index
      %13 = vector.load %arg7[%c0_11, %c0_12] : memref<512x128xf32, #tpu.memory_space<vmem>>, vector<512x128xf32>
      tpu.vector_store %arg7[%c0_11, %c0_12], %12 {strides = array<i32>} : memref<512x128xf32, #tpu.memory_space<vmem>>, vector<512x128xf32>,
    } else {
    }
    %c0 = arith.constant 0 : index
    %c0_1 = arith.constant 0 : index
    %3 = vector.load %arg7[%c0, %c0_1] : memref<512x128xf32, #tpu.memory_space<vmem>>, vector<512x128xf32>
    %c0_2 = arith.constant 0 : index
    %c0_3 = arith.constant 0 : index
    %4 = vector.load %arg3[%c0_2, %c0_3] : memref<512x128xbf16, #tpu.memory_space<vmem>>, vector<512x128xbf16>
    %c0_4 = arith.constant 0 : index
    %c0_5 = arith.constant 0 : index
    %5 = vector.load %arg4[%c0_4, %c0_5] : memref<128x128xbf16, #tpu.memory_space<vmem>>, vector<128x128xbf16>
    %cst = arith.constant dense<0.000000e+00> : vector<512x128xf32>
    %6 = tpu.matmul %4, %5, %cst {dimension_numbers = #tpu.dot_dimension_numbers<[1], [0], [0], [1], [0, 0, 1, 1], [], []>} : vector<512x128xbf16>, vector<128x128xbf16>, vector<512x128xf32> -> vector<512x128xf32>
    %7 = arith.addf %3, %6 : vector<512x128xf32>
    %c0_6 = arith.constant 0 : index
    %c0_7 = arith.constant 0 : index
    %8 = vector.load %arg7[%c0_6, %c0_7] : memref<512x128xf32, #tpu.memory_space<vmem>>, vector<512x128xf32>
    tpu.vector_store %arg7[%c0_6, %c0_7], %7 {strides = array<i32>} : memref<512x128xf32, #tpu.memory_space<vmem>>, vector<512x128xf32>,
    %c0_i32_8 = arith.constant 0 : i32
    %9 = arith.cmpi eq, %arg2, %c0_i32_8 : i32
    %10 = arith.extui %9 : i1 to i32
    %c0_i32_9 = arith.constant 0 : i32
    %11 = arith.cmpi ne, %10, %c0_i32_9 : i32
    scf.if %11 {
      %c0_10 = arith.constant 0 : index
      %c0_11 = arith.constant 0 : index
      %12 = vector.load %arg7[%c0_10, %c0_11] : memref<512x128xf32, #tpu.memory_space<vmem>>, vector<512x128xf32>
      %c0_12 = arith.constant 0 : index
      %c0_13 = arith.constant 0 : index
      %13 = vector.load %arg5[%c0_12, %c0_13] : memref<1x128xf32, #tpu.memory_space<vmem>>, vector<1x128xf32>
      %14 = vector.broadcast %13 : vector<1x128xf32> to vector<512x128xf32>
      %15 = arith.addf %12, %14 : vector<512x128xf32>
      %16 = math.tanh %15 : vector<512x128xf32>
      %c0_14 = arith.constant 0 : index
      %c0_15 = arith.constant 0 : index
      %17 = vector.load %arg6[%c0_14, %c0_15] : memref<512x128xf32, #tpu.memory_space<vmem>>, vector<512x128xf32>
      tpu.vector_store %arg6[%c0_14, %c0_15], %16 {strides = array<i32>} : memref<512x128xf32, #tpu.memory_space<vmem>>, vector<512x128xf32>,
    } else {
    }
    return
  }
  func.func @transform_0(%arg0: i32, %arg1: i32, %arg2: i32) -> (i32, i32) {
    %c0_i32 = arith.constant 0 : i32
    return %arg0, %arg2 : i32, i32
  }
  func.func @transform_1(%arg0: i32, %arg1: i32, %arg2: i32) -> (i32, i32) {
    %c0_i32 = arith.constant 0 : i32
    return %arg2, %arg1 : i32, i32
  }
  func.func @transform_2(%arg0: i32, %arg1: i32, %arg2: i32) -> (i32, i32) {
    %c0_i32 = arith.constant 0 : i32
    %c0_i32_0 = arith.constant 0 : i32
    return %c0_i32, %arg1 : i32, i32
  }
  func.func @transform_3(%arg0: i32, %arg1: i32, %arg2: i32) -> (i32, i32) {
    %c0_i32 = arith.constant 0 : i32
    return %arg0, %arg1 : i32, i32
  }
}

module attributes {stable_mosaic.version = 11 : i64} {
  func.func @_gemm_bias_act_kernel(%arg0: i32, %arg1: i32, %arg2: i32, %arg3: memref<512x128xbf16, #tpu.memory_space<vmem>>, %arg4: memref<128x128xbf16, #tpu.memory_space<vmem>>, %arg5: memref<1x128xf32, #tpu.memory_space<vmem>>, %arg6: memref<512x128xf32, #tpu.memory_space<vmem>>, %arg7: memref<512x128xf32, #tpu.memory_space<vmem>>) attributes {dimension_semantics = [#tpu.dimension_semantics<parallel>, #tpu.dimension_semantics<parallel>, #tpu.dimension_semantics<arbitrary>], iteration_bounds = array<i64: 4, 1, 1>, scalar_prefetch = 0 : i64, scratch_operands = 1 : i64, tpu.core_type = #tpu.core_type<tc>, window_params = [{transform_indices = @transform_0, window_bounds = array<i64: 512, 128>}, {transform_indices = @transform_1, window_bounds = array<i64: 128, 128>}, {transform_indices = @transform_2, window_bounds = array<i64: 1, 128>}, {transform_indices = @transform_3, window_bounds = array<i64: 512, 128>}]} {
    %c0_i32 = arith.constant 0 : i32
    %0 = arith.cmpi eq, %arg2, %c0_i32 : i32
    %1 = arith.extui %0 : i1 to i32
    %c0_i32_0 = arith.constant 0 : i32
    %2 = arith.cmpi ne, %1, %c0_i32_0 : i32
    scf.if %2 {
      %cst_10 = arith.constant 0.000000e+00 : f32
      %12 = vector.broadcast %cst_10 : f32 to vector<512x128xf32>
      %c0_11 = arith.constant 0 : index
      %c0_12 = arith.constant 0 : index
      %13 = vector.load %arg7[%c0_11, %c0_12] : memref<512x128xf32, #tpu.memory_space<vmem>>, vector<512x128xf32>
      tpu.vector_store %arg7[%c0_11, %c0_12], %12 {strides = array<i32>} : memref<512x128xf32, #tpu.memory_space<vmem>>, vector<512x128xf32>,
    } else {
    }
    %c0 = arith.constant 0 : index
    %c0_1 = arith.constant 0 : index
    %3 = vector.load %arg7[%c0, %c0_1] : memref<512x128xf32, #tpu.memory_space<vmem>>, vector<512x128xf32>
    %c0_2 = arith.constant 0 : index
    %c0_3 = arith.constant 0 : index
    %4 = vector.load %arg3[%c0_2, %c0_3] : memref<512x128xbf16, #tpu.memory_space<vmem>>, vector<512x128xbf16>
    %c0_4 = arith.constant 0 : index
    %c0_5 = arith.constant 0 : index
    %5 = vector.load %arg4[%c0_4, %c0_5] : memref<128x128xbf16, #tpu.memory_space<vmem>>, vector<128x128xbf16>
    %cst = arith.constant dense<0.000000e+00> : vector<512x128xf32>
    %6 = tpu.matmul %4, %5, %cst {dimension_numbers = #tpu.dot_dimension_numbers<[1], [0], [0], [1], [0, 0, 1, 1], [], []>} : vector<512x128xbf16>, vector<128x128xbf16>, vector<512x128xf32> -> vector<512x128xf32>
    %7 = arith.addf %3, %6 : vector<512x128xf32>
    %c0_6 = arith.constant 0 : index
    %c0_7 = arith.constant 0 : index
    %8 = vector.load %arg7[%c0_6, %c0_7] : memref<512x128xf32, #tpu.memory_space<vmem>>, vector<512x128xf32>
    tpu.vector_store %arg7[%c0_6, %c0_7], %7 {strides = array<i32>} : memref<512x128xf32, #tpu.memory_space<vmem>>, vector<512x128xf32>,
    %c0_i32_8 = arith.constant 0 : i32
    %9 = arith.cmpi eq, %arg2, %c0_i32_8 : i32
    %10 = arith.extui %9 : i1 to i32
    %c0_i32_9 = arith.constant 0 : i32
    %11 = arith.cmpi ne, %10, %c0_i32_9 : i32
    scf.if %11 {
      %c0_10 = arith.constant 0 : index
      %c0_11 = arith.constant 0 : index
      %12 = vector.load %arg7[%c0_10, %c0_11] : memref<512x128xf32, #tpu.memory_space<vmem>>, vector<512x128xf32>
      %c0_12 = arith.constant 0 : index
      %c0_13 = arith.constant 0 : index
      %13 = vector.load %arg5[%c0_12, %c0_13] : memref<1x128xf32, #tpu.memory_space<vmem>>, vector<1x128xf32>
      %14 = vector.broadcast %13 : vector<1x128xf32> to vector<512x128xf32>
      %15 = arith.addf %12, %14 : vector<512x128xf32>
      %16 = arith.negf %15 : vector<512x128xf32>
      %17 = math.exp %16 : vector<512x128xf32>
      %cst_14 = arith.constant 1.000000e+00 : f32
      %18 = vector.broadcast %cst_14 : f32 to vector<512x128xf32>
      %19 = arith.addf %18, %17 : vector<512x128xf32>
      %20 = arith.divf %18, %19 : vector<512x128xf32>
      %c0_15 = arith.constant 0 : index
      %c0_16 = arith.constant 0 : index
      %21 = vector.load %arg6[%c0_15, %c0_16] : memref<512x128xf32, #tpu.memory_space<vmem>>, vector<512x128xf32>
      tpu.vector_store %arg6[%c0_15, %c0_16], %20 {strides = array<i32>} : memref<512x128xf32, #tpu.memory_space<vmem>>, vector<512x128xf32>,
    } else {
    }
    return
  }
  func.func @transform_0(%arg0: i32, %arg1: i32, %arg2: i32) -> (i32, i32) {
    %c0_i32 = arith.constant 0 : i32
    return %arg0, %arg2 : i32, i32
  }
  func.func @transform_1(%arg0: i32, %arg1: i32, %arg2: i32) -> (i32, i32) {
    %c0_i32 = arith.constant 0 : i32
    return %arg2, %arg1 : i32, i32
  }
  func.func @transform_2(%arg0: i32, %arg1: i32, %arg2: i32) -> (i32, i32) {
    %c0_i32 = arith.constant 0 : i32
    %c0_i32_0 = arith.constant 0 : i32
    return %c0_i32, %arg1 : i32, i32
  }
  func.func @transform_3(%arg0: i32, %arg1: i32, %arg2: i32) -> (i32, i32) {
    %c0_i32 = arith.constant 0 : i32
    return %arg0, %arg1 : i32, i32
  }
}

module attributes {stable_mosaic.version = 11 : i64} {
  func.func @_fuse_sigmoid_kernel(%arg0: i32, %arg1: memref<6x3xf32, #tpu.memory_space<smem>>, %arg2: memref<3xf32, #tpu.memory_space<smem>>, %arg3: memref<6x16x128xf32, #tpu.memory_space<vmem>>, %arg4: memref<3x16x128xf32, #tpu.memory_space<vmem>>) attributes {dimension_semantics = [#tpu.dimension_semantics<parallel>], iteration_bounds = array<i64: 1>, scalar_prefetch = 0 : i64, scratch_operands = 0 : i64, tpu.core_type = #tpu.core_type<tc>, window_params = [{transform_indices = @transform_0, window_bounds = array<i64: 6, 3>}, {transform_indices = @transform_1, window_bounds = array<i64: 3>}, {transform_indices = @transform_2, window_bounds = array<i64: 6, 16, 128>}, {transform_indices = @transform_3, window_bounds = array<i64: 3, 16, 128>}]} {
    %c0 = arith.constant 0 : index
    %c0_0 = arith.constant 0 : index
    %c0_1 = arith.constant 0 : index
    %0 = vector.load %arg3[%c0, %c0_0, %c0_1] : memref<6x16x128xf32, #tpu.memory_space<vmem>>, vector<6x16x128xf32>
    %c0_2 = arith.constant 0 : index
    %1 = memref.load %arg2[%c0_2] : memref<3xf32, #tpu.memory_space<smem>>
    %2 = vector.broadcast %1 : f32 to vector<16x128xf32>
    %c0_3 = arith.constant 0 : index
    %c0_4 = arith.constant 0 : index
    %3 = memref.load %arg1[%c0_3, %c0_4] : memref<6x3xf32, #tpu.memory_space<smem>>
    %4 = vector.extract_strided_slice %0 {offsets = [0, 0, 0], sizes = [1, 16, 128], strides = [1, 1, 1]} : vector<6x16x128xf32> to vector<1x16x128xf32>
    %5 = vector.shape_cast %4 : vector<1x16x128xf32> to vector<16x128xf32>
    %6 = vector.broadcast %3 : f32 to vector<16x128xf32>
    %7 = arith.mulf %6, %5 : vector<16x128xf32>
    %8 = arith.addf %2, %7 : vector<16x128xf32>
    %c1 = arith.constant 1 : index
    %c0_5 = arith.constant 0 : index
    %9 = memref.load %arg1[%c1, %c0_5] : memref<6x3xf32, #tpu.memory_space<smem>>
    %10 = vector.extract_strided_slice %0 {offsets = [1, 0, 0], sizes = [1, 16, 128], strides = [1, 1, 1]} : vector<6x16x128xf32> to vector<1x16x128xf32>
    %11 = vector.shape_cast %10 : vector<1x16x128xf32> to vector<16x128xf32>
    %12 = vector.broadcast %9 : f32 to vector<16x128xf32>
    %13 = arith.mulf %12, %11 : vector<16x128xf32>
    %14 = arith.addf %8, %13 : vector<16x128xf32>
    %c2 = arith.constant 2 : index
    %c0_6 = arith.constant 0 : index
    %15 = memref.load %arg1[%c2, %c0_6] : memref<6x3xf32, #tpu.memory_space<smem>>
    %16 = vector.extract_strided_slice %0 {offsets = [2, 0, 0], sizes = [1, 16, 128], strides = [1, 1, 1]} : vector<6x16x128xf32> to vector<1x16x128xf32>
    %17 = vector.shape_cast %16 : vector<1x16x128xf32> to vector<16x128xf32>
    %18 = vector.broadcast %15 : f32 to vector<16x128xf32>
    %19 = arith.mulf %18, %17 : vector<16x128xf32>
    %20 = arith.addf %14, %19 : vector<16x128xf32>
    %c3 = arith.constant 3 : index
    %c0_7 = arith.constant 0 : index
    %21 = memref.load %arg1[%c3, %c0_7] : memref<6x3xf32, #tpu.memory_space<smem>>
    %22 = vector.extract_strided_slice %0 {offsets = [3, 0, 0], sizes = [1, 16, 128], strides = [1, 1, 1]} : vector<6x16x128xf32> to vector<1x16x128xf32>
    %23 = vector.shape_cast %22 : vector<1x16x128xf32> to vector<16x128xf32>
    %24 = vector.broadcast %21 : f32 to vector<16x128xf32>
    %25 = arith.mulf %24, %23 : vector<16x128xf32>
    %26 = arith.addf %20, %25 : vector<16x128xf32>
    %c4 = arith.constant 4 : index
    %c0_8 = arith.constant 0 : index
    %27 = memref.load %arg1[%c4, %c0_8] : memref<6x3xf32, #tpu.memory_space<smem>>
    %28 = vector.extract_strided_slice %0 {offsets = [4, 0, 0], sizes = [1, 16, 128], strides = [1, 1, 1]} : vector<6x16x128xf32> to vector<1x16x128xf32>
    %29 = vector.shape_cast %28 : vector<1x16x128xf32> to vector<16x128xf32>
    %30 = vector.broadcast %27 : f32 to vector<16x128xf32>
    %31 = arith.mulf %30, %29 : vector<16x128xf32>
    %32 = arith.addf %26, %31 : vector<16x128xf32>
    %c5 = arith.constant 5 : index
    %c0_9 = arith.constant 0 : index
    %33 = memref.load %arg1[%c5, %c0_9] : memref<6x3xf32, #tpu.memory_space<smem>>
    %34 = vector.extract_strided_slice %0 {offsets = [5, 0, 0], sizes = [1, 16, 128], strides = [1, 1, 1]} : vector<6x16x128xf32> to vector<1x16x128xf32>
    %35 = vector.shape_cast %34 : vector<1x16x128xf32> to vector<16x128xf32>
    %36 = vector.broadcast %33 : f32 to vector<16x128xf32>
    %37 = arith.mulf %36, %35 : vector<16x128xf32>
    %38 = arith.addf %32, %37 : vector<16x128xf32>
    %39 = arith.negf %38 : vector<16x128xf32>
    %40 = math.exp %39 : vector<16x128xf32>
    %cst = arith.constant 1.000000e+00 : f32
    %41 = vector.broadcast %cst : f32 to vector<16x128xf32>
    %42 = arith.addf %41, %40 : vector<16x128xf32>
    %43 = arith.divf %41, %42 : vector<16x128xf32>
    %c0_10 = arith.constant 0 : index
    %c0_11 = arith.constant 0 : index
    %c0_12 = arith.constant 0 : index
    %44 = vector.load %arg4[%c0_10, %c0_11, %c0_12] : memref<3x16x128xf32, #tpu.memory_space<vmem>>, vector<1x16x128xf32>
    %45 = vector.shape_cast %44 : vector<1x16x128xf32> to vector<16x128xf32>
    %46 = vector.shape_cast %43 : vector<16x128xf32> to vector<1x16x128xf32>
    tpu.vector_store %arg4[%c0_10, %c0_11, %c0_12], %46 {strides = array<i32>} : memref<3x16x128xf32, #tpu.memory_space<vmem>>, vector<1x16x128xf32>,
    %c1_13 = arith.constant 1 : index
    %47 = memref.load %arg2[%c1_13] : memref<3xf32, #tpu.memory_space<smem>>
    %48 = vector.broadcast %47 : f32 to vector<16x128xf32>
    %c0_14 = arith.constant 0 : index
    %c1_15 = arith.constant 1 : index
    %49 = memref.load %arg1[%c0_14, %c1_15] : memref<6x3xf32, #tpu.memory_space<smem>>
    %50 = vector.extract_strided_slice %0 {offsets = [0, 0, 0], sizes = [1, 16, 128], strides = [1, 1, 1]} : vector<6x16x128xf32> to vector<1x16x128xf32>
    %51 = vector.shape_cast %50 : vector<1x16x128xf32> to vector<16x128xf32>
    %52 = vector.broadcast %49 : f32 to vector<16x128xf32>
    %53 = arith.mulf %52, %51 : vector<16x128xf32>
    %54 = arith.addf %48, %53 : vector<16x128xf32>
    %c1_16 = arith.constant 1 : index
    %c1_17 = arith.constant 1 : index
    %55 = memref.load %arg1[%c1_16, %c1_17] : memref<6x3xf32, #tpu.memory_space<smem>>
    %56 = vector.extract_strided_slice %0 {offsets = [1, 0, 0], sizes = [1, 16, 128], strides = [1, 1, 1]} : vector<6x16x128xf32> to vector<1x16x128xf32>
    %57 = vector.shape_cast %56 : vector<1x16x128xf32> to vector<16x128xf32>
    %58 = vector.broadcast %55 : f32 to vector<16x128xf32>
    %59 = arith.mulf %58, %57 : vector<16x128xf32>
    %60 = arith.addf %54, %59 : vector<16x128xf32>
    %c2_18 = arith.constant 2 : index
    %c1_19 = arith.constant 1 : index
    %61 = memref.load %arg1[%c2_18, %c1_19] : memref<6x3xf32, #tpu.memory_space<smem>>
    %62 = vector.extract_strided_slice %0 {offsets = [2, 0, 0], sizes = [1, 16, 128], strides = [1, 1, 1]} : vector<6x16x128xf32> to vector<1x16x128xf32>
    %63 = vector.shape_cast %62 : vector<1x16x128xf32> to vector<16x128xf32>
    %64 = vector.broadcast %61 : f32 to vector<16x128xf32>
    %65 = arith.mulf %64, %63 : vector<16x128xf32>
    %66 = arith.addf %60, %65 : vector<16x128xf32>
    %c3_20 = arith.constant 3 : index
    %c1_21 = arith.constant 1 : index
    %67 = memref.load %arg1[%c3_20, %c1_21] : memref<6x3xf32, #tpu.memory_space<smem>>
    %68 = vector.extract_strided_slice %0 {offsets = [3, 0, 0], sizes = [1, 16, 128], strides = [1, 1, 1]} : vector<6x16x128xf32> to vector<1x16x128xf32>
    %69 = vector.shape_cast %68 : vector<1x16x128xf32> to vector<16x128xf32>
    %70 = vector.broadcast %67 : f32 to vector<16x128xf32>
    %71 = arith.mulf %70, %69 : vector<16x128xf32>
    %72 = arith.addf %66, %71 : vector<16x128xf32>
    %c4_22 = arith.constant 4 : index
    %c1_23 = arith.constant 1 : index
    %73 = memref.load %arg1[%c4_22, %c1_23] : memref<6x3xf32, #tpu.memory_space<smem>>
    %74 = vector.extract_strided_slice %0 {offsets = [4, 0, 0], sizes = [1, 16, 128], strides = [1, 1, 1]} : vector<6x16x128xf32> to vector<1x16x128xf32>
    %75 = vector.shape_cast %74 : vector<1x16x128xf32> to vector<16x128xf32>
    %76 = vector.broadcast %73 : f32 to vector<16x128xf32>
    %77 = arith.mulf %76, %75 : vector<16x128xf32>
    %78 = arith.addf %72, %77 : vector<16x128xf32>
    %c5_24 = arith.constant 5 : index
    %c1_25 = arith.constant 1 : index
    %79 = memref.load %arg1[%c5_24, %c1_25] : memref<6x3xf32, #tpu.memory_space<smem>>
    %80 = vector.extract_strided_slice %0 {offsets = [5, 0, 0], sizes = [1, 16, 128], strides = [1, 1, 1]} : vector<6x16x128xf32> to vector<1x16x128xf32>
    %81 = vector.shape_cast %80 : vector<1x16x128xf32> to vector<16x128xf32>
    %82 = vector.broadcast %79 : f32 to vector<16x128xf32>
    %83 = arith.mulf %82, %81 : vector<16x128xf32>
    %84 = arith.addf %78, %83 : vector<16x128xf32>
    %85 = arith.negf %84 : vector<16x128xf32>
    %86 = math.exp %85 : vector<16x128xf32>
    %cst_26 = arith.constant 1.000000e+00 : f32
    %87 = vector.broadcast %cst_26 : f32 to vector<16x128xf32>
    %88 = arith.addf %87, %86 : vector<16x128xf32>
    %89 = arith.divf %87, %88 : vector<16x128xf32>
    %c1_27 = arith.constant 1 : index
    %c0_28 = arith.constant 0 : index
    %c0_29 = arith.constant 0 : index
    %90 = vector.load %arg4[%c1_27, %c0_28, %c0_29] : memref<3x16x128xf32, #tpu.memory_space<vmem>>, vector<1x16x128xf32>
    %91 = vector.shape_cast %90 : vector<1x16x128xf32> to vector<16x128xf32>
    %92 = vector.shape_cast %89 : vector<16x128xf32> to vector<1x16x128xf32>
    tpu.vector_store %arg4[%c1_27, %c0_28, %c0_29], %92 {strides = array<i32>} : memref<3x16x128xf32, #tpu.memory_space<vmem>>, vector<1x16x128xf32>,
    %c2_30 = arith.constant 2 : index
    %93 = memref.load %arg2[%c2_30] : memref<3xf32, #tpu.memory_space<smem>>
    %94 = vector.broadcast %93 : f32 to vector<16x128xf32>
    %c0_31 = arith.constant 0 : index
    %c2_32 = arith.constant 2 : index
    %95 = memref.load %arg1[%c0_31, %c2_32] : memref<6x3xf32, #tpu.memory_space<smem>>
    %96 = vector.extract_strided_slice %0 {offsets = [0, 0, 0], sizes = [1, 16, 128], strides = [1, 1, 1]} : vector<6x16x128xf32> to vector<1x16x128xf32>
    %97 = vector.shape_cast %96 : vector<1x16x128xf32> to vector<16x128xf32>
    %98 = vector.broadcast %95 : f32 to vector<16x128xf32>
    %99 = arith.mulf %98, %97 : vector<16x128xf32>
    %100 = arith.addf %94, %99 : vector<16x128xf32>
    %c1_33 = arith.constant 1 : index
    %c2_34 = arith.constant 2 : index
    %101 = memref.load %arg1[%c1_33, %c2_34] : memref<6x3xf32, #tpu.memory_space<smem>>
    %102 = vector.extract_strided_slice %0 {offsets = [1, 0, 0], sizes = [1, 16, 128], strides = [1, 1, 1]} : vector<6x16x128xf32> to vector<1x16x128xf32>
    %103 = vector.shape_cast %102 : vector<1x16x128xf32> to vector<16x128xf32>
    %104 = vector.broadcast %101 : f32 to vector<16x128xf32>
    %105 = arith.mulf %104, %103 : vector<16x128xf32>
    %106 = arith.addf %100, %105 : vector<16x128xf32>
    %c2_35 = arith.constant 2 : index
    %c2_36 = arith.constant 2 : index
    %107 = memref.load %arg1[%c2_35, %c2_36] : memref<6x3xf32, #tpu.memory_space<smem>>
    %108 = vector.extract_strided_slice %0 {offsets = [2, 0, 0], sizes = [1, 16, 128], strides = [1, 1, 1]} : vector<6x16x128xf32> to vector<1x16x128xf32>
    %109 = vector.shape_cast %108 : vector<1x16x128xf32> to vector<16x128xf32>
    %110 = vector.broadcast %107 : f32 to vector<16x128xf32>
    %111 = arith.mulf %110, %109 : vector<16x128xf32>
    %112 = arith.addf %106, %111 : vector<16x128xf32>
    %c3_37 = arith.constant 3 : index
    %c2_38 = arith.constant 2 : index
    %113 = memref.load %arg1[%c3_37, %c2_38] : memref<6x3xf32, #tpu.memory_space<smem>>
    %114 = vector.extract_strided_slice %0 {offsets = [3, 0, 0], sizes = [1, 16, 128], strides = [1, 1, 1]} : vector<6x16x128xf32> to vector<1x16x128xf32>
    %115 = vector.shape_cast %114 : vector<1x16x128xf32> to vector<16x128xf32>
    %116 = vector.broadcast %113 : f32 to vector<16x128xf32>
    %117 = arith.mulf %116, %115 : vector<16x128xf32>
    %118 = arith.addf %112, %117 : vector<16x128xf32>
    %c4_39 = arith.constant 4 : index
    %c2_40 = arith.constant 2 : index
    %119 = memref.load %arg1[%c4_39, %c2_40] : memref<6x3xf32, #tpu.memory_space<smem>>
    %120 = vector.extract_strided_slice %0 {offsets = [4, 0, 0], sizes = [1, 16, 128], strides = [1, 1, 1]} : vector<6x16x128xf32> to vector<1x16x128xf32>
    %121 = vector.shape_cast %120 : vector<1x16x128xf32> to vector<16x128xf32>
    %122 = vector.broadcast %119 : f32 to vector<16x128xf32>
    %123 = arith.mulf %122, %121 : vector<16x128xf32>
    %124 = arith.addf %118, %123 : vector<16x128xf32>
    %c5_41 = arith.constant 5 : index
    %c2_42 = arith.constant 2 : index
    %125 = memref.load %arg1[%c5_41, %c2_42] : memref<6x3xf32, #tpu.memory_space<smem>>
    %126 = vector.extract_strided_slice %0 {offsets = [5, 0, 0], sizes = [1, 16, 128], strides = [1, 1, 1]} : vector<6x16x128xf32> to vector<1x16x128xf32>
    %127 = vector.shape_cast %126 : vector<1x16x128xf32> to vector<16x128xf32>
    %128 = vector.broadcast %125 : f32 to vector<16x128xf32>
    %129 = arith.mulf %128, %127 : vector<16x128xf32>
    %130 = arith.addf %124, %129 : vector<16x128xf32>
    %131 = arith.negf %130 : vector<16x128xf32>
    %132 = math.exp %131 : vector<16x128xf32>
    %cst_43 = arith.constant 1.000000e+00 : f32
    %133 = vector.broadcast %cst_43 : f32 to vector<16x128xf32>
    %134 = arith.addf %133, %132 : vector<16x128xf32>
    %135 = arith.divf %133, %134 : vector<16x128xf32>
    %c2_44 = arith.constant 2 : index
    %c0_45 = arith.constant 0 : index
    %c0_46 = arith.constant 0 : index
    %136 = vector.load %arg4[%c2_44, %c0_45, %c0_46] : memref<3x16x128xf32, #tpu.memory_space<vmem>>, vector<1x16x128xf32>
    %137 = vector.shape_cast %136 : vector<1x16x128xf32> to vector<16x128xf32>
    %138 = vector.shape_cast %135 : vector<16x128xf32> to vector<1x16x128xf32>
    tpu.vector_store %arg4[%c2_44, %c0_45, %c0_46], %138 {strides = array<i32>} : memref<3x16x128xf32, #tpu.memory_space<vmem>>, vector<1x16x128xf32>,
    return
  }
  func.func @transform_0(%arg0: i32) -> (i32, i32) {
    %c0_i32 = arith.constant 0 : i32
    %c0_i32_0 = arith.constant 0 : i32
    %c0_i32_1 = arith.constant 0 : i32
    return %c0_i32, %c0_i32_0 : i32, i32
  }
  func.func @transform_1(%arg0: i32) -> i32 {
    %c0_i32 = arith.constant 0 : i32
    %c0_i32_0 = arith.constant 0 : i32
    return %c0_i32 : i32
  }
  func.func @transform_2(%arg0: i32) -> (i32, i32, i32) {
    %c0_i32 = arith.constant 0 : i32
    %c0_i32_0 = arith.constant 0 : i32
    %c0_i32_1 = arith.constant 0 : i32
    return %c0_i32, %arg0, %c0_i32_0 : i32, i32, i32
  }
  func.func @transform_3(%arg0: i32) -> (i32, i32, i32) {
    %c0_i32 = arith.constant 0 : i32
    %c0_i32_0 = arith.constant 0 : i32
    %c0_i32_1 = arith.constant 0 : i32
    return %c0_i32, %arg0, %c0_i32_0 : i32, i32, i32
  }
}

</mosaic_0001>

<bundles_post_ra>
// kernel: dual_motion_gan_forward.18
= control target key start
LH: loop header
LB: loop body
LE: loop exit
PB: predicated region body
PF: predicated region fallthrough
CT: control target
= control target key end

     0   :  { %s2507_s12 = smov 0   ;;  %s2509_s13 = smov 0   ;;  %s2711_s0 = inlined_call_operand.vmem [shape: bf16[1536,128], index: 0, kind: input, shape index: {}]   ;;  %s2712_s1 = inlined_call_operand.vmem [shape: bf16[128,128], index: 1, kind: input, shape index: {}]   ;;  %s2713_s2 = inlined_call_operand.vmem [shape: f32[1,128], index: 2, kind: input, shape index: {}]   ;;  %s2714_s3 = inlined_call_operand.vmem [shape: bf16[1536,128], index: 3, kind: output, shape index: {}]  }
   0x1   :  { %s2511_s14 = smov 0  }
   0x2 LB: > { %s32_s15 = sadd.s32 1, %s2481_s13  ;;  %p1896_p0 = scmp.ge.s32.totalorder %s2485_s14, 1  ;;  %s2485_s14 = sphi %s2511_s14, %s13_s14   ;;  %s2481_s13 = sphi %s2509_s13, %s2716_s13   ;;  %s2477_s12 = sphi %s2507_s12, %s2715_s12  }
   0x3   : > { %p34_p1 = scmp.ge.s32.totalorder %s32_s15, 3  ;;  %p188_p2 = scmp.lt.s32.totalorder %s2485_s14, 4 }
   0x5   : > { %s2718_s15 = smov (%p34_p1, %s32_s15), 0  ;;  %p189_p3 = pnand %p1896_p0, %p188_p2 }
   0x6   : > { %s1897_s18 = sshll.u32 (!%p189_p3), %s2477_s12, 6 }
   0x7   : > { %192 = sbr.rel (%p189_p3) target bundleno = 315 (0x13b), region = 32  ;;  %p230_p4 = scmp.lt.s32.totalorder (!%p189_p3), %s1897_s18, 191 }
   0xc   : > { %v2423_v0 = vld [vmem:[%s2712_s1 + $0x38] sm:$0xff]   ;;  %v2424_v1 = vld [vmem:[%s2712_s1 + $0x30] sm:$0xff]   ;;  %s2720_s18 = smov (!%p230_p4, %s1897_s18), 191  ;;  %v2425_v2 = vld [vmem:[%s2712_s1 + $0x28] sm:$0xff]  }
   0xd   : > { %2303 = vmatprep.subr.bf16.mxu0 %v2423_v0  ;;  %2383 = vmatprep.subr.bf16.mxu1 %v2423_v0  ;;  %s1898_s23 = sshll.u32 %s2720_s18, 2  ;;  %v2426_v3 = vld [vmem:[%s2712_s1 + $0x20] sm:$0xff]   ;;  %v2427_v6 = vld [vmem:[%s2712_s1 + $0x18] sm:$0xff]   ;;  %v2428_v7 = vld [vmem:[%s2712_s1 + $0x10] sm:$0xff]  }
   0xe   : > { %2304 = vmatpush3.bf16.msra.mxu0 %v2423_v0  ;;  %2391 = vmatpush3.bf16.msra.mxu1 %v2423_v0  ;;  %s2542_s26 = scalar_lea.vmem %s2711_s0, %s1898_s23  ;;  %v2429_v8 = vld [vmem:[%s2712_s1 + $0x8] sm:$0xff]   ;;  %v2430_v9 = vld [vmem:[%s2712_s1] sm:$0xff]   ;;  %s2609_s17 = scalar_lea.vmem %s2714_s3, %s1898_s23 }
   0xf   : > { %2305 = vmatprep.subr.bf16.mxu0 %v2424_v1  ;;  %2384 = vmatprep.subr.bf16.mxu1 %v2424_v1  ;;  %v2431_v4 = vld [vmem:[%s2542_s26] sm:$0xff]   ;;  %v2433_v10 = vld [vmem:[%s2542_s26 + $0x8] sm:$0xff]   ;;  %v2435_v12 = vld [vmem:[%s2542_s26 + $0x10] sm:$0xff]  }
  0x10   : > { %v2432_v5 = vld [vmem:[%s2542_s26 + $0x80] sm:$0xff]   ;;  %2319 = vmatprep.mubr.bf16.mxu0 %v2431_v4  ;;  %v2434_v11 = vld [vmem:[%s2542_s26 + $0x88] sm:$0xff]   ;;  %v2436_v13 = vld [vmem:[%s2542_s26 + $0x90] sm:$0xff]  }
  0x11   : > { %2351 = vmatprep.mubr.bf16.mxu1 %v2432_v5  ;;  %v2437_v14 = vld [vmem:[%s2542_s26 + $0x18] sm:$0xff]   ;;  %v2439_v16 = vld [vmem:[%s2542_s26 + $0x20] sm:$0xff]   ;;  %v2441_v18 = vld [vmem:[%s2542_s26 + $0x28] sm:$0xff]  }
  0x12   : > { %2306 = vmatpush3.bf16.msra.mxu0 %v2424_v1  ;;  %2392 = vmatpush3.bf16.msra.mxu1 %v2424_v1  ;;  %v2438_v15 = vld [vmem:[%s2542_s26 + $0x98] sm:$0xff]   ;;  %v2440_v17 = vld [vmem:[%s2542_s26 + $0xa0] sm:$0xff]   ;;  %v2442_v19 = vld [vmem:[%s2542_s26 + $0xa8] sm:$0xff]  }
  0x13   : > { %2307 = vmatprep.subr.bf16.mxu0 %v2425_v2  ;;  %2385 = vmatprep.subr.bf16.mxu1 %v2425_v2  ;;  %v2443_v20 = vld [vmem:[%s2542_s26 + $0x30] sm:$0xff]   ;;  %v2445_v22 = vld [vmem:[%s2542_s26 + $0x38] sm:$0xff]   ;;  %v2447_v24 = vld [vmem:[%s2542_s26 + $0x40] sm:$0xff]  }
  0x14   : > { %v2444_v21 = vld [vmem:[%s2542_s26 + $0xb0] sm:$0xff]   ;;  %v2446_v23 = vld [vmem:[%s2542_s26 + $0xb8] sm:$0xff]   ;;  %v2448_v25 = vld [vmem:[%s2542_s26 + $0xc0] sm:$0xff]  }
  0x15   : > { %v2449_v26 = vld [vmem:[%s2542_s26 + $0x48] sm:$0xff]   ;;  %v2451_v28 = vld [vmem:[%s2542_s26 + $0x50] sm:$0xff]   ;;  %v2453_v30 = vld [vmem:[%s2542_s26 + $0x58] sm:$0xff]  }
  0x16   : > { %2308 = vmatpush3.bf16.msra.mxu0 %v2425_v2  ;;  %2393 = vmatpush3.bf16.msra.mxu1 %v2425_v2  ;;  %v2450_v27 = vld [vmem:[%s2542_s26 + $0xc8] sm:$0xff]   ;;  %v2452_v29 = vld [vmem:[%s2542_s26 + $0xd0] sm:$0xff]   ;;  %v2454_v31 = vld [vmem:[%s2542_s26 + $0xd8] sm:$0xff]  }
  0x17   : > { %2309 = vmatprep.subr.bf16.mxu0 %v2426_v3  ;;  %2386 = vmatprep.subr.bf16.mxu1 %v2426_v3  ;;  %v2455_v32 = vld [vmem:[%s2542_s26 + $0x60] sm:$0xff]   ;;  %v2457_v34 = vld [vmem:[%s2542_s26 + $0x68] sm:$0xff]   ;;  %v2459_v36 = vld [vmem:[%s2542_s26 + $0x70] sm:$0xff]  }
  0x18   : > { %v2456_v33 = vld [vmem:[%s2542_s26 + $0xe0] sm:$0xff]   ;;  %v2458_v35 = vld [vmem:[%s2542_s26 + $0xe8] sm:$0xff]   ;;  %v2460_v37 = vld [vmem:[%s2542_s26 + $0xf0] sm:$0xff]  }
  0x19   : > { %v2461_v38 = vld [vmem:[%s2542_s26 + $0x78] sm:$0xff]   ;;  %v2594_v40 = vld [vmem:[%s2713_s2] ss:$0 sm:$0xff] }
  0x1a   : > { %2310 = vmatpush3.bf16.msra.mxu0 %v2426_v3  ;;  %2394 = vmatpush3.bf16.msra.mxu1 %v2426_v3  ;;  %v2462_v39 = vld [vmem:[%s2542_s26 + $0xf8] sm:$0xff]  }
  0x1b   : > { %2311 = vmatprep.subr.bf16.mxu0 %v2427_v6  ;;  %2387 = vmatprep.subr.bf16.mxu1 %v2427_v6 }
  0x1e   : > { %2312 = vmatpush3.bf16.msra.mxu0 %v2427_v6  ;;  %2395 = vmatpush3.bf16.msra.mxu1 %v2427_v6 }
  0x1f   : > { %2313 = vmatprep.subr.bf16.mxu0 %v2428_v7  ;;  %2388 = vmatprep.subr.bf16.mxu1 %v2428_v7 }
  0x22   : > { %2314 = vmatpush3.bf16.msra.mxu0 %v2428_v7  ;;  %2396 = vmatpush3.bf16.msra.mxu1 %v2428_v7 }
  0x23   : > { %2315 = vmatprep.subr.bf16.mxu0 %v2429_v8  ;;  %2389 = vmatprep.subr.bf16.mxu1 %v2429_v8 }
  0x26   : > { %2316 = vmatpush3.bf16.msra.mxu0 %v2429_v8  ;;  %2397 = vmatpush3.bf16.msra.mxu1 %v2429_v8 }
  0x27   : > { %2317 = vmatprep.subr.bf16.mxu0 %v2430_v9  ;;  %2390 = vmatprep.subr.bf16.mxu1 %v2430_v9 }
  0x2a   : > { %2318 = vmatpush3.bf16.msra.mxu0 %v2430_v9  ;;  %2398 = vmatpush3.bf16.msra.mxu1 %v2430_v9 }
  0x2d   : > { %2320 = vmatmul.mubr.bf16.vlgmr.msra.gmra.mxu0 %v2433_v10  ;;  %2352 = vmatmul.mubr.bf16.vlgmr.msra.gmra.mxu1 %v2434_v11 }
  0x2e   : > { %2323 = vmatprep.mubr.bf16.mxu0 %v2435_v12  ;;  %2355 = vmatprep.mubr.bf16.mxu1 %v2436_v13 }
  0x35   : > { %2324 = vmatmul.mubr.bf16.gmra.mxu0 %v2437_v14  ;;  %2356 = vmatmul.mubr.bf16.gmra.mxu1 %v2438_v15 }
  0x36   : > { %2327 = vmatprep.mubr.bf16.mxu0 %v2439_v16  ;;  %2359 = vmatprep.mubr.bf16.mxu1 %v2440_v17 }
  0x3d   : > { %2328 = vmatmul.mubr.bf16.gmra.mxu0 %v2441_v18  ;;  %2360 = vmatmul.mubr.bf16.gmra.mxu1 %v2442_v19 }
  0x3e   : > { %2331 = vmatprep.mubr.bf16.mxu0 %v2443_v20  ;;  %2363 = vmatprep.mubr.bf16.mxu1 %v2444_v21 }
  0x45   : > { %2332 = vmatmul.mubr.bf16.gmra.mxu0 %v2445_v22  ;;  %2364 = vmatmul.mubr.bf16.gmra.mxu1 %v2446_v23 }
  0x46   : > { %2335 = vmatprep.mubr.bf16.mxu0 %v2447_v24  ;;  %2367 = vmatprep.mubr.bf16.mxu1 %v2448_v25 }
  0x4d   : > { %2336 = vmatmul.mubr.bf16.gmra.mxu0 %v2449_v26  ;;  %2368 = vmatmul.mubr.bf16.gmra.mxu1 %v2450_v27 }
  0x4e   : > { %2339 = vmatprep.mubr.bf16.mxu0 %v2451_v28  ;;  %2371 = vmatprep.mubr.bf16.mxu1 %v2452_v29 }
  0x55   : > { %2340 = vmatmul.mubr.bf16.gmra.mxu0 %v2453_v30  ;;  %2372 = vmatmul.mubr.bf16.gmra.mxu1 %v2454_v31 }
  0x56   : > { %2343 = vmatprep.mubr.bf16.mxu0 %v2455_v32  ;;  %2375 = vmatprep.mubr.bf16.mxu1 %v2456_v33 }
  0x5d   : > { %2344 = vmatmul.mubr.bf16.gmra.mxu0 %v2457_v34  ;;  %2376 = vmatmul.mubr.bf16.gmra.mxu1 %v2458_v35 }
  0x5e   : > { %2347 = vmatprep.mubr.bf16.mxu0 %v2459_v36  ;;  %2379 = vmatprep.mubr.bf16.mxu1 %v2460_v37 }
  0x65   : > { %2348 = vmatmul.mubr.bf16.gmra.mxu0 %v2461_v38  ;;  %2380 = vmatmul.mubr.bf16.gmra.mxu1 %v2462_v39 }
  0xed   : > { %v2321_v41 = vpop.f32.mrf.mxu0  ;;  %v2353_v42 = vpop.f32.mrf.mxu1 }
  0xee   : > { %v1205_v43 = vadd.f32 %v2321_v41, %v2594_v40  ;;  %v1237_v44 = vadd.f32 %v2353_v42, %v2594_v40 }
  0xef   : > { %v746_v45 = vpop.f32.mrf.mxu0  ;;  %v874_v46 = vpop.f32.mrf.mxu1 }
  0xf0   : > { %vm1269_vm0 = vcmp.gt.f32.partialorder %v1205_v43, 0.0  ;;  %v1333_v47 = vmul.f32 0.2, %v1205_v43  ;;  %vm1301_vm1 = vcmp.gt.f32.partialorder %v1237_v44, 0.0  ;;  %v1365_v48 = vmul.f32 0.2, %v1237_v44 }
  0xf1   : > { %v1203_v49 = vadd.f32 %v2594_v40, %v746_v45  ;;  %v1235_v50 = vadd.f32 %v2594_v40, %v874_v46  ;;  %v2322_v51 = vpop.f32.mrf.mxu0  ;;  %v2354_v52 = vpop.f32.mrf.mxu1 }
  0xf2   : > { %v1397_v53 = vsel %vm1269_vm0, %v1205_v43, %v1333_v47  ;;  %v1206_v54 = vadd.f32 %v2322_v51, %v2594_v40  ;;  %v1238_v55 = vadd.f32 %v2354_v52, %v2594_v40  ;;  %v1429_v56 = vsel %vm1301_vm1, %v1237_v44, %v1365_v48 }
  0xf3   : > { %vm1267_vm2 = vcmp.gt.f32.partialorder %v1203_v49, 0.0  ;;  %v1331_v57 = vmul.f32 0.2, %v1203_v49  ;;  %vm1299_vm3 = vcmp.gt.f32.partialorder %v1235_v50, 0.0  ;;  %v749_v58 = vpop.f32.mrf.mxu0  ;;  %v877_v59 = vpop.f32.mrf.mxu1  ;;  %v1363_v63 = vmul.f32 0.2, %v1235_v50 }
  0xf4   : > { %vm1270_vm4 = vcmp.gt.f32.partialorder %v1206_v54, 0.0  ;;  %v1334_v60 = vmul.f32 0.2, %v1206_v54  ;;  %vm1302_vm5 = vcmp.gt.f32.partialorder %v1238_v55, 0.0  ;;  %v1366_v61 = vmul.f32 0.2, %v1238_v55 }
  0xf5   : > { %v1395_v62 = vsel %vm1267_vm2, %v1203_v49, %v1331_v57  ;;  %v1204_v0 = vadd.f32 %v2594_v40, %v749_v58  ;;  %v1236_v1 = vadd.f32 %v2594_v40, %v877_v59  ;;  %v2325_v2 = vpop.f32.mrf.mxu0  ;;  %v2357_v3 = vpop.f32.mrf.mxu1  ;;  %v1427_v15 = vsel %vm1299_vm3, %v1235_v50, %v1363_v63 }
  0xf6   : > { %v1398_v4 = vsel %vm1270_vm4, %v1206_v54, %v1334_v60  ;;  %v1430_v5 = vsel %vm1302_vm5, %v1238_v55, %v1366_v61  ;;  %v1209_v6 = vadd.f32 %v2325_v2, %v2594_v40  ;;  %v1241_v7 = vadd.f32 %v2357_v3, %v2594_v40 }
  0xf7   : > { %v2080_v8 = vpack.c.bf16 %v1398_v4, %v1397_v53  ;;  %v2160_v9 = vpack.c.bf16 %v1430_v5, %v1429_v56  ;;  %vm1268_vm6 = vcmp.gt.f32.partialorder %v1204_v0, 0.0  ;;  %v1332_v10 = vmul.f32 0.2, %v1204_v0  ;;  %v762_v11 = vpop.f32.mrf.mxu0  ;;  %v890_v12 = vpop.f32.mrf.mxu1 }
  0xf8   : > { %vm1300_vm7 = vcmp.gt.f32.partialorder %v1236_v1, 0.0  ;;  %v1364_v13 = vmul.f32 0.2, %v1236_v1  ;;  %vm1273_vm8 = vcmp.gt.f32.partialorder %v1209_v6, 0.0  ;;  %v1337_v14 = vmul.f32 0.2, %v1209_v6 }
  0xf9   : > { %2232 = vst [vmem:[%s2609_s17 + $0x8] sm:$0xff] %v2080_v8   ;;  %2248 = vst [vmem:[%s2609_s17 + $0x88] sm:$0xff] %v2160_v9   ;;  %v1396_v16 = vsel %vm1268_vm6, %v1204_v0, %v1332_v10  ;;  %v1369_v17 = vmul.f32 0.2, %v1241_v7  ;;  %v1207_v18 = vadd.f32 %v2594_v40, %v762_v11  ;;  %v2326_v19 = vpop.f32.mrf.mxu0  ;;  %v2358_v20 = vpop.f32.mrf.mxu1  ;;  %vm1305_vm9 = vcmp.gt.f32.partialorder %v1241_v7, 0.0 }
  0xfa   : > { %v2075_v21 = vpack.c.bf16 %v1396_v16, %v1395_v62  ;;  %v1428_v22 = vsel %vm1300_vm7, %v1236_v1, %v1364_v13  ;;  %v1239_v23 = vadd.f32 %v2594_v40, %v890_v12  ;;  %v1401_v25 = vsel %vm1273_vm8, %v1209_v6, %v1337_v14 }
  0xfb   : > { %v2155_v24 = vpack.c.bf16 %v1428_v22, %v1427_v15  ;;  %vm1271_vm10 = vcmp.gt.f32.partialorder %v1207_v18, 0.0  ;;  %v1335_v26 = vmul.f32 0.2, %v1207_v18  ;;  %v765_v27 = vpop.f32.mrf.mxu0  ;;  %v893_v28 = vpop.f32.mrf.mxu1  ;;  %v1210_v30 = vadd.f32 %v2326_v19, %v2594_v40 }
  0xfc   : > { %2076 = vst [vmem:[%s2609_s17] sm:$0xff] %v2075_v21   ;;  %vm1303_vm11 = vcmp.gt.f32.partialorder %v1239_v23, 0.0  ;;  %v1367_v29 = vmul.f32 0.2, %v1239_v23  ;;  %v1242_v31 = vadd.f32 %v2358_v20, %v2594_v40  ;;  %v1433_v32 = vsel %vm1305_vm9, %v1241_v7, %v1369_v17 }
  0xfd   : > { %2247 = vst [vmem:[%s2609_s17 + $0x80] sm:$0xff] %v2155_v24   ;;  %v1399_v33 = vsel %vm1271_vm10, %v1207_v18, %v1335_v26  ;;  %v1208_v34 = vadd.f32 %v2594_v40, %v765_v27  ;;  %v1240_v35 = vadd.f32 %v2594_v40, %v893_v28  ;;  %v2329_v36 = vpop.f32.mrf.mxu0  ;;  %v2361_v37 = vpop.f32.mrf.mxu1  ;;  %vm1274_vm12 = vcmp.gt.f32.partialorder %v1210_v30, 0.0 }
  0xfe   : > { %v1431_v38 = vsel %vm1303_vm11, %v1239_v23, %v1367_v29  ;;  %v1338_v39 = vmul.f32 0.2, %v1210_v30  ;;  %vm1306_vm13 = vcmp.gt.f32.partialorder %v1242_v31, 0.0  ;;  %v1370_v41 = vmul.f32 0.2, %v1242_v31 }
  0xff   : > { %vm1272_vm14 = vcmp.gt.f32.partialorder %v1208_v34, 0.0  ;;  %v1336_v42 = vmul.f32 0.2, %v1208_v34  ;;  %vm1304_vm15 = vcmp.gt.f32.partialorder %v1240_v35, 0.0  ;;  %v778_v43 = vpop.f32.mrf.mxu0  ;;  %v906_v44 = vpop.f32.mrf.mxu1  ;;  %v1368_v46 = vmul.f32 0.2, %v1240_v35 }
 0x100   : > { %v1402_v45 = vsel %vm1274_vm12, %v1210_v30, %v1338_v39  ;;  %v1213_v47 = vadd.f32 %v2329_v36, %v2594_v40  ;;  %v1245_v48 = vadd.f32 %v2361_v37, %v2594_v40  ;;  %v1434_v50 = vsel %vm1306_vm13, %v1242_v31, %v1370_v41 }
 0x101   : > { %v2090_v49 = vpack.c.bf16 %v1402_v45, %v1401_v25  ;;  %v1400_v51 = vsel %vm1272_vm14, %v1208_v34, %v1336_v42  ;;  %v1211_v52 = vadd.f32 %v2594_v40, %v778_v43  ;;  %v2330_v53 = vpop.f32.mrf.mxu0  ;;  %v2362_v54 = vpop.f32.mrf.mxu1  ;;  %v2170_v55 = vpack.c.bf16 %v1434_v50, %v1433_v32 }
 0x102   : > { %v2085_v56 = vpack.c.bf16 %v1400_v51, %v1399_v33  ;;  %v1432_v57 = vsel %vm1304_vm15, %v1240_v35, %v1368_v46  ;;  %vm1277_vm0 = vcmp.gt.f32.partialorder %v1213_v47, 0.0  ;;  %v1341_v59 = vmul.f32 0.2, %v1213_v47 }
 0x103   : > { %2234 = vst [vmem:[%s2609_s17 + $0x18] sm:$0xff] %v2090_v49   ;;  %v2165_v58 = vpack.c.bf16 %v1432_v57, %v1431_v38  ;;  %vm1309_vm1 = vcmp.gt.f32.partialorder %v1245_v48, 0.0  ;;  %v1373_v60 = vmul.f32 0.2, %v1245_v48  ;;  %v781_v61 = vpop.f32.mrf.mxu0  ;;  %v909_v62 = vpop.f32.mrf.mxu1  ;;  %2250 = vst [vmem:[%s2609_s17 + $0x98] sm:$0xff] %v2170_v55   ;;  %vm1275_vm2 = vcmp.gt.f32.partialorder %v1211_v52, 0.0 }
 0x104   : > { %2233 = vst [vmem:[%s2609_s17 + $0x10] sm:$0xff] %v2085_v56   ;;  %v1339_v63 = vmul.f32 0.2, %v1211_v52  ;;  %v1243_v0 = vadd.f32 %v2594_v40, %v906_v44  ;;  %v1214_v1 = vadd.f32 %v2330_v53, %v2594_v40  ;;  %v1405_v2 = vsel %vm1277_vm0, %v1213_v47, %v1341_v59 }
 0x105   : > { %2249 = vst [vmem:[%s2609_s17 + $0x90] sm:$0xff] %v2165_v58   ;;  %v1437_v3 = vsel %vm1309_vm1, %v1245_v48, %v1373_v60  ;;  %v1246_v4 = vadd.f32 %v2362_v54, %v2594_v40  ;;  %v1212_v5 = vadd.f32 %v2594_v40, %v781_v61  ;;  %v2333_v6 = vpop.f32.mrf.mxu0  ;;  %v2365_v7 = vpop.f32.mrf.mxu1  ;;  %v1244_v16 = vadd.f32 %v2594_v40, %v909_v62 }
 0x106   : > { %v1403_v8 = vsel %vm1275_vm2, %v1211_v52, %v1339_v63  ;;  %vm1307_vm3 = vcmp.gt.f32.partialorder %v1243_v0, 0.0  ;;  %v1371_v9 = vmul.f32 0.2, %v1243_v0  ;;  %vm1278_vm4 = vcmp.gt.f32.partialorder %v1214_v1, 0.0 }
 0x107   : > { %v1342_v10 = vmul.f32 0.2, %v1214_v1  ;;  %vm1310_vm5 = vcmp.gt.f32.partialorder %v1246_v4, 0.0  ;;  %v1374_v11 = vmul.f32 0.2, %v1246_v4  ;;  %vm1276_vm6 = vcmp.gt.f32.partialorder %v1212_v5, 0.0  ;;  %v794_v12 = vpop.f32.mrf.mxu0  ;;  %v922_v13 = vpop.f32.mrf.mxu1 }
 0x108   : > { %v1435_v14 = vsel %vm1307_vm3, %v1243_v0, %v1371_v9  ;;  %v1340_v15 = vmul.f32 0.2, %v1212_v5  ;;  %v1217_v17 = vadd.f32 %v2333_v6, %v2594_v40  ;;  %v1249_v20 = vadd.f32 %v2365_v7, %v2594_v40 }
 0x109   : > { %v1406_v18 = vsel %vm1278_vm4, %v1214_v1, %v1342_v10  ;;  %v1438_v19 = vsel %vm1310_vm5, %v1246_v4, %v1374_v11  ;;  %v1215_v21 = vadd.f32 %v2594_v40, %v794_v12  ;;  %v2334_v22 = vpop.f32.mrf.mxu0  ;;  %v2366_v23 = vpop.f32.mrf.mxu1  ;;  %vm1308_vm7 = vcmp.gt.f32.partialorder %v1244_v16, 0.0 }
 0x10a   : > { %v2100_v24 = vpack.c.bf16 %v1406_v18, %v1405_v2  ;;  %v2180_v25 = vpack.c.bf16 %v1438_v19, %v1437_v3  ;;  %v1404_v26 = vsel %vm1276_vm6, %v1212_v5, %v1340_v15  ;;  %v1372_v28 = vmul.f32 0.2, %v1244_v16 }
 0x10b   : > { %v2095_v27 = vpack.c.bf16 %v1404_v26, %v1403_v8  ;;  %vm1281_vm8 = vcmp.gt.f32.partialorder %v1217_v17, 0.0  ;;  %v1345_v29 = vmul.f32 0.2, %v1217_v17  ;;  %v797_v30 = vpop.f32.mrf.mxu0  ;;  %v925_v31 = vpop.f32.mrf.mxu1  ;;  %vm1313_vm9 = vcmp.gt.f32.partialorder %v1249_v20, 0.0 }
 0x10c   : > { %2236 = vst [vmem:[%s2609_s17 + $0x28] sm:$0xff] %v2100_v24   ;;  %2252 = vst [vmem:[%s2609_s17 + $0xa8] sm:$0xff] %v2180_v25   ;;  %v1377_v32 = vmul.f32 0.2, %v1249_v20  ;;  %vm1279_vm10 = vcmp.gt.f32.partialorder %v1215_v21, 0.0  ;;  %v1436_v34 = vsel %vm1308_vm7, %v1244_v16, %v1372_v28  ;;  %v1247_v36 = vadd.f32 %v2594_v40, %v922_v13 }
 0x10d   : > { %v1343_v33 = vmul.f32 0.2, %v1215_v21  ;;  %2235 = vst [vmem:[%s2609_s17 + $0x20] sm:$0xff] %v2095_v27   ;;  %v1409_v35 = vsel %vm1281_vm8, %v1217_v17, %v1345_v29  ;;  %v1218_v37 = vadd.f32 %v2334_v22, %v2594_v40  ;;  %v2337_v38 = vpop.f32.mrf.mxu0  ;;  %v2369_v39 = vpop.f32.mrf.mxu1  ;;  %v2175_v41 = vpack.c.bf16 %v1436_v34, %v1435_v14 }
 0x10e   : > { %v1441_v42 = vsel %vm1313_vm9, %v1249_v20, %v1377_v32  ;;  %v1250_v44 = vadd.f32 %v2366_v23, %v2594_v40  ;;  %vm1311_vm11 = vcmp.gt.f32.partialorder %v1247_v36, 0.0  ;;  %v1375_v45 = vmul.f32 0.2, %v1247_v36 }
 0x10f   : > { %v1407_v43 = vsel %vm1279_vm10, %v1215_v21, %v1343_v33  ;;  %vm1282_vm12 = vcmp.gt.f32.partialorder %v1218_v37, 0.0  ;;  %v1346_v46 = vmul.f32 0.2, %v1218_v37  ;;  %v810_v47 = vpop.f32.mrf.mxu0  ;;  %v938_v48 = vpop.f32.mrf.mxu1  ;;  %2251 = vst [vmem:[%s2609_s17 + $0xa0] sm:$0xff] %v2175_v41   ;;  %v1216_v50 = vadd.f32 %v2594_v40, %v797_v30 }
 0x110   : > { %vm1314_vm13 = vcmp.gt.f32.partialorder %v1250_v44, 0.0  ;;  %v1378_v49 = vmul.f32 0.2, %v1250_v44  ;;  %v1248_v51 = vadd.f32 %v2594_v40, %v925_v31  ;;  %v1439_v52 = vsel %vm1311_vm11, %v1247_v36, %v1375_v45 }
 0x111   : > { %v1410_v53 = vsel %vm1282_vm12, %v1218_v37, %v1346_v46  ;;  %v1221_v54 = vadd.f32 %v2337_v38, %v2594_v40  ;;  %v1253_v55 = vadd.f32 %v2369_v39, %v2594_v40  ;;  %v2338_v56 = vpop.f32.mrf.mxu0  ;;  %v2370_v57 = vpop.f32.mrf.mxu1  ;;  %vm1280_vm14 = vcmp.gt.f32.partialorder %v1216_v50, 0.0 }
 0x112   : > { %v2110_v58 = vpack.c.bf16 %v1410_v53, %v1409_v35  ;;  %v1442_v59 = vsel %vm1314_vm13, %v1250_v44, %v1378_v49  ;;  %v1344_v60 = vmul.f32 0.2, %v1216_v50  ;;  %vm1312_vm15 = vcmp.gt.f32.partialorder %v1248_v51, 0.0 }
 0x113   : > { %v2190_v61 = vpack.c.bf16 %v1442_v59, %v1441_v42  ;;  %v1376_v62 = vmul.f32 0.2, %v1248_v51  ;;  %vm1285_vm0 = vcmp.gt.f32.partialorder %v1221_v54, 0.0  ;;  %v813_v63 = vpop.f32.mrf.mxu0  ;;  %v941_v0 = vpop.f32.mrf.mxu1  ;;  %v1349_v2 = vmul.f32 0.2, %v1221_v54 }
 0x114   : > { %2238 = vst [vmem:[%s2609_s17 + $0x38] sm:$0xff] %v2110_v58   ;;  %v1408_v1 = vsel %vm1280_vm14, %v1216_v50, %v1344_v60  ;;  %vm1317_vm1 = vcmp.gt.f32.partialorder %v1253_v55, 0.0  ;;  %v1381_v3 = vmul.f32 0.2, %v1253_v55  ;;  %v1219_v6 = vadd.f32 %v2594_v40, %v810_v47 }
 0x115   : > { %2254 = vst [vmem:[%s2609_s17 + $0xb8] sm:$0xff] %v2190_v61   ;;  %v2105_v4 = vpack.c.bf16 %v1408_v1, %v1407_v43  ;;  %v1440_v5 = vsel %vm1312_vm15, %v1248_v51, %v1376_v62  ;;  %v1251_v7 = vadd.f32 %v2594_v40, %v938_v48  ;;  %v2341_v8 = vpop.f32.mrf.mxu0  ;;  %v2373_v9 = vpop.f32.mrf.mxu1  ;;  %v1413_v11 = vsel %vm1285_vm0, %v1221_v54, %v1349_v2 }
 0x116   : > { %v2185_v10 = vpack.c.bf16 %v1440_v5, %v1439_v52  ;;  %v1445_v12 = vsel %vm1317_vm1, %v1253_v55, %v1381_v3  ;;  %v1222_v13 = vadd.f32 %v2338_v56, %v2594_v40  ;;  %vm1283_vm2 = vcmp.gt.f32.partialorder %v1219_v6, 0.0 }
 0x117   : > { %2237 = vst [vmem:[%s2609_s17 + $0x30] sm:$0xff] %v2105_v4   ;;  %v1347_v14 = vmul.f32 0.2, %v1219_v6  ;;  %vm1315_vm3 = vcmp.gt.f32.partialorder %v1251_v7, 0.0  ;;  %v1379_v15 = vmul.f32 0.2, %v1251_v7  ;;  %v826_v16 = vpop.f32.mrf.mxu0  ;;  %v954_v17 = vpop.f32.mrf.mxu1  ;;  %v1254_v19 = vadd.f32 %v2370_v57, %v2594_v40 }
 0x118   : > { %2253 = vst [vmem:[%s2609_s17 + $0xb0] sm:$0xff] %v2185_v10   ;;  %vm1286_vm4 = vcmp.gt.f32.partialorder %v1222_v13, 0.0  ;;  %v1350_v18 = vmul.f32 0.2, %v1222_v13  ;;  %v1220_v20 = vadd.f32 %v2594_v40, %v813_v63  ;;  %v1252_v23 = vadd.f32 %v2594_v40, %v941_v0 }
 0x119   : > { %v1411_v21 = vsel %vm1283_vm2, %v1219_v6, %v1347_v14  ;;  %v1443_v22 = vsel %vm1315_vm3, %v1251_v7, %v1379_v15  ;;  %v1225_v24 = vadd.f32 %v2341_v8, %v2594_v40  ;;  %v2342_v25 = vpop.f32.mrf.mxu0  ;;  %v2374_v26 = vpop.f32.mrf.mxu1  ;;  %vm1318_vm5 = vcmp.gt.f32.partialorder %v1254_v19, 0.0 }
 0x11a   : > { %v1414_v27 = vsel %vm1286_vm4, %v1222_v13, %v1350_v18  ;;  %v1382_v28 = vmul.f32 0.2, %v1254_v19  ;;  %vm1284_vm6 = vcmp.gt.f32.partialorder %v1220_v20, 0.0  ;;  %v1348_v30 = vmul.f32 0.2, %v1220_v20 }
 0x11b   : > { %v2120_v29 = vpack.c.bf16 %v1414_v27, %v1413_v11  ;;  %vm1316_vm7 = vcmp.gt.f32.partialorder %v1252_v23, 0.0  ;;  %v1380_v31 = vmul.f32 0.2, %v1252_v23  ;;  %v829_v32 = vpop.f32.mrf.mxu0  ;;  %v957_v33 = vpop.f32.mrf.mxu1  ;;  %vm1289_vm8 = vcmp.gt.f32.partialorder %v1225_v24, 0.0 }
 0x11c   : > { %v1446_v34 = vsel %vm1318_vm5, %v1254_v19, %v1382_v28  ;;  %v1353_v35 = vmul.f32 0.2, %v1225_v24  ;;  %v1257_v36 = vadd.f32 %v2373_v9, %v2594_v40  ;;  %v1412_v38 = vsel %vm1284_vm6, %v1220_v20, %v1348_v30 }
 0x11d   : > { %2240 = vst [vmem:[%s2609_s17 + $0x48] sm:$0xff] %v2120_v29   ;;  %v2200_v37 = vpack.c.bf16 %v1446_v34, %v1445_v12  ;;  %v1444_v39 = vsel %vm1316_vm7, %v1252_v23, %v1380_v31  ;;  %v1223_v41 = vadd.f32 %v2594_v40, %v826_v16  ;;  %v2345_v42 = vpop.f32.mrf.mxu0  ;;  %v2377_v43 = vpop.f32.mrf.mxu1  ;;  %v2115_v44 = vpack.c.bf16 %v1412_v38, %v1411_v21 }
 0x11e   : > { %v2195_v45 = vpack.c.bf16 %v1444_v39, %v1443_v22  ;;  %v1417_v46 = vsel %vm1289_vm8, %v1225_v24, %v1353_v35  ;;  %vm1321_vm9 = vcmp.gt.f32.partialorder %v1257_v36, 0.0  ;;  %v1385_v47 = vmul.f32 0.2, %v1257_v36 }
 0x11f   : > { %2256 = vst [vmem:[%s2609_s17 + $0xc8] sm:$0xff] %v2200_v37   ;;  %vm1287_vm10 = vcmp.gt.f32.partialorder %v1223_v41, 0.0  ;;  %v1351_v48 = vmul.f32 0.2, %v1223_v41  ;;  %v1255_v49 = vadd.f32 %v2594_v40, %v954_v17  ;;  %v842_v50 = vpop.f32.mrf.mxu0  ;;  %v970_v51 = vpop.f32.mrf.mxu1  ;;  %2239 = vst [vmem:[%s2609_s17 + $0x40] sm:$0xff] %v2115_v44   ;;  %v1226_v52 = vadd.f32 %v2342_v25, %v2594_v40 }
 0x120   : > { %2255 = vst [vmem:[%s2609_s17 + $0xc0] sm:$0xff] %v2195_v45   ;;  %v1258_v53 = vadd.f32 %v2374_v26, %v2594_v40  ;;  %v1224_v54 = vadd.f32 %v2594_v40, %v829_v32  ;;  %v1256_v55 = vadd.f32 %v2594_v40, %v957_v33  ;;  %v1449_v56 = vsel %vm1321_vm9, %v1257_v36, %v1385_v47 }
 0x121   : > { %v1415_v57 = vsel %vm1287_vm10, %v1223_v41, %v1351_v48  ;;  %vm1319_vm11 = vcmp.gt.f32.partialorder %v1255_v49, 0.0  ;;  %v1383_v58 = vmul.f32 0.2, %v1255_v49  ;;  %v2346_v59 = vpop.f32.mrf.mxu0  ;;  %v2378_v60 = vpop.f32.mrf.mxu1  ;;  %vm1290_vm12 = vcmp.gt.f32.partialorder %v1226_v52, 0.0 }
 0x122   : > { %v1354_v61 = vmul.f32 0.2, %v1226_v52  ;;  %vm1322_vm13 = vcmp.gt.f32.partialorder %v1258_v53, 0.0  ;;  %v1386_v62 = vmul.f32 0.2, %v1258_v53  ;;  %vm1288_vm14 = vcmp.gt.f32.partialorder %v1224_v54, 0.0 }
 0x123   : > { %v1447_v63 = vsel %vm1319_vm11, %v1255_v49, %v1383_v58  ;;  %v1352_v0 = vmul.f32 0.2, %v1224_v54  ;;  %vm1320_vm15 = vcmp.gt.f32.partialorder %v1256_v55, 0.0  ;;  %v845_v1 = vpop.f32.mrf.mxu0  ;;  %v973_v2 = vpop.f32.mrf.mxu1  ;;  %v1384_v5 = vmul.f32 0.2, %v1256_v55 }
 0x124   : > { %v1418_v3 = vsel %vm1290_vm12, %v1226_v52, %v1354_v61  ;;  %v1450_v4 = vsel %vm1322_vm13, %v1258_v53, %v1386_v62  ;;  %v1229_v6 = vadd.f32 %v2345_v42, %v2594_v40  ;;  %v1261_v10 = vadd.f32 %v2377_v43, %v2594_v40 }
 0x125   : > { %v2130_v7 = vpack.c.bf16 %v1418_v3, %v1417_v46  ;;  %v2210_v8 = vpack.c.bf16 %v1450_v4, %v1449_v56  ;;  %v1416_v9 = vsel %vm1288_vm14, %v1224_v54, %v1352_v0  ;;  %v2349_v11 = vpop.f32.mrf.mxu0  ;;  %v2381_v12 = vpop.f32.mrf.mxu1  ;;  %v1448_v14 = vsel %vm1320_vm15, %v1256_v55, %v1384_v5 }
 0x126   : > { %v2125_v13 = vpack.c.bf16 %v1416_v9, %v1415_v57  ;;  %vm1293_vm0 = vcmp.gt.f32.partialorder %v1229_v6, 0.0  ;;  %v1357_v15 = vmul.f32 0.2, %v1229_v6  ;;  %v2205_v16 = vpack.c.bf16 %v1448_v14, %v1447_v63 }
 0x127   : > { %2242 = vst [vmem:[%s2609_s17 + $0x58] sm:$0xff] %v2130_v7   ;;  %2258 = vst [vmem:[%s2609_s17 + $0xd8] sm:$0xff] %v2210_v8   ;;  %vm1325_vm1 = vcmp.gt.f32.partialorder %v1261_v10, 0.0  ;;  %v1389_v17 = vmul.f32 0.2, %v1261_v10  ;;  %v1227_v18 = vadd.f32 %v2594_v40, %v842_v50  ;;  %v1259_v19 = vadd.f32 %v2594_v40, %v970_v51  ;;  %v858_v25 = vpop.f32.mrf.mxu0  ;;  %v986_v26 = vpop.f32.mrf.mxu1 }
 0x128   : > { %2241 = vst [vmem:[%s2609_s17 + $0x50] sm:$0xff] %v2125_v13   ;;  %v1230_v20 = vadd.f32 %v2346_v59, %v2594_v40  ;;  %v1262_v21 = vadd.f32 %v2378_v60, %v2594_v40  ;;  %2257 = vst [vmem:[%s2609_s17 + $0xd0] sm:$0xff] %v2205_v16   ;;  %v1421_v22 = vsel %vm1293_vm0, %v1229_v6, %v1357_v15 }
 0x129   : > { %vm1291_vm2 = vcmp.gt.f32.partialorder %v1227_v18, 0.0  ;;  %v1355_v23 = vmul.f32 0.2, %v1227_v18  ;;  %v1228_v24 = vadd.f32 %v2594_v40, %v845_v1  ;;  %v1453_v27 = vsel %vm1325_vm1, %v1261_v10, %v1389_v17  ;;  %v2350_v39 = vpop.f32.mrf.mxu0  ;;  %v2382_v41 = vpop.f32.mrf.mxu1 }
 0x12a   : > { %vm1323_vm3 = vcmp.gt.f32.partialorder %v1259_v19, 0.0  ;;  %vm1294_vm4 = vcmp.gt.f32.partialorder %v1230_v20, 0.0  ;;  %v1358_v28 = vmul.f32 0.2, %v1230_v20  ;;  %v1387_v29 = vmul.f32 0.2, %v1259_v19 }
 0x12b   : > { %vm1326_vm5 = vcmp.gt.f32.partialorder %v1262_v21, 0.0  ;;  %v1390_v30 = vmul.f32 0.2, %v1262_v21  ;;  %vm1292_vm6 = vcmp.gt.f32.partialorder %v1228_v24, 0.0  ;;  %v1419_v31 = vsel %vm1291_vm2, %v1227_v18, %v1355_v23  ;;  %v861_v55 = vpop.f32.mrf.mxu0  ;;  %v989_v56 = vpop.f32.mrf.mxu1 }
 0x12c   : > { %v1422_v32 = vsel %vm1294_vm4, %v1230_v20, %v1358_v28  ;;  %v1356_v33 = vmul.f32 0.2, %v1228_v24  ;;  %v1260_v34 = vadd.f32 %v2594_v40, %v973_v2  ;;  %v1233_v37 = vadd.f32 %v2349_v11, %v2594_v40 }
 0x12d   : > { %v2140_v35 = vpack.c.bf16 %v1422_v32, %v1421_v22  ;;  %v1454_v36 = vsel %vm1326_vm5, %v1262_v21, %v1390_v30  ;;  %v1265_v38 = vadd.f32 %v2381_v12, %v2594_v40  ;;  %v1451_v45 = vsel %vm1323_vm3, %v1259_v19, %v1387_v29 }
 0x12e   : > { %v2220_v42 = vpack.c.bf16 %v1454_v36, %v1453_v27  ;;  %v1420_v43 = vsel %vm1292_vm6, %v1228_v24, %v1356_v33  ;;  %vm1324_vm7 = vcmp.gt.f32.partialorder %v1260_v34, 0.0  ;;  %v1388_v44 = vmul.f32 0.2, %v1260_v34 }
 0x12f   : > { %2244 = vst [vmem:[%s2609_s17 + $0x68] sm:$0xff] %v2140_v35   ;;  %v2135_v46 = vpack.c.bf16 %v1420_v43, %v1419_v31  ;;  %vm1297_vm8 = vcmp.gt.f32.partialorder %v1233_v37, 0.0  ;;  %v1361_v47 = vmul.f32 0.2, %v1233_v37  ;;  %vm1329_vm9 = vcmp.gt.f32.partialorder %v1265_v38, 0.0 }
 0x130   : > { %2260 = vst [vmem:[%s2609_s17 + $0xe8] sm:$0xff] %v2220_v42   ;;  %v1452_v48 = vsel %vm1324_vm7, %v1260_v34, %v1388_v44  ;;  %v1393_v49 = vmul.f32 0.2, %v1265_v38  ;;  %v1231_v50 = vadd.f32 %v2594_v40, %v858_v25  ;;  %v1263_v52 = vadd.f32 %v2594_v40, %v986_v26 }
 0x131   : > { %2243 = vst [vmem:[%s2609_s17 + $0x60] sm:$0xff] %v2135_v46   ;;  %v2215_v51 = vpack.c.bf16 %v1452_v48, %v1451_v45  ;;  %v1234_v53 = vadd.f32 %v2350_v39, %v2594_v40  ;;  %v1266_v54 = vadd.f32 %v2382_v41, %v2594_v40  ;;  %v1425_v57 = vsel %vm1297_vm8, %v1233_v37, %v1361_v47 }
 0x132   : > { %v1457_v58 = vsel %vm1329_vm9, %v1265_v38, %v1393_v49  ;;  %v1359_v60 = vmul.f32 0.2, %v1231_v50  ;;  %v1232_v62 = vadd.f32 %v2594_v40, %v861_v55  ;;  %v1264_v63 = vadd.f32 %v2594_v40, %v989_v56 }
 0x133   : > { %2259 = vst [vmem:[%s2609_s17 + $0xe0] sm:$0xff] %v2215_v51   ;;  %vm1298_vm10 = vcmp.gt.f32.partialorder %v1234_v53, 0.0  ;;  %v1362_v59 = vmul.f32 0.2, %v1234_v53  ;;  %vm1330_vm11 = vcmp.gt.f32.partialorder %v1266_v54, 0.0  ;;  %vm1295_vm12 = vcmp.gt.f32.partialorder %v1231_v50, 0.0 }
 0x134   : > { %v1394_v61 = vmul.f32 0.2, %v1266_v54  ;;  %vm1327_vm13 = vcmp.gt.f32.partialorder %v1263_v52, 0.0  ;;  %v1391_v0 = vmul.f32 0.2, %v1263_v52  ;;  %vm1296_vm14 = vcmp.gt.f32.partialorder %v1232_v62, 0.0 }
 0x135   : > { %v1426_v1 = vsel %vm1298_vm10, %v1234_v53, %v1362_v59  ;;  %v1360_v4 = vmul.f32 0.2, %v1232_v62  ;;  %vm1328_vm15 = vcmp.gt.f32.partialorder %v1264_v63, 0.0  ;;  %v1392_v6 = vmul.f32 0.2, %v1264_v63 }
 0x136   : > { %v2150_v2 = vpack.c.bf16 %v1426_v1, %v1425_v57  ;;  %v1458_v3 = vsel %vm1330_vm11, %v1266_v54, %v1394_v61  ;;  %v1423_v7 = vsel %vm1295_vm12, %v1231_v50, %v1359_v60  ;;  %v1455_v9 = vsel %vm1327_vm13, %v1263_v52, %v1391_v0 }
 0x137   : > { %v2230_v5 = vpack.c.bf16 %v1458_v3, %v1457_v58  ;;  %v1424_v8 = vsel %vm1296_vm14, %v1232_v62, %v1360_v4  ;;  %v1456_v10 = vsel %vm1328_vm15, %v1264_v63, %v1392_v6 }
 0x138   : > { %2246 = vst [vmem:[%s2609_s17 + $0x78] sm:$0xff] %v2150_v2   ;;  %v2145_v40 = vpack.c.bf16 %v1424_v8, %v1423_v7  ;;  %v2225_v11 = vpack.c.bf16 %v1456_v10, %v1455_v9 }
 0x139   : > { %2262 = vst [vmem:[%s2609_s17 + $0xf8] sm:$0xff] %v2230_v5  }
 0x13a   : > { %2245 = vst [vmem:[%s2609_s17 + $0x70] sm:$0xff] %v2145_v40   ;;  %2261 = vst [vmem:[%s2609_s17 + $0xf0] sm:$0xff] %v2225_v11  }
 0x13b PF: > { %s13_s14 = sadd.s32 1, %s2485_s14   ;;  %s2715_s12 = smov %s2481_s13 }
 0x13c   : > { %p10_p5 = scmp.ge.s32.totalorder %s13_s14, 5   ;;  %s2716_s13 = smov %s2718_s15 }
 0x13e   :  { %12 = sbr.rel (!%p10_p5) target bundleno = 2 (0x2), region = 76 }

// kernel: dual_motion_gan_forward.19
= control target key start
LH: loop header
LB: loop body
LE: loop exit
PB: predicated region body
PF: predicated region fallthrough
CT: control target
= control target key end

     0   :  { %s1325_s12 = smov 0   ;;  %s1327_s13 = smov 0   ;;  %s1453_s0 = inlined_call_operand.vmem [shape: bf16[384,128], index: 0, kind: input, shape index: {}]   ;;  %s1454_s1 = inlined_call_operand.vmem [shape: bf16[128,128], index: 1, kind: input, shape index: {}]   ;;  %s1455_s2 = inlined_call_operand.vmem [shape: f32[1,128], index: 2, kind: input, shape index: {}]   ;;  %s1456_s3 = inlined_call_operand.vmem [shape: bf16[384,128], index: 3, kind: output, shape index: {}]  }
   0x1   :  { %s1329_s14 = smov 0  }
   0x2 LB: > { %s32_s15 = sadd.s32 1, %s1299_s13  ;;  %p1016_p0 = scmp.ge.s32.totalorder %s1303_s14, 1  ;;  %s1303_s14 = sphi %s1329_s14, %s13_s14   ;;  %s1299_s13 = sphi %s1327_s13, %s1458_s13   ;;  %s1295_s12 = sphi %s1325_s12, %s1457_s12  }
   0x3   : > { %p34_p1 = scmp.ge.s32.totalorder %s32_s15, 2  ;;  %p188_p2 = scmp.lt.s32.totalorder %s1303_s14, 3 }
   0x5   : > { %s1460_s15 = smov (%p34_p1, %s32_s15), 0  ;;  %p189_p3 = pnand %p1016_p0, %p188_p2 }
   0x6   : > { %s229_s18 = smul.u32 (!%p189_p3), 24, %s1295_s12 }
   0x7   : > { %192 = sbr.rel (%p189_p3) target bundleno = 271 (0x10f), region = 32 }
   0x8   : > { %p230_p4 = scmp.lt.s32.totalorder (!%p189_p3), %s229_s18, 47 }
   0xc   : > { %v1261_v0 = vld [vmem:[%s1454_s1 + $0x38] sm:$0xff]   ;;  %v1262_v1 = vld [vmem:[%s1454_s1 + $0x30] sm:$0xff]   ;;  %v1263_v2 = vld [vmem:[%s1454_s1 + $0x28] sm:$0xff]   ;;  %s1462_s18 = smov (!%p230_p4, %s229_s18), 47 }
   0xd   : > { %1181 = vmatprep.subr.bf16.mxu0 %v1261_v0  ;;  %1221 = vmatprep.subr.bf16.mxu1 %v1261_v0  ;;  %s1017_s23 = sshll.u32 %s1462_s18, 2  ;;  %v1264_v3 = vld [vmem:[%s1454_s1 + $0x20] sm:$0xff]   ;;  %v1265_v6 = vld [vmem:[%s1454_s1 + $0x18] sm:$0xff]   ;;  %v1266_v7 = vld [vmem:[%s1454_s1 + $0x10] sm:$0xff]  }
   0xe   : > { %1182 = vmatpush3.bf16.msra.mxu0 %v1261_v0  ;;  %1229 = vmatpush3.bf16.msra.mxu1 %v1261_v0  ;;  %s1363_s28 = scalar_lea.vmem %s1453_s0, %s1017_s23  ;;  %v1267_v8 = vld [vmem:[%s1454_s1 + $0x8] sm:$0xff]   ;;  %v1268_v9 = vld [vmem:[%s1454_s1] sm:$0xff]   ;;  %s1407_s17 = scalar_lea.vmem %s1456_s3, %s1017_s23 }
   0xf   : > { %1183 = vmatprep.subr.bf16.mxu0 %v1262_v1  ;;  %1222 = vmatprep.subr.bf16.mxu1 %v1262_v1  ;;  %v1269_v4 = vld [vmem:[%s1363_s28] sm:$0xff]   ;;  %v1270_v5 = vld [vmem:[%s1363_s28 + $0x30] sm:$0xff]   ;;  %v1271_v10 = vld [vmem:[%s1363_s28 + $0x8] sm:$0xff]  }
  0x10   : > { %1197 = vmatprep.mubr.bf16.mxu0 %v1269_v4  ;;  %1209 = vmatprep.mubr.bf16.mxu1 %v1270_v5  ;;  %v1272_v11 = vld [vmem:[%s1363_s28 + $0x38] sm:$0xff]   ;;  %v1273_v12 = vld [vmem:[%s1363_s28 + $0x10] sm:$0xff]   ;;  %v1274_v13 = vld [vmem:[%s1363_s28 + $0x40] sm:$0xff]  }
  0x11   : > { %v1275_v14 = vld [vmem:[%s1363_s28 + $0x18] sm:$0xff]   ;;  %v1276_v15 = vld [vmem:[%s1363_s28 + $0x48] sm:$0xff]   ;;  %v1277_v16 = vld [vmem:[%s1363_s28 + $0x20] sm:$0xff]  }
  0x12   : > { %1184 = vmatpush3.bf16.msra.mxu0 %v1262_v1  ;;  %1230 = vmatpush3.bf16.msra.mxu1 %v1262_v1  ;;  %v1278_v17 = vld [vmem:[%s1363_s28 + $0x50] sm:$0xff]   ;;  %v1279_v18 = vld [vmem:[%s1363_s28 + $0x28] sm:$0xff]   ;;  %v1280_v19 = vld [vmem:[%s1363_s28 + $0x58] sm:$0xff]  }
  0x13   : > { %1185 = vmatprep.subr.bf16.mxu0 %v1263_v2  ;;  %1223 = vmatprep.subr.bf16.mxu1 %v1263_v2  ;;  %v1392_v20 = vld [vmem:[%s1455_s2] ss:$0 sm:$0xff] }
  0x16   : > { %1186 = vmatpush3.bf16.msra.mxu0 %v1263_v2  ;;  %1231 = vmatpush3.bf16.msra.mxu1 %v1263_v2 }
  0x17   : > { %1187 = vmatprep.subr.bf16.mxu0 %v1264_v3  ;;  %1224 = vmatprep.subr.bf16.mxu1 %v1264_v3 }
  0x1a   : > { %1188 = vmatpush3.bf16.msra.mxu0 %v1264_v3  ;;  %1232 = vmatpush3.bf16.msra.mxu1 %v1264_v3 }
  0x1b   : > { %1189 = vmatprep.subr.bf16.mxu0 %v1265_v6  ;;  %1225 = vmatprep.subr.bf16.mxu1 %v1265_v6 }
  0x1e   : > { %1190 = vmatpush3.bf16.msra.mxu0 %v1265_v6  ;;  %1233 = vmatpush3.bf16.msra.mxu1 %v1265_v6 }
  0x1f   : > { %1191 = vmatprep.subr.bf16.mxu0 %v1266_v7  ;;  %1226 = vmatprep.subr.bf16.mxu1 %v1266_v7 }
  0x22   : > { %1192 = vmatpush3.bf16.msra.mxu0 %v1266_v7  ;;  %1234 = vmatpush3.bf16.msra.mxu1 %v1266_v7 }
  0x23   : > { %1193 = vmatprep.subr.bf16.mxu0 %v1267_v8  ;;  %1227 = vmatprep.subr.bf16.mxu1 %v1267_v8 }
  0x26   : > { %1194 = vmatpush3.bf16.msra.mxu0 %v1267_v8  ;;  %1235 = vmatpush3.bf16.msra.mxu1 %v1267_v8 }
  0x27   : > { %1195 = vmatprep.subr.bf16.mxu0 %v1268_v9  ;;  %1228 = vmatprep.subr.bf16.mxu1 %v1268_v9 }
  0x2a   : > { %1196 = vmatpush3.bf16.msra.mxu0 %v1268_v9  ;;  %1236 = vmatpush3.bf16.msra.mxu1 %v1268_v9 }
  0x2d   : > { %1198 = vmatmul.mubr.bf16.vlgmr.msra.gmra.mxu0 %v1271_v10  ;;  %1210 = vmatmul.mubr.bf16.vlgmr.msra.gmra.mxu1 %v1272_v11 }
  0x2e   : > { %1201 = vmatprep.mubr.bf16.mxu0 %v1273_v12  ;;  %1213 = vmatprep.mubr.bf16.mxu1 %v1274_v13 }
  0x35   : > { %1202 = vmatmul.mubr.bf16.gmra.mxu0 %v1275_v14  ;;  %1214 = vmatmul.mubr.bf16.gmra.mxu1 %v1276_v15 }
  0x36   : > { %1205 = vmatprep.mubr.bf16.mxu0 %v1277_v16  ;;  %1217 = vmatprep.mubr.bf16.mxu1 %v1278_v17 }
  0x3d   : > { %1206 = vmatmul.mubr.bf16.gmra.mxu0 %v1279_v18  ;;  %1218 = vmatmul.mubr.bf16.gmra.mxu1 %v1280_v19 }
  0xed   : > { %v1199_v21 = vpop.f32.mrf.mxu0  ;;  %v1211_v22 = vpop.f32.mrf.mxu1 }
  0xee   : > { %v685_v23 = vadd.f32 %v1199_v21, %v1392_v20  ;;  %v697_v24 = vadd.f32 %v1211_v22, %v1392_v20 }
  0xef   : > { %v506_v25 = vpop.f32.mrf.mxu0  ;;  %v554_v26 = vpop.f32.mrf.mxu1 }
  0xf0   : > { %vm709_vm0 = vcmp.gt.f32.partialorder %v685_v23, 0.0  ;;  %v733_v27 = vmul.f32 0.2, %v685_v23  ;;  %vm721_vm1 = vcmp.gt.f32.partialorder %v697_v24, 0.0  ;;  %v745_v28 = vmul.f32 0.2, %v697_v24 }
  0xf1   : > { %v683_v29 = vadd.f32 %v1392_v20, %v506_v25  ;;  %v695_v30 = vadd.f32 %v1392_v20, %v554_v26  ;;  %v1200_v31 = vpop.f32.mrf.mxu0  ;;  %v1212_v32 = vpop.f32.mrf.mxu1 }
  0xf2   : > { %v757_v33 = vsel %vm709_vm0, %v685_v23, %v733_v27  ;;  %v686_v34 = vadd.f32 %v1200_v31, %v1392_v20  ;;  %v698_v35 = vadd.f32 %v1212_v32, %v1392_v20  ;;  %v769_v36 = vsel %vm721_vm1, %v697_v24, %v745_v28 }
  0xf3   : > { %vm707_vm2 = vcmp.gt.f32.partialorder %v683_v29, 0.0  ;;  %v731_v37 = vmul.f32 0.2, %v683_v29  ;;  %vm719_vm3 = vcmp.gt.f32.partialorder %v695_v30, 0.0  ;;  %v509_v38 = vpop.f32.mrf.mxu0  ;;  %v557_v39 = vpop.f32.mrf.mxu1  ;;  %v743_v43 = vmul.f32 0.2, %v695_v30 }
  0xf4   : > { %vm710_vm4 = vcmp.gt.f32.partialorder %v686_v34, 0.0  ;;  %v734_v40 = vmul.f32 0.2, %v686_v34  ;;  %vm722_vm5 = vcmp.gt.f32.partialorder %v698_v35, 0.0  ;;  %v746_v41 = vmul.f32 0.2, %v698_v35 }
  0xf5   : > { %v755_v42 = vsel %vm707_vm2, %v683_v29, %v731_v37  ;;  %v684_v44 = vadd.f32 %v1392_v20, %v509_v38  ;;  %v696_v45 = vadd.f32 %v1392_v20, %v557_v39  ;;  %v1203_v46 = vpop.f32.mrf.mxu0  ;;  %v1215_v47 = vpop.f32.mrf.mxu1  ;;  %v767_v0 = vsel %vm719_vm3, %v695_v30, %v743_v43 }
  0xf6   : > { %v758_v48 = vsel %vm710_vm4, %v686_v34, %v734_v40  ;;  %v770_v49 = vsel %vm722_vm5, %v698_v35, %v746_v41  ;;  %v689_v50 = vadd.f32 %v1203_v46, %v1392_v20  ;;  %v701_v51 = vadd.f32 %v1215_v47, %v1392_v20 }
  0xf7   : > { %v1098_v52 = vpack.c.bf16 %v758_v48, %v757_v33  ;;  %v1128_v53 = vpack.c.bf16 %v770_v49, %v769_v36  ;;  %vm708_vm6 = vcmp.gt.f32.partialorder %v684_v44, 0.0  ;;  %v732_v54 = vmul.f32 0.2, %v684_v44  ;;  %v522_v55 = vpop.f32.mrf.mxu0  ;;  %v570_v56 = vpop.f32.mrf.mxu1 }
  0xf8   : > { %vm720_vm7 = vcmp.gt.f32.partialorder %v696_v45, 0.0  ;;  %v744_v57 = vmul.f32 0.2, %v696_v45  ;;  %vm713_vm8 = vcmp.gt.f32.partialorder %v689_v50, 0.0  ;;  %v737_v58 = vmul.f32 0.2, %v689_v50 }
  0xf9   : > { %1150 = vst [vmem:[%s1407_s17 + $0x8] sm:$0xff] %v1098_v52   ;;  %1156 = vst [vmem:[%s1407_s17 + $0x38] sm:$0xff] %v1128_v53   ;;  %v756_v59 = vsel %vm708_vm6, %v684_v44, %v732_v54  ;;  %vm725_vm9 = vcmp.gt.f32.partialorder %v701_v51, 0.0  ;;  %v749_v60 = vmul.f32 0.2, %v701_v51  ;;  %v687_v61 = vadd.f32 %v1392_v20, %v522_v55  ;;  %v1204_v62 = vpop.f32.mrf.mxu0  ;;  %v1216_v63 = vpop.f32.mrf.mxu1 }
  0xfa   : > { %v1093_v1 = vpack.c.bf16 %v756_v59, %v755_v42  ;;  %v768_v2 = vsel %vm720_vm7, %v696_v45, %v744_v57  ;;  %v699_v3 = vadd.f32 %v1392_v20, %v570_v56  ;;  %v761_v8 = vsel %vm713_vm8, %v689_v50, %v737_v58 }
  0xfb   : > { %v1123_v4 = vpack.c.bf16 %v768_v2, %v767_v0  ;;  %vm711_vm10 = vcmp.gt.f32.partialorder %v687_v61, 0.0  ;;  %v735_v5 = vmul.f32 0.2, %v687_v61  ;;  %v525_v6 = vpop.f32.mrf.mxu0  ;;  %v573_v7 = vpop.f32.mrf.mxu1  ;;  %v773_v9 = vsel %vm725_vm9, %v701_v51, %v749_v60 }
  0xfc   : > { %1094 = vst [vmem:[%s1407_s17] sm:$0xff] %v1093_v1   ;;  %v690_v10 = vadd.f32 %v1204_v62, %v1392_v20  ;;  %v702_v11 = vadd.f32 %v1216_v63, %v1392_v20  ;;  %vm723_vm11 = vcmp.gt.f32.partialorder %v699_v3, 0.0  ;;  %v747_v12 = vmul.f32 0.2, %v699_v3 }
  0xfd   : > { %1155 = vst [vmem:[%s1407_s17 + $0x30] sm:$0xff] %v1123_v4   ;;  %v688_v13 = vadd.f32 %v1392_v20, %v525_v6  ;;  %v700_v14 = vadd.f32 %v1392_v20, %v573_v7  ;;  %v1207_v15 = vpop.f32.mrf.mxu0  ;;  %v1219_v16 = vpop.f32.mrf.mxu1  ;;  %v759_v17 = vsel %vm711_vm10, %v687_v61, %v735_v5 }
  0xfe   : > { %vm714_vm12 = vcmp.gt.f32.partialorder %v690_v10, 0.0  ;;  %v738_v18 = vmul.f32 0.2, %v690_v10  ;;  %vm726_vm13 = vcmp.gt.f32.partialorder %v702_v11, 0.0  ;;  %v750_v19 = vmul.f32 0.2, %v702_v11 }
  0xff   : > { %vm712_vm14 = vcmp.gt.f32.partialorder %v688_v13, 0.0  ;;  %v736_v21 = vmul.f32 0.2, %v688_v13  ;;  %vm724_vm15 = vcmp.gt.f32.partialorder %v700_v14, 0.0  ;;  %v538_v22 = vpop.f32.mrf.mxu0  ;;  %v586_v23 = vpop.f32.mrf.mxu1  ;;  %v748_v25 = vmul.f32 0.2, %v700_v14 }
 0x100   : > { %v762_v24 = vsel %vm714_vm12, %v690_v10, %v738_v18  ;;  %v693_v26 = vadd.f32 %v1207_v15, %v1392_v20  ;;  %v705_v27 = vadd.f32 %v1219_v16, %v1392_v20  ;;  %v774_v29 = vsel %vm726_vm13, %v702_v11, %v750_v19 }
 0x101   : > { %v1108_v28 = vpack.c.bf16 %v762_v24, %v761_v8  ;;  %v760_v30 = vsel %vm712_vm14, %v688_v13, %v736_v21  ;;  %v691_v31 = vadd.f32 %v1392_v20, %v538_v22  ;;  %v1208_v32 = vpop.f32.mrf.mxu0  ;;  %v1220_v33 = vpop.f32.mrf.mxu1  ;;  %v771_v34 = vsel %vm723_vm11, %v699_v3, %v747_v12 }
 0x102   : > { %v1138_v35 = vpack.c.bf16 %v774_v29, %v773_v9  ;;  %v1103_v36 = vpack.c.bf16 %v760_v30, %v759_v17  ;;  %v772_v37 = vsel %vm724_vm15, %v700_v14, %v748_v25  ;;  %vm717_vm0 = vcmp.gt.f32.partialorder %v693_v26, 0.0 }
 0x103   : > { %1152 = vst [vmem:[%s1407_s17 + $0x18] sm:$0xff] %v1108_v28   ;;  %v1133_v38 = vpack.c.bf16 %v772_v37, %v771_v34  ;;  %v741_v39 = vmul.f32 0.2, %v693_v26  ;;  %v541_v40 = vpop.f32.mrf.mxu0  ;;  %vm729_vm1 = vcmp.gt.f32.partialorder %v705_v27, 0.0  ;;  %v753_v41 = vmul.f32 0.2, %v705_v27  ;;  %v589_v47 = vpop.f32.mrf.mxu1 }
 0x104   : > { %1158 = vst [vmem:[%s1407_s17 + $0x48] sm:$0xff] %v1138_v35   ;;  %1151 = vst [vmem:[%s1407_s17 + $0x10] sm:$0xff] %v1103_v36   ;;  %v739_v42 = vmul.f32 0.2, %v691_v31  ;;  %v694_v43 = vadd.f32 %v1208_v32, %v1392_v20  ;;  %vm715_vm2 = vcmp.gt.f32.partialorder %v691_v31, 0.0  ;;  %v703_v44 = vadd.f32 %v1392_v20, %v586_v23 }
 0x105   : > { %1157 = vst [vmem:[%s1407_s17 + $0x40] sm:$0xff] %v1133_v38   ;;  %v706_v45 = vadd.f32 %v1220_v33, %v1392_v20  ;;  %v692_v46 = vadd.f32 %v1392_v20, %v541_v40  ;;  %v765_v48 = vsel %vm717_vm0, %v693_v26, %v741_v39  ;;  %v777_v51 = vsel %vm729_vm1, %v705_v27, %v753_v41 }
 0x106   : > { %vm718_vm3 = vcmp.gt.f32.partialorder %v694_v43, 0.0  ;;  %v742_v49 = vmul.f32 0.2, %v694_v43  ;;  %v763_v52 = vsel %vm715_vm2, %v691_v31, %v739_v42  ;;  %v704_v54 = vadd.f32 %v1392_v20, %v589_v47 }
 0x107   : > { %vm730_vm4 = vcmp.gt.f32.partialorder %v706_v45, 0.0  ;;  %v754_v50 = vmul.f32 0.2, %v706_v45  ;;  %vm716_vm5 = vcmp.gt.f32.partialorder %v692_v46, 0.0  ;;  %v740_v53 = vmul.f32 0.2, %v692_v46 }
 0x108   : > { %vm727_vm6 = vcmp.gt.f32.partialorder %v703_v44, 0.0  ;;  %v751_v55 = vmul.f32 0.2, %v703_v44  ;;  %v766_v56 = vsel %vm718_vm3, %v694_v43, %v742_v49  ;;  %vm728_vm7 = vcmp.gt.f32.partialorder %v704_v54, 0.0 }
 0x109   : > { %v778_v57 = vsel %vm730_vm4, %v706_v45, %v754_v50  ;;  %v1118_v58 = vpack.c.bf16 %v766_v56, %v765_v48  ;;  %v764_v60 = vsel %vm716_vm5, %v692_v46, %v740_v53  ;;  %v752_v62 = vmul.f32 0.2, %v704_v54 }
 0x10a   : > { %v1148_v59 = vpack.c.bf16 %v778_v57, %v777_v51  ;;  %v1113_v61 = vpack.c.bf16 %v764_v60, %v763_v52  ;;  %v775_v63 = vsel %vm727_vm6, %v703_v44, %v751_v55 }
 0x10b   : > { %1154 = vst [vmem:[%s1407_s17 + $0x28] sm:$0xff] %v1118_v58   ;;  %v776_v0 = vsel %vm728_vm7, %v704_v54, %v752_v62 }
 0x10c   : > { %1160 = vst [vmem:[%s1407_s17 + $0x58] sm:$0xff] %v1148_v59   ;;  %1153 = vst [vmem:[%s1407_s17 + $0x20] sm:$0xff] %v1113_v61   ;;  %v1143_v1 = vpack.c.bf16 %v776_v0, %v775_v63 }
 0x10e   : > { %1159 = vst [vmem:[%s1407_s17 + $0x50] sm:$0xff] %v1143_v1  }
 0x10f PF: > { %s13_s14 = sadd.s32 1, %s1303_s14   ;;  %s1457_s12 = smov %s1299_s13 }
 0x110   : > { %p10_p5 = scmp.ge.s32.totalorder %s13_s14, 4   ;;  %s1458_s13 = smov %s1460_s15 }
 0x112   :  { %12 = sbr.rel (!%p10_p5) target bundleno = 2 (0x2), region = 76 }

// kernel: dual_motion_gan_forward.20
= control target key start
LH: loop header
LB: loop body
LE: loop exit
PB: predicated region body
PF: predicated region fallthrough
CT: control target
= control target key end

     0   :  { %s909_s12 = smov 0   ;;  %s911_s13 = smov 0   ;;  %s1005_s0 = inlined_call_operand.vmem [shape: bf16[96,256], index: 0, kind: input, shape index: {}]   ;;  %s1006_s1 = inlined_call_operand.vmem [shape: bf16[256,128], index: 1, kind: input, shape index: {}]   ;;  %s1007_s2 = inlined_call_operand.vmem [shape: f32[1,128], index: 2, kind: input, shape index: {}]   ;;  %s1008_s3 = inlined_call_operand.vmem [shape: bf16[96,128], index: 3, kind: output, shape index: {}]  }
   0x1   :  { %s913_s14 = smov 0  }
   0x2 LB: > { %s32_s15 = sadd.s32 1, %s883_s13  ;;  %p707_p0 = scmp.ge.s32.totalorder %s887_s14, 1  ;;  %s887_s14 = sphi %s913_s14, %s13_s14   ;;  %s883_s13 = sphi %s911_s13, %s1010_s13   ;;  %s879_s12 = sphi %s909_s12, %s1009_s12  }
   0x3   : > { %p34_p1 = scmp.ge.s32.totalorder %s32_s15, 2  ;;  %p191_p2 = scmp.lt.s32.totalorder %s887_s14, 3 }
   0x5   : > { %s1012_s15 = smov (%p34_p1, %s32_s15), 0  ;;  %p192_p3 = pnand %p707_p0, %p191_p2 }
   0x6   : > { %s234_s18 = smul.u32 (!%p192_p3), 6, %s879_s12 }
   0x7   : > { %195 = sbr.rel (%p192_p3) target bundleno = 262 (0x106), region = 32 }
   0x8   : > { %p236_p4 = scmp.lt.s32.totalorder (!%p192_p3), %s234_s18, 11 }
   0xc   : > { %v840_v0 = vld [vmem:[%s1006_s1 + $0x78] sm:$0xff]   ;;  %v842_v2 = vld [vmem:[%s1006_s1 + $0x70] sm:$0xff]   ;;  %v844_v4 = vld [vmem:[%s1006_s1 + $0x68] sm:$0xff]   ;;  %s1014_s18 = smov (!%p236_p4, %s234_s18), 11 }
   0xd   : > { %v841_v1 = vld [vmem:[%s1006_s1 + $0x38] sm:$0xff]   ;;  %766 = vmatprep.subr.bf16.mxu0 %v840_v0  ;;  %800 = vmatprep.subr.bf16.mxu1 %v840_v0  ;;  %v843_v3 = vld [vmem:[%s1006_s1 + $0x30] sm:$0xff]   ;;  %v845_v5 = vld [vmem:[%s1006_s1 + $0x28] sm:$0xff]   ;;  %s742_s6 = sshll.u32 %s1014_s18, 3  ;;  %s710_s5 = sshll.u32 %s1014_s18, 2 }
   0xe   : > { %767 = vmatpush3.bf16.msra.mxu0 %v841_v1  ;;  %808 = vmatpush3.bf16.msra.mxu1 %v841_v1  ;;  %v846_v6 = vld [vmem:[%s1006_s1 + $0x60] sm:$0xff]   ;;  %v848_v8 = vld [vmem:[%s1006_s1 + $0x58] sm:$0xff]   ;;  %s960_s11 = scalar_lea.vmem %s1005_s0, %s742_s6  ;;  %v850_v10 = vld [vmem:[%s1006_s1 + $0x50] sm:$0xff]   ;;  %s265_s8 = scalar_lea.vmem %s1008_s3, %s710_s5 }
   0xf   : > { %768 = vmatprep.subr.bf16.mxu0 %v842_v2  ;;  %801 = vmatprep.subr.bf16.mxu1 %v842_v2  ;;  %v847_v7 = vld [vmem:[%s1006_s1 + $0x20] sm:$0xff]   ;;  %v849_v9 = vld [vmem:[%s1006_s1 + $0x18] sm:$0xff]   ;;  %v851_v13 = vld [vmem:[%s1006_s1 + $0x10] sm:$0xff]  }
  0x10   : > { %v858_v11 = vld [vmem:[%s960_s11 + $0x4] ss:$8 sps:$4 sm:$0xff]   ;;  %v861_v12 = vld [vmem:[%s960_s11 + $0x14] ss:$8 sps:$4 sm:$0xff]   ;;  %v856_v18 = vld [vmem:[%s960_s11] ss:$8 sps:$4 sm:$0xff]  }
  0x11   : > { %v852_v14 = vld [vmem:[%s1006_s1 + $0x48] sm:$0xff]   ;;  %480 = vmatprep.mubr.bf16.mxu0 %v858_v11  ;;  %488 = vmatprep.mubr.bf16.mxu1 %v861_v12  ;;  %v854_v16 = vld [vmem:[%s1006_s1 + $0x40] sm:$0xff]   ;;  %v859_v19 = vld [vmem:[%s960_s11 + $0x10] ss:$8 sps:$4 sm:$0xff]  }
  0x12   : > { %769 = vmatpush3.bf16.msra.mxu0 %v843_v3  ;;  %809 = vmatpush3.bf16.msra.mxu1 %v843_v3  ;;  %v853_v15 = vld [vmem:[%s1006_s1 + $0x8] sm:$0xff]   ;;  %v855_v17 = vld [vmem:[%s1006_s1] sm:$0xff]  }
  0x13   : > { %770 = vmatprep.subr.bf16.mxu0 %v844_v4  ;;  %802 = vmatprep.subr.bf16.mxu1 %v844_v4  ;;  %v862_v20 = vld [vmem:[%s960_s11 + $0x24] ss:$8 sps:$4 sm:$0xff]   ;;  %v864_v21 = vld [vmem:[%s960_s11 + $0x20] ss:$8 sps:$4 sm:$0xff]  }
  0x14   : > { %v733_v27 = vld [vmem:[%s1007_s2] ss:$0 sm:$0xff] }
  0x16   : > { %771 = vmatpush3.bf16.msra.mxu0 %v845_v5  ;;  %810 = vmatpush3.bf16.msra.mxu1 %v845_v5 }
  0x17   : > { %772 = vmatprep.subr.bf16.mxu0 %v846_v6  ;;  %803 = vmatprep.subr.bf16.mxu1 %v846_v6 }
  0x1a   : > { %773 = vmatpush3.bf16.msra.mxu0 %v847_v7  ;;  %811 = vmatpush3.bf16.msra.mxu1 %v847_v7 }
  0x1b   : > { %774 = vmatprep.subr.bf16.mxu0 %v848_v8  ;;  %804 = vmatprep.subr.bf16.mxu1 %v848_v8 }
  0x1e   : > { %775 = vmatpush3.bf16.msra.mxu0 %v849_v9  ;;  %812 = vmatpush3.bf16.msra.mxu1 %v849_v9 }
  0x1f   : > { %776 = vmatprep.subr.bf16.mxu0 %v850_v10  ;;  %805 = vmatprep.subr.bf16.mxu1 %v850_v10 }
  0x22   : > { %777 = vmatpush3.bf16.msra.mxu0 %v851_v13  ;;  %813 = vmatpush3.bf16.msra.mxu1 %v851_v13 }
  0x23   : > { %778 = vmatprep.subr.bf16.mxu0 %v852_v14  ;;  %806 = vmatprep.subr.bf16.mxu1 %v852_v14 }
  0x26   : > { %779 = vmatpush3.bf16.msra.mxu0 %v853_v15  ;;  %814 = vmatpush3.bf16.msra.mxu1 %v853_v15 }
  0x27   : > { %780 = vmatprep.subr.bf16.mxu0 %v854_v16  ;;  %807 = vmatprep.subr.bf16.mxu1 %v854_v16 }
  0x2a   : > { %781 = vmatpush3.bf16.msra.mxu0 %v855_v17  ;;  %815 = vmatpush3.bf16.msra.mxu1 %v855_v17 }
  0x2d   : > { %481 = vmatmul.mubr.bf16.vlgmr.msra.gmra.mxu0 %v856_v18  ;;  %489 = vmatmul.mubr.bf16.vlgmr.msra.gmra.mxu1 %v859_v19 }
  0x2e   : > { %496 = vmatprep.mubr.bf16.mxu1 %v862_v20 }
  0x35   : > { %497 = vmatmul.mubr.bf16.gmra.mxu1 %v864_v21 }
  0xed   : > { %v782_v22 = vpop.f32.mrf.mxu0  ;;  %v788_v23 = vpop.f32.mrf.mxu1 }
  0xef   : > { %v783_v24 = vpop.f32.mrf.mxu0  ;;  %v789_v25 = vpop.f32.mrf.mxu1 }
  0xf0   : > { %v784_v26 = vadd.f32 %v783_v24, %v782_v22  ;;  %v790_v28 = vadd.f32 %v789_v25, %v788_v23 }
  0xf1   : > { %v785_v29 = vpop.f32.mrf.mxu0  ;;  %v791_v30 = vpop.f32.mrf.mxu1 }
  0xf2   : > { %v533_v31 = vadd.f32 %v784_v26, %v733_v27  ;;  %v535_v32 = vadd.f32 %v790_v28, %v733_v27 }
  0xf3   : > { %v786_v33 = vpop.f32.mrf.mxu0  ;;  %v792_v34 = vpop.f32.mrf.mxu1 }
  0xf4   : > { %v545_v35 = vmul.f32 0.2, %v533_v31  ;;  %vm539_vm0 = vcmp.gt.f32.partialorder %v533_v31, 0.0  ;;  %v787_v36 = vadd.f32 %v786_v33, %v785_v29  ;;  %v793_v37 = vadd.f32 %v792_v34, %v791_v30 }
  0xf5   : > { %v794_v38 = vpop.f32.mrf.mxu1  ;;  %v547_v39 = vmul.f32 0.2, %v535_v32  ;;  %vm541_vm1 = vcmp.gt.f32.partialorder %v535_v32, 0.0 }
  0xf6   : > { %v534_v40 = vadd.f32 %v787_v36, %v733_v27  ;;  %v536_v41 = vadd.f32 %v793_v37, %v733_v27  ;;  %v551_v43 = vsel %vm539_vm0, %v533_v31, %v545_v35 }
  0xf7   : > { %v795_v42 = vpop.f32.mrf.mxu1  ;;  %v553_v48 = vsel %vm541_vm1, %v535_v32, %v547_v39 }
  0xf8   : > { %v796_v44 = vadd.f32 %v795_v42, %v794_v38  ;;  %vm540_vm2 = vcmp.gt.f32.partialorder %v534_v40, 0.0  ;;  %v546_v45 = vmul.f32 0.2, %v534_v40  ;;  %vm542_vm3 = vcmp.gt.f32.partialorder %v536_v41, 0.0 }
  0xf9   : > { %v548_v46 = vmul.f32 0.2, %v536_v41  ;;  %v797_v47 = vpop.f32.mrf.mxu1 }
  0xfa   : > { %v552_v49 = vsel %vm540_vm2, %v534_v40, %v546_v45  ;;  %v537_v51 = vadd.f32 %v796_v44, %v733_v27 }
  0xfb   : > { %v554_v50 = vsel %vm542_vm3, %v536_v41, %v548_v46  ;;  %v798_v52 = vpop.f32.mrf.mxu1  ;;  %v752_v53 = vpack.c.bf16 %v552_v49, %v551_v43 }
  0xfc   : > { %v757_v54 = vpack.c.bf16 %v554_v50, %v553_v48  ;;  %v799_v55 = vadd.f32 %v798_v52, %v797_v47  ;;  %v549_v56 = vmul.f32 0.2, %v537_v51  ;;  %vm543_vm4 = vcmp.gt.f32.partialorder %v537_v51, 0.0 }
  0xfd   : > { %753 = vst [vmem:[%s265_s8] sm:$0xff] %v752_v53  }
  0xfe   : > { %764 = vst [vmem:[%s265_s8 + $0x8] sm:$0xff] %v757_v54   ;;  %v538_v57 = vadd.f32 %v799_v55, %v733_v27  ;;  %v555_v59 = vsel %vm543_vm4, %v537_v51, %v549_v56 }
 0x100   : > { %vm544_vm5 = vcmp.gt.f32.partialorder %v538_v57, 0.0  ;;  %v550_v58 = vmul.f32 0.2, %v538_v57 }
 0x102   : > { %v556_v60 = vsel %vm544_vm5, %v538_v57, %v550_v58 }
 0x103   : > { %v762_v61 = vpack.c.bf16 %v556_v60, %v555_v59 }
 0x105   : > { %765 = vst [vmem:[%s265_s8 + $0x10] sm:$0xff] %v762_v61  }
 0x106 PF: > { %s13_s14 = sadd.s32 1, %s887_s14   ;;  %s1009_s12 = smov %s883_s13 }
 0x107   : > { %p10_p5 = scmp.ge.s32.totalorder %s13_s14, 4   ;;  %s1010_s13 = smov %s1012_s15 }
 0x109   :  { %12 = sbr.rel (!%p10_p5) target bundleno = 2 (0x2), region = 76 }

// kernel: dual_motion_gan_forward.21
= control target key start
LH: loop header
LB: loop body
LE: loop exit
PB: predicated region body
PF: predicated region fallthrough
CT: control target
= control target key end

     0   :  { %s455_s1 = inlined_call_operand.vmem [shape: bf16[256,128], index: 1, kind: input, shape index: {}]   ;;  %s456_s0 = inlined_call_operand.vmem [shape: bf16[24,256], index: 0, kind: input, shape index: {}]   ;;  %s457_s2 = inlined_call_operand.vmem [shape: f32[1,128], index: 2, kind: input, shape index: {}]   ;;  %s458_s3 = inlined_call_operand.vmem [shape: bf16[24,128], index: 3, kind: output, shape index: {}]  }
   0x1   :  { %v348_v0 = vld [vmem:[%s455_s1 + $0x78] sm:$0xff]   ;;  %v350_v2 = vld [vmem:[%s455_s1 + $0x70] sm:$0xff]   ;;  %v352_v4 = vld [vmem:[%s455_s1 + $0x68] sm:$0xff]  }
   0x2   :  { %v349_v1 = vld [vmem:[%s455_s1 + $0x38] sm:$0xff]   ;;  %304 = vmatprep.subr.bf16.mxu0 %v348_v0  ;;  %332 = vmatprep.subr.bf16.mxu1 %v348_v0  ;;  %v351_v3 = vld [vmem:[%s455_s1 + $0x30] sm:$0xff]   ;;  %v353_v5 = vld [vmem:[%s455_s1 + $0x28] sm:$0xff]  }
   0x3   :  { %305 = vmatpush3.bf16.msra.mxu0 %v349_v1  ;;  %340 = vmatpush3.bf16.msra.mxu1 %v349_v1  ;;  %v354_v6 = vld [vmem:[%s455_s1 + $0x60] sm:$0xff]   ;;  %v356_v8 = vld [vmem:[%s455_s1 + $0x58] sm:$0xff]   ;;  %v358_v10 = vld [vmem:[%s455_s1 + $0x50] sm:$0xff]  }
   0x4   :  { %306 = vmatprep.subr.bf16.mxu0 %v350_v2  ;;  %333 = vmatprep.subr.bf16.mxu1 %v350_v2  ;;  %v355_v7 = vld [vmem:[%s455_s1 + $0x20] sm:$0xff]   ;;  %v357_v9 = vld [vmem:[%s455_s1 + $0x18] sm:$0xff]   ;;  %v27_v12 = vld [vmem:[%s456_s0 + $0x10] sm:$0xff] }
   0x5   :  { %v366_v11 = vld [vmem:[%s456_s0 + $0x4] ss:$8 sps:$4 sm:$0xff]   ;;  %v275_v13 = vcombine.high %v27_v12, %v27_v12  ;;  %v359_v14 = vld [vmem:[%s455_s1 + $0x10] sm:$0xff]   ;;  %v364_v19 = vld [vmem:[%s456_s0] ss:$8 sps:$4 sm:$0xff]   ;;  %v274_v20 = vcombine.low %v27_v12, %v27_v12 }
   0x6   :  { %v360_v15 = vld [vmem:[%s455_s1 + $0x48] sm:$0xff]   ;;  %205 = vmatprep.mubr.bf16.mxu0 %v366_v11  ;;  %v362_v17 = vld [vmem:[%s455_s1 + $0x40] sm:$0xff]  }
   0x7   :  { %307 = vmatpush3.bf16.msra.mxu0 %v351_v3  ;;  %341 = vmatpush3.bf16.msra.mxu1 %v351_v3  ;;  %v361_v16 = vld [vmem:[%s455_s1 + $0x8] sm:$0xff]   ;;  %v363_v18 = vld [vmem:[%s455_s1] sm:$0xff]  }
   0x8   :  { %308 = vmatprep.subr.bf16.mxu0 %v352_v4  ;;  %334 = vmatprep.subr.bf16.mxu1 %v352_v4  ;;  %v292_v24 = vld [vmem:[%s457_s2] ss:$0 sm:$0xff] }
   0x9   :  { %213 = vmatprep.mubr.bf16.mxu1 %v275_v13 }
   0xb   :  { %309 = vmatpush3.bf16.msra.mxu0 %v353_v5  ;;  %342 = vmatpush3.bf16.msra.mxu1 %v353_v5 }
   0xc   :  { %310 = vmatprep.subr.bf16.mxu0 %v354_v6  ;;  %335 = vmatprep.subr.bf16.mxu1 %v354_v6 }
   0xf   :  { %311 = vmatpush3.bf16.msra.mxu0 %v355_v7  ;;  %343 = vmatpush3.bf16.msra.mxu1 %v355_v7 }
  0x10   :  { %312 = vmatprep.subr.bf16.mxu0 %v356_v8  ;;  %336 = vmatprep.subr.bf16.mxu1 %v356_v8 }
  0x13   :  { %313 = vmatpush3.bf16.msra.mxu0 %v357_v9  ;;  %344 = vmatpush3.bf16.msra.mxu1 %v357_v9 }
  0x14   :  { %314 = vmatprep.subr.bf16.mxu0 %v358_v10  ;;  %337 = vmatprep.subr.bf16.mxu1 %v358_v10 }
  0x17   :  { %315 = vmatpush3.bf16.msra.mxu0 %v359_v14  ;;  %345 = vmatpush3.bf16.msra.mxu1 %v359_v14 }
  0x18   :  { %316 = vmatprep.subr.bf16.mxu0 %v360_v15  ;;  %338 = vmatprep.subr.bf16.mxu1 %v360_v15 }
  0x1b   :  { %317 = vmatpush3.bf16.msra.mxu0 %v361_v16  ;;  %346 = vmatpush3.bf16.msra.mxu1 %v361_v16 }
  0x1c   :  { %318 = vmatprep.subr.bf16.mxu0 %v362_v17  ;;  %339 = vmatprep.subr.bf16.mxu1 %v362_v17 }
  0x1f   :  { %319 = vmatpush3.bf16.msra.mxu0 %v363_v18  ;;  %347 = vmatpush3.bf16.msra.mxu1 %v363_v18 }
  0x22   :  { %206 = vmatmul.mubr.bf16.vlgmr.msra.gmra.mxu0 %v364_v19  ;;  %214 = vmatmul.mubr.bf16.vlgmr.msra.gmra.mxu1 %v274_v20 }
  0xe2   :  { %v320_v21 = vpop.f32.mrf.mxu0  ;;  %v326_v22 = vpop.f32.mrf.mxu1 }
  0xe4   :  { %v321_v23 = vpop.f32.mrf.mxu0  ;;  %v327_v25 = vpop.f32.mrf.mxu1 }
  0xe5   :  { %v322_v26 = vadd.f32 %v321_v23, %v320_v21  ;;  %v328_v27 = vadd.f32 %v327_v25, %v326_v22 }
  0xe6   :  { %v323_v28 = vpop.f32.mrf.mxu0  ;;  %v329_v29 = vpop.f32.mrf.mxu1 }
  0xe7   :  { %v242_v30 = vadd.f32 %v328_v27, %v292_v24  ;;  %v240_v31 = vadd.f32 %v322_v26, %v292_v24 }
  0xe8   :  { %v324_v32 = vpop.f32.mrf.mxu0  ;;  %v330_v33 = vpop.f32.mrf.mxu1 }
  0xe9   :  { %vm245_vm0 = vcmp.gt.f32.partialorder %v242_v30, 0.0  ;;  %v248_v34 = vmul.f32 0.2, %v242_v30  ;;  %v325_v35 = vadd.f32 %v324_v32, %v323_v28  ;;  %v246_v37 = vmul.f32 0.2, %v240_v31 }
  0xea   :  { %vm243_vm1 = vcmp.gt.f32.partialorder %v240_v31, 0.0 }
  0xeb   :  { %v251_v36 = vsel %vm245_vm0, %v242_v30, %v248_v34  ;;  %v241_v39 = vadd.f32 %v325_v35, %v292_v24  ;;  %v249_v41 = vsel %vm243_vm1, %v240_v31, %v246_v37 }
  0xec   :  { %v298_v38 = vpack.c.bf16 %v251_v36, %v251_v36 }
  0xed   :  { %vm244_vm2 = vcmp.gt.f32.partialorder %v241_v39, 0.0  ;;  %v247_v40 = vmul.f32 0.2, %v241_v39 }
  0xee   :  { %267 = vst [vmem:[%s458_s3 + $0x8] sm:$0xf] %v298_v38 }
  0xef   :  { %v250_v42 = vsel %vm244_vm2, %v241_v39, %v247_v40 }
  0xf0   :  { %v302_v43 = vpack.c.bf16 %v250_v42, %v249_v41 }
  0xf2   :  { %303 = vst [vmem:[%s458_s3] sm:$0xff] %v302_v43  }

// kernel: dual_motion_gan_forward.22
= control target key start
LH: loop header
LB: loop body
LE: loop exit
PB: predicated region body
PF: predicated region fallthrough
CT: control target
= control target key end

     0   :  { %s614_s1 = inlined_call_operand.vmem [shape: bf16[384,128], index: 1, kind: input, shape index: {}]   ;;  %s615_s0 = inlined_call_operand.vmem [shape: bf16[24,384], index: 0, kind: input, shape index: {}]   ;;  %s616_s2 = inlined_call_operand.vmem [shape: f32[1,128], index: 2, kind: input, shape index: {}]   ;;  %s617_s3 = inlined_call_operand.vmem [shape: f32[24,128], index: 3, kind: output, shape index: {}]  }
   0x1   :  { %v464_v0 = vld [vmem:[%s614_s1 + $0x78] sm:$0xff]   ;;  %v467_v3 = vld [vmem:[%s614_s1 + $0x70] sm:$0xff]   ;;  %v470_v6 = vld [vmem:[%s614_s1 + $0x68] sm:$0xff]  }
   0x2   :  { %v465_v1 = vld [vmem:[%s614_s1 + $0xb8] sm:$0xff]   ;;  %406 = vmatprep.subr.bf16.mxu0 %v464_v0  ;;  %v468_v4 = vld [vmem:[%s614_s1 + $0xb0] sm:$0xff]   ;;  %v471_v7 = vld [vmem:[%s614_s1 + $0xa8] sm:$0xff]  }
   0x3   :  { %v466_v2 = vld [vmem:[%s614_s1 + $0x38] sm:$0xff]   ;;  %444 = vmatprep.subr.bf16.mxu1 %v465_v1  ;;  %v469_v5 = vld [vmem:[%s614_s1 + $0x30] sm:$0xff]   ;;  %v472_v8 = vld [vmem:[%s614_s1 + $0x28] sm:$0xff]  }
   0x4   :  { %407 = vmatpush3.bf16.msra.mxu0 %v466_v2  ;;  %445 = vmatpush3.bf16.msra.mxu1 %v465_v1  ;;  %v473_v9 = vld [vmem:[%s614_s1 + $0x60] sm:$0xff]   ;;  %v476_v12 = vld [vmem:[%s614_s1 + $0x58] sm:$0xff]   ;;  %v479_v15 = vld [vmem:[%s614_s1 + $0x50] sm:$0xff]  }
   0x5   :  { %408 = vmatprep.subr.bf16.mxu0 %v467_v3  ;;  %446 = vmatprep.subr.bf16.mxu1 %v468_v4  ;;  %v474_v10 = vld [vmem:[%s614_s1 + $0xa0] sm:$0xff]   ;;  %v477_v13 = vld [vmem:[%s614_s1 + $0x98] sm:$0xff]   ;;  %v480_v16 = vld [vmem:[%s614_s1 + $0x90] sm:$0xff]  }
   0x6   :  { %v475_v11 = vld [vmem:[%s614_s1 + $0x20] sm:$0xff]   ;;  %v478_v14 = vld [vmem:[%s614_s1 + $0x18] sm:$0xff]   ;;  %v481_v17 = vld [vmem:[%s614_s1 + $0x10] sm:$0xff]  }
   0x7   :  { %v482_v18 = vld [vmem:[%s614_s1 + $0x48] sm:$0xff]   ;;  %v485_v21 = vld [vmem:[%s614_s1 + $0x40] sm:$0xff]   ;;  %v29_v26 = vld [vmem:[%s615_s0 + $0x18] sm:$0xff] }
   0x8   :  { %409 = vmatpush3.bf16.msra.mxu0 %v469_v5  ;;  %447 = vmatpush3.bf16.msra.mxu1 %v468_v4  ;;  %v483_v19 = vld [vmem:[%s614_s1 + $0x88] sm:$0xff]   ;;  %v486_v22 = vld [vmem:[%s614_s1 + $0x80] sm:$0xff]   ;;  %v379_v29 = vcombine.high %v29_v26, %v29_v26  ;;  %v378_v30 = vcombine.low %v29_v26, %v29_v26 }
   0x9   :  { %410 = vmatprep.subr.bf16.mxu0 %v470_v6  ;;  %448 = vmatprep.subr.bf16.mxu1 %v471_v7  ;;  %v484_v20 = vld [vmem:[%s614_s1 + $0x8] sm:$0xff]   ;;  %v490_v23 = vld [vmem:[%s615_s0 + $0x4] ss:$12 sps:$4 sm:$0xff]   ;;  %v492_v28 = vld [vmem:[%s615_s0 + $0x20] ss:$0 sps:$4 sm:$0xff]  }
   0xa   :  { %v491_v24 = vld [vmem:[%s615_s0 + $0x8] ss:$12 sps:$4 sm:$0xff]   ;;  %282 = vmatprep.mubr.bf16.mxu0 %v490_v23  ;;  %v487_v25 = vld [vmem:[%s614_s1] sm:$0xff]  }
   0xb   :  { %460 = vmatprep.mubr.bf16.mxu1 %v491_v24  ;;  %v488_v27 = vld [vmem:[%s615_s0] ss:$12 sps:$4 sm:$0xff]  }
   0xc   :  { %411 = vmatpush3.bf16.msra.mxu0 %v472_v8  ;;  %449 = vmatpush3.bf16.msra.mxu1 %v471_v7  ;;  %v405_v36 = vld [vmem:[%s616_s2] ss:$0 sm:$0xff] }
   0xd   :  { %412 = vmatprep.subr.bf16.mxu0 %v473_v9  ;;  %450 = vmatprep.subr.bf16.mxu1 %v474_v10 }
  0x10   :  { %413 = vmatpush3.bf16.msra.mxu0 %v475_v11  ;;  %451 = vmatpush3.bf16.msra.mxu1 %v474_v10 }
  0x11   :  { %414 = vmatprep.subr.bf16.mxu0 %v476_v12  ;;  %452 = vmatprep.subr.bf16.mxu1 %v477_v13 }
  0x14   :  { %415 = vmatpush3.bf16.msra.mxu0 %v478_v14  ;;  %453 = vmatpush3.bf16.msra.mxu1 %v477_v13 }
  0x15   :  { %416 = vmatprep.subr.bf16.mxu0 %v479_v15  ;;  %454 = vmatprep.subr.bf16.mxu1 %v480_v16 }
  0x18   :  { %417 = vmatpush3.bf16.msra.mxu0 %v481_v17  ;;  %455 = vmatpush3.bf16.msra.mxu1 %v480_v16 }
  0x19   :  { %418 = vmatprep.subr.bf16.mxu0 %v482_v18  ;;  %456 = vmatprep.subr.bf16.mxu1 %v483_v19 }
  0x1c   :  { %419 = vmatpush3.bf16.msra.mxu0 %v484_v20  ;;  %457 = vmatpush3.bf16.msra.mxu1 %v483_v19 }
  0x1d   :  { %420 = vmatprep.subr.bf16.mxu0 %v485_v21  ;;  %458 = vmatprep.subr.bf16.mxu1 %v486_v22 }
  0x20   :  { %421 = vmatpush3.bf16.msra.mxu0 %v487_v25  ;;  %459 = vmatpush3.bf16.msra.mxu1 %v486_v22 }
  0x23   :  { %283 = vmatmul.mubr.bf16.vlgmr.msra.gmra.mxu0 %v488_v27  ;;  %461 = vmatmul.mubr.bf16.vlgmr.msra.gmra.mxu1 %v492_v28 }
  0x24   :  { %290 = vmatprep.mubr.bf16.mxu0 %v379_v29 }
  0x2b   :  { %291 = vmatmul.mubr.bf16.gmra.mxu0 %v378_v30 }
  0xe3   :  { %v422_v31 = vpop.f32.mrf.mxu0  ;;  %v462_v32 = vpop.f32.mrf.mxu1 }
  0xe5   :  { %v423_v33 = vpop.f32.mrf.mxu0  ;;  %v332_v34 = vpop.f32.mrf.mxu1 }
  0xe6   :  { %v424_v35 = vadd.f32 %v423_v33, %v422_v31 }
  0xe7   :  { %v425_v37 = vpop.f32.mrf.mxu0  ;;  %v463_v38 = vpop.f32.mrf.mxu1 }
  0xe8   :  { %v333_v39 = vadd.f32 %v424_v35, %v332_v34 }
  0xe9   :  { %v426_v40 = vpop.f32.mrf.mxu0  ;;  %v335_v43 = vpop.f32.mrf.mxu1 }
  0xea   :  { %v365_v41 = vadd.f32 %v405_v36, %v333_v39  ;;  %v427_v42 = vadd.f32 %v426_v40, %v425_v37 }
  0xeb   :  { %v428_v44 = vpop.f32.mrf.mxu0 }
  0xec   :  { %368 = vst [vmem:[%s617_s3] sm:$0xff] %v365_v41  ;;  %v336_v45 = vadd.f32 %v427_v42, %v335_v43 }
  0xed   :  { %v429_v46 = vpop.f32.mrf.mxu0 }
  0xee   :  { %v366_v47 = vadd.f32 %v405_v36, %v336_v45  ;;  %v430_v48 = vadd.f32 %v429_v46, %v428_v44 }
  0xef   :  { %v431_v49 = vpop.f32.mrf.mxu0 }
  0xf0   :  { %369 = vst [vmem:[%s617_s3 + $0x8] sm:$0xff] %v366_v47  ;;  %v341_v50 = vadd.f32 %v462_v32, %v430_v48 }
  0xf1   :  { %v432_v51 = vpop.f32.mrf.mxu0 }
  0xf2   :  { %v367_v52 = vadd.f32 %v405_v36, %v341_v50 }
  0xf4   :  { %370 = vst [vmem:[%s617_s3 + $0x10] sm:$0xff] %v367_v52 }

// kernel: dual_motion_gan_forward.30
= control target key start
LH: loop header
LB: loop body
LE: loop exit
PB: predicated region body
PF: predicated region fallthrough
CT: control target
= control target key end

     0   :  { %v195_v0 = vmov 0.0   ;;  %vm196_vm0 = vmmov 0   ;;  %s250_s1 = inlined_call_operand.vmem [shape: bf16[128,128], index: 1, kind: input, shape index: {}]   ;;  %s251_s0 = inlined_call_operand.vmem [shape: bf16[8,128], index: 0, kind: input, shape index: {}]   ;;  %s252_s2 = inlined_call_operand.vmem [shape: f32[1,128], index: 2, kind: input, shape index: {}]   ;;  %s253_s3 = inlined_call_operand.vmem [shape: bf16[8,128], index: 3, kind: output, shape index: {}]  }
   0x1   :  { %165 = vmatprep.subr.bf16.mxu0 %v195_v0  ;;  %v187_v1 = vld [vmem:[%s250_s1 + $0x38] sm:$0xff]   ;;  %181 = vmatprep.mubr.msk.bf16.mxu0 %vm196_vm0, %v195_v0  ;;  %v188_v2 = vld [vmem:[%s250_s1 + $0x30] sm:$0xff]   ;;  %v189_v3 = vld [vmem:[%s250_s1 + $0x28] sm:$0xff]  }
   0x2   :  { %166 = vmatpush3.bf16.msra.mxu0 %v187_v1  ;;  %v190_v4 = vld [vmem:[%s250_s1 + $0x20] sm:$0xff]   ;;  %v191_v5 = vld [vmem:[%s250_s1 + $0x18] sm:$0xff]   ;;  %v192_v6 = vld [vmem:[%s250_s1 + $0x10] sm:$0xff]  }
   0x3   :  { %167 = vmatprep.subr.bf16.mxu0 %v195_v0  ;;  %v193_v7 = vld [vmem:[%s250_s1 + $0x8] sm:$0xff]   ;;  %v194_v8 = vld [vmem:[%s250_s1] sm:$0xff]  }
   0x4   :  { %v21_v9 = vld [vmem:[%s251_s0] sm:$0xf] }
   0x5   :  { %v155_v10 = vld [vmem:[%s252_s2] ss:$0 sm:$0xff] }
   0x6   :  { %168 = vmatpush3.bf16.msra.mxu0 %v188_v2 }
   0x7   :  { %169 = vmatprep.subr.bf16.mxu0 %v195_v0 }
   0xa   :  { %170 = vmatpush3.bf16.msra.mxu0 %v189_v3 }
   0xb   :  { %171 = vmatprep.subr.bf16.mxu0 %v195_v0 }
   0xe   :  { %172 = vmatpush3.bf16.msra.mxu0 %v190_v4 }
   0xf   :  { %173 = vmatprep.subr.bf16.mxu0 %v195_v0 }
  0x12   :  { %174 = vmatpush3.bf16.msra.mxu0 %v191_v5 }
  0x13   :  { %175 = vmatprep.subr.bf16.mxu0 %v195_v0 }
  0x16   :  { %176 = vmatpush3.bf16.msra.mxu0 %v192_v6 }
  0x17   :  { %177 = vmatprep.subr.bf16.mxu0 %v195_v0 }
  0x1a   :  { %178 = vmatpush3.bf16.msra.mxu0 %v193_v7 }
  0x1b   :  { %179 = vmatprep.subr.bf16.mxu0 %v195_v0 }
  0x1e   :  { %180 = vmatpush3.bf16.msra.mxu0 %v194_v8 }
  0x21   :  { %182 = vmatmul.mubr.bf16.vlgmr.msra.gmra.mxu0 %v21_v9 }
  0xe1   :  { %v120_v11 = vpop.f32.mrf.mxu0 }
  0xe2   :  { %v139_v12 = vadd.f32 %v155_v10, %v120_v11 }
  0xe3   :  { %v183_v13 = vpop.f32.mrf.mxu0 }
  0xe4   :  { %v140_v14 = vmax.f32 %v139_v12, 0.0 }
  0xe5   :  { %v123_v15 = vpop.f32.mrf.mxu0 }
  0xe6   :  { %v141_v16 = vpack.c.bf16 %v140_v14, %v140_v14 }
  0xe7   :  { %v184_v17 = vpop.f32.mrf.mxu0 }
  0xe8   :  { %142 = vst [vmem:[%s253_s3] sm:$0xf] %v141_v16 }

// kernel: closed_call.33
= control target key start
LH: loop header
LB: loop body
LE: loop exit
PB: predicated region body
PF: predicated region fallthrough
CT: control target
= control target key end

     0   :  { %v492_v0 = vmov 0.0   ;;  %vm493_vm0 = vmmov 0   ;;  %s495_s23 = smov 32   ;;  %vm346_vm1 = vcmask 261120   ;;  %vm361_vm2 = vcmask 257024   ;;  %s617_s1 = inlined_call_operand.vmem [shape: bf16[384,128], index: 1, kind: input, shape index: {}]   ;;  %s618_s0 = inlined_call_operand.vmem [shape: bf16[8,384], index: 0, kind: input, shape index: {}]   ;;  %s619_s2 = inlined_call_operand.vmem [shape: f32[8,128], index: 2, kind: input, shape index: {}]   ;;  %s620_s3 = inlined_call_operand.vmem [shape: f32[8,32], index: 3, kind: input, shape index: {}]   ;;  %s621_s5 = inlined_call_operand.vmem [shape: f32[8,32], index: 5, kind: output, shape index: {1}]   ;;  %s622_s4 = inlined_call_operand.vmem [shape: bf16[8,32], index: 4, kind: output, shape index: {0}]  }
   0x1   :  { %432 = vmatprep.subr.bf16.mxu1 %v492_v0  ;;  %v457_v1 = vld [vmem:[%s617_s1 + $0x78] sm:$0xff]   ;;  %448 = vmatprep.mubr.msk.bf16.mxu1 %vm493_vm0, %v492_v0  ;;  %v460_v4 = vld [vmem:[%s617_s1 + $0x70] sm:$0xff]   ;;  %v463_v7 = vld [vmem:[%s617_s1 + $0x68] sm:$0xff]  }
   0x2   :  { %v458_v2 = vld [vmem:[%s617_s1 + $0xb8] sm:$0xff]   ;;  %401 = vmatprep.subr.bf16.mxu0 %v457_v1  ;;  %v461_v5 = vld [vmem:[%s617_s1 + $0xb0] sm:$0xff]   ;;  %v464_v8 = vld [vmem:[%s617_s1 + $0xa8] sm:$0xff]  }
   0x3   :  { %v459_v3 = vld [vmem:[%s617_s1 + $0x38] sm:$0xff]   ;;  %433 = vmatpush3.bf16.msra.mxu1 %v458_v2  ;;  %v462_v6 = vld [vmem:[%s617_s1 + $0x30] sm:$0xff]   ;;  %v465_v9 = vld [vmem:[%s617_s1 + $0x28] sm:$0xff]  }
   0x4   :  { %402 = vmatpush3.bf16.msra.mxu0 %v459_v3  ;;  %434 = vmatprep.subr.bf16.mxu1 %v492_v0  ;;  %v466_v10 = vld [vmem:[%s617_s1 + $0x60] sm:$0xff]   ;;  %v469_v13 = vld [vmem:[%s617_s1 + $0x58] sm:$0xff]   ;;  %v472_v16 = vld [vmem:[%s617_s1 + $0x50] sm:$0xff]  }
   0x5   :  { %403 = vmatprep.subr.bf16.mxu0 %v460_v4  ;;  %v467_v11 = vld [vmem:[%s617_s1 + $0xa0] sm:$0xff]   ;;  %v470_v14 = vld [vmem:[%s617_s1 + $0x98] sm:$0xff]   ;;  %v473_v17 = vld [vmem:[%s617_s1 + $0x90] sm:$0xff]  }
   0x6   :  { %v468_v12 = vld [vmem:[%s617_s1 + $0x20] sm:$0xff]   ;;  %v471_v15 = vld [vmem:[%s617_s1 + $0x18] sm:$0xff]   ;;  %v474_v18 = vld [vmem:[%s617_s1 + $0x10] sm:$0xff]  }
   0x7   :  { %435 = vmatpush3.bf16.msra.mxu1 %v461_v5  ;;  %v475_v19 = vld [vmem:[%s617_s1 + $0x48] sm:$0xff]   ;;  %v26_v22 = vld [vmem:[%s618_s0] sm:$0xff] }
   0x8   :  { %404 = vmatpush3.bf16.msra.mxu0 %v462_v6  ;;  %436 = vmatprep.subr.bf16.mxu1 %v492_v0  ;;  %v476_v20 = vld [vmem:[%s617_s1 + $0x88] sm:$0xff]   ;;  %v478_v23 = vld [vmem:[%s617_s1 + $0x40] sm:$0xff]   ;;  %v372_v24 = vcombine.high %v26_v22, %v26_v22  ;;  %v371_v28 = vcombine.low %v26_v22, %v26_v22 }
   0x9   :  { %405 = vmatprep.subr.bf16.mxu0 %v463_v7  ;;  %v477_v21 = vld [vmem:[%s617_s1 + $0x8] sm:$0xff]   ;;  %v479_v25 = vld [vmem:[%s617_s1 + $0x80] sm:$0xff]  }
   0xa   :  { %263 = vmatprep.mubr.bf16.mxu0 %v372_v24  ;;  %v480_v26 = vld [vmem:[%s617_s1] sm:$0xff]   ;;  %v483_v27 = vld [vmem:[%s618_s0 + $0x8] ss:$0 sps:$4 sm:$0xff]   ;;  %s494_s0 = smov 64  }
   0xb   :  { %437 = vmatpush3.bf16.msra.mxu1 %v464_v8  ;;  %v317_v35 = vld [vmem:[%s619_s2] sm:$0xff]  ;;  %s496_s2 = smov 96  }
   0xc   :  { %406 = vmatpush3.bf16.msra.mxu0 %v465_v9  ;;  %438 = vmatprep.subr.bf16.mxu1 %v492_v0  ;;  %v326_v42 = vld [vmem:[%s620_s3] sm:$0xff] }
   0xd   :  { %407 = vmatprep.subr.bf16.mxu0 %v466_v10 }
   0xf   :  { %439 = vmatpush3.bf16.msra.mxu1 %v467_v11 }
  0x10   :  { %408 = vmatpush3.bf16.msra.mxu0 %v468_v12  ;;  %440 = vmatprep.subr.bf16.mxu1 %v492_v0 }
  0x11   :  { %409 = vmatprep.subr.bf16.mxu0 %v469_v13 }
  0x13   :  { %441 = vmatpush3.bf16.msra.mxu1 %v470_v14 }
  0x14   :  { %410 = vmatpush3.bf16.msra.mxu0 %v471_v15  ;;  %442 = vmatprep.subr.bf16.mxu1 %v492_v0 }
  0x15   :  { %411 = vmatprep.subr.bf16.mxu0 %v472_v16 }
  0x17   :  { %443 = vmatpush3.bf16.msra.mxu1 %v473_v17 }
  0x18   :  { %412 = vmatpush3.bf16.msra.mxu0 %v474_v18  ;;  %444 = vmatprep.subr.bf16.mxu1 %v492_v0 }
  0x19   :  { %413 = vmatprep.subr.bf16.mxu0 %v475_v19 }
  0x1b   :  { %445 = vmatpush3.bf16.msra.mxu1 %v476_v20 }
  0x1c   :  { %414 = vmatpush3.bf16.msra.mxu0 %v477_v21  ;;  %446 = vmatprep.subr.bf16.mxu1 %v492_v0 }
  0x1d   :  { %415 = vmatprep.subr.bf16.mxu0 %v478_v23 }
  0x1f   :  { %447 = vmatpush3.bf16.msra.mxu1 %v479_v25 }
  0x20   :  { %416 = vmatpush3.bf16.msra.mxu0 %v480_v26 }
  0x22   :  { %449 = vmatmul.mubr.bf16.vlgmr.msra.gmra.mxu1 %v483_v27 }
  0x23   :  { %264 = vmatmul.mubr.bf16.vlgmr.msra.gmra.mxu0 %v371_v28 }
  0xe2   :  { %v305_v29 = vpop.f32.mrf.mxu1 }
  0xe3   :  { %v417_v30 = vpop.f32.mrf.mxu0 }
  0xe4   :  { %v450_v31 = vpop.f32.mrf.mxu1 }
  0xe5   :  { %v418_v32 = vpop.f32.mrf.mxu0 }
  0xe6   :  { %v419_v33 = vadd.f32 %v418_v32, %v417_v30  ;;  %v308_v34 = vpop.f32.mrf.mxu1 }
  0xe7   :  { %v420_v36 = vpop.f32.mrf.mxu0 }
  0xe8   :  { %v306_v37 = vadd.f32 %v419_v33, %v305_v29  ;;  %v451_v38 = vpop.f32.mrf.mxu1 }
  0xe9   :  { %v421_v39 = vpop.f32.mrf.mxu0 }
  0xea   :  { %v318_v40 = vadd.f32 %v317_v35, %v306_v37 }
  0xec   :  { %484 = vtanh.f32 %v318_v40  ;;  %v398_v43 = vmul.f32 -1.442695, %v318_v40 }
  0xee   :  { %486 = vpow2.f32 %v398_v43 }
  0xf9   :  { %v485_v41 = vpop.eup %484 }
  0xfa   :  { %333 = vrot.lane.b32.xlu0 %v485_v41, %s494_s0 }
  0xfb   :  { %v487_v44 = vpop.eup %486 }
  0xfc   :  { %v322_v45 = vadd.f32 1.0, %v487_v44 }
  0xfe   :  { %328 = vrot.lane.b32.xlu0 %v326_v42, %s495_s23  ;;  %488 = vrcp.f32 %v322_v45 }
 0x10b   :  { %v489_v46 = vpop.eup %488 }
 0x16c   :  { %v334_v47 = vpop.permute.xlu0 %333 }
 0x16d   :  { %v336_v48 = vmul.f32 %v489_v46, %v334_v47 }
 0x16f   :  { %338 = vrot.lane.b32.xlu1 %v336_v48, %s495_s23 }
 0x170   :  { %v329_v49 = vpop.permute.xlu0 %328 }
 0x171   :  { %v331_v50 = vmul.f32 %v489_v46, %v329_v49 }
 0x1e1   :  { %v339_v51 = vpop.permute.xlu1 %338 }
 0x1e2   :  { %v341_v52 = vadd.f32 %v339_v51, %v331_v50 }
 0x1e4   :  { %490 = vtanh.f32 %v341_v52  ;;  %343 = vrot.lane.b32.xlu0 %v341_v52, %s496_s2 }
 0x1f1   :  { %v491_v53 = vpop.eup %490 }
 0x1f2   :  { %350 = vrot.lane.b32.xlu1 %v491_v53, %s494_s0 }
 0x256   :  { %v344_v54 = vpop.permute.xlu0 %343 }
 0x257   :  { %347 = vst.msk [vmem:[%s621_s5] sm:$0xff] %vm346_vm1, %v344_v54 }
 0x264   :  { %v351_v55 = vpop.permute.xlu1 %350 }
 0x265   :  { %v353_v56 = vmul.f32 %v489_v46, %v351_v55 }
 0x267   :  { %v400_v57 = vpack.c.bf16 %v353_v56, %v353_v56 }
 0x269   :  { %358 = vrot.lane.b32.xlu1 %v400_v57, %s495_s23 }
 0x2db   :  { %v359_v58 = vpop.permute.xlu1 %358 }
 0x2dc   :  { %362 = vst.msk [vmem:[%s622_s4] sm:$0xf] %vm361_vm2, %v359_v58 }

// kernel: dual_motion_gan_forward.31
= control target key start
LH: loop header
LB: loop body
LE: loop exit
PB: predicated region body
PF: predicated region fallthrough
CT: control target
= control target key end

     0   :  { %s339_s1 = inlined_call_operand.vmem [shape: bf16[128,128], index: 1, kind: input, shape index: {}]   ;;  %s340_s0 = inlined_call_operand.vmem [shape: bf16[32,128], index: 0, kind: input, shape index: {}]   ;;  %s341_s2 = inlined_call_operand.vmem [shape: f32[1,128], index: 2, kind: input, shape index: {}]   ;;  %s342_s3 = inlined_call_operand.vmem [shape: bf16[32,128], index: 3, kind: output, shape index: {}]  }
   0x1   :  { %v270_v0 = vld [vmem:[%s339_s1 + $0x38] sm:$0xff]   ;;  %v271_v1 = vld [vmem:[%s339_s1 + $0x30] sm:$0xff]   ;;  %v272_v2 = vld [vmem:[%s339_s1 + $0x28] sm:$0xff]  }
   0x2   :  { %250 = vmatprep.subr.bf16.mxu0 %v270_v0  ;;  %v273_v3 = vld [vmem:[%s339_s1 + $0x20] sm:$0xff]   ;;  %v274_v5 = vld [vmem:[%s339_s1 + $0x18] sm:$0xff]   ;;  %v275_v6 = vld [vmem:[%s339_s1 + $0x10] sm:$0xff]  }
   0x3   :  { %251 = vmatpush3.bf16.msra.mxu0 %v270_v0  ;;  %v278_v4 = vld [vmem:[%s340_s0] sm:$0xff]   ;;  %v276_v7 = vld [vmem:[%s339_s1 + $0x8] sm:$0xff]  }
   0x4   :  { %252 = vmatprep.subr.bf16.mxu0 %v271_v1  ;;  %266 = vmatprep.mubr.bf16.mxu0 %v278_v4  ;;  %v277_v8 = vld [vmem:[%s339_s1] sm:$0xff]   ;;  %v279_v9 = vld [vmem:[%s340_s0 + $0x8] sm:$0xff]  }
   0x5   :  { %v220_v11 = vld [vmem:[%s341_s2] ss:$0 sm:$0xff] }
   0x7   :  { %253 = vmatpush3.bf16.msra.mxu0 %v271_v1 }
   0x8   :  { %254 = vmatprep.subr.bf16.mxu0 %v272_v2 }
   0xb   :  { %255 = vmatpush3.bf16.msra.mxu0 %v272_v2 }
   0xc   :  { %256 = vmatprep.subr.bf16.mxu0 %v273_v3 }
   0xf   :  { %257 = vmatpush3.bf16.msra.mxu0 %v273_v3 }
  0x10   :  { %258 = vmatprep.subr.bf16.mxu0 %v274_v5 }
  0x13   :  { %259 = vmatpush3.bf16.msra.mxu0 %v274_v5 }
  0x14   :  { %260 = vmatprep.subr.bf16.mxu0 %v275_v6 }
  0x17   :  { %261 = vmatpush3.bf16.msra.mxu0 %v275_v6 }
  0x18   :  { %262 = vmatprep.subr.bf16.mxu0 %v276_v7 }
  0x1b   :  { %263 = vmatpush3.bf16.msra.mxu0 %v276_v7 }
  0x1c   :  { %264 = vmatprep.subr.bf16.mxu0 %v277_v8 }
  0x1f   :  { %265 = vmatpush3.bf16.msra.mxu0 %v277_v8 }
  0x22   :  { %267 = vmatmul.mubr.bf16.vlgmr.msra.gmra.mxu0 %v279_v9 }
  0xe2   :  { %v268_v10 = vpop.f32.mrf.mxu0 }
  0xe3   :  { %v180_v13 = vadd.f32 %v268_v10, %v220_v11 }
  0xe4   :  { %v141_v12 = vpop.f32.mrf.mxu0 }
  0xe5   :  { %v178_v15 = vadd.f32 %v220_v11, %v141_v12  ;;  %v184_v18 = vmax.f32 %v180_v13, 0.0 }
  0xe6   :  { %v269_v14 = vpop.f32.mrf.mxu0 }
  0xe7   :  { %v181_v16 = vadd.f32 %v269_v14, %v220_v11  ;;  %v182_v21 = vmax.f32 %v178_v15, 0.0 }
  0xe8   :  { %v144_v17 = vpop.f32.mrf.mxu0 }
  0xe9   :  { %v185_v19 = vmax.f32 %v181_v16, 0.0  ;;  %v179_v20 = vadd.f32 %v220_v11, %v144_v17 }
  0xeb   :  { %v237_v22 = vpack.c.bf16 %v185_v19, %v184_v18  ;;  %v183_v23 = vmax.f32 %v179_v20, 0.0 }
  0xed   :  { %239 = vst [vmem:[%s342_s3 + $0x8] sm:$0xff] %v237_v22   ;;  %v232_v24 = vpack.c.bf16 %v183_v23, %v182_v21 }
  0xef   :  { %233 = vst [vmem:[%s342_s3] sm:$0xff] %v232_v24  }

// kernel: dual_motion_gan_forward.32
= control target key start
LH: loop header
LB: loop body
LE: loop exit
PB: predicated region body
PF: predicated region fallthrough
CT: control target
= control target key end

     0   :  { %s839_s12 = smov 0   ;;  %s841_s13 = smov 0   ;;  %s912_s0 = inlined_call_operand.vmem [shape: bf16[128,128], index: 0, kind: input, shape index: {}]   ;;  %s913_s1 = inlined_call_operand.vmem [shape: bf16[128,128], index: 1, kind: input, shape index: {}]   ;;  %s914_s2 = inlined_call_operand.vmem [shape: f32[1,128], index: 2, kind: input, shape index: {}]   ;;  %s915_s3 = inlined_call_operand.vmem [shape: bf16[128,128], index: 3, kind: output, shape index: {}]  }
   0x1   :  { %s843_s14 = smov 0  }
   0x2 LB: > { %s32_s15 = sadd.s32 1, %s813_s13  ;;  %p648_p0 = scmp.ge.s32.totalorder %s817_s14, 1  ;;  %s817_s14 = sphi %s843_s14, %s13_s14   ;;  %s813_s13 = sphi %s841_s13, %s917_s13   ;;  %s809_s12 = sphi %s839_s12, %s916_s12  }
   0x3   : > { %p34_p1 = scmp.ge.s32.totalorder %s32_s15, 2  ;;  %p188_p2 = scmp.lt.s32.totalorder %s817_s14, 3 }
   0x5   : > { %s919_s15 = smov (%p34_p1, %s32_s15), 0  ;;  %p189_p3 = pnand %p648_p0, %p188_p2 }
   0x6   : > { %s649_s18 = sshll.u32 (!%p189_p3), %s809_s12, 3 }
   0x7   : > { %192 = sbr.rel (%p189_p3) target bundleno = 251 (0xfb), region = 32  ;;  %p230_p4 = scmp.lt.s32.totalorder (!%p189_p3), %s649_s18, 15 }
   0xc   : > { %v783_v0 = vld [vmem:[%s913_s1 + $0x38] sm:$0xff]   ;;  %v784_v1 = vld [vmem:[%s913_s1 + $0x30] sm:$0xff]   ;;  %s921_s18 = smov (!%p230_p4, %s649_s18), 15  ;;  %v785_v2 = vld [vmem:[%s913_s1 + $0x28] sm:$0xff]  }
   0xd   : > { %719 = vmatprep.subr.bf16.mxu0 %v783_v0  ;;  %743 = vmatprep.subr.bf16.mxu1 %v783_v0  ;;  %s650_s23 = sshll.u32 %s921_s18, 2  ;;  %v786_v3 = vld [vmem:[%s913_s1 + $0x20] sm:$0xff]   ;;  %v787_v6 = vld [vmem:[%s913_s1 + $0x18] sm:$0xff]   ;;  %v788_v7 = vld [vmem:[%s913_s1 + $0x10] sm:$0xff]  }
   0xe   : > { %720 = vmatpush3.bf16.msra.mxu0 %v783_v0  ;;  %751 = vmatpush3.bf16.msra.mxu1 %v783_v0  ;;  %s874_s26 = scalar_lea.vmem %s912_s0, %s650_s23  ;;  %v789_v8 = vld [vmem:[%s913_s1 + $0x8] sm:$0xff]   ;;  %v790_v9 = vld [vmem:[%s913_s1] sm:$0xff]   ;;  %s257_s17 = scalar_lea.vmem %s915_s3, %s650_s23 }
   0xf   : > { %721 = vmatprep.subr.bf16.mxu0 %v784_v1  ;;  %744 = vmatprep.subr.bf16.mxu1 %v784_v1  ;;  %v791_v4 = vld [vmem:[%s874_s26] sm:$0xff]   ;;  %v792_v5 = vld [vmem:[%s874_s26 + $0x10] sm:$0xff]   ;;  %v793_v10 = vld [vmem:[%s874_s26 + $0x8] sm:$0xff]  }
  0x10   : > { %735 = vmatprep.mubr.bf16.mxu0 %v791_v4  ;;  %739 = vmatprep.mubr.bf16.mxu1 %v792_v5  ;;  %v794_v11 = vld [vmem:[%s874_s26 + $0x18] sm:$0xff]   ;;  %v665_v12 = vld [vmem:[%s914_s2] ss:$0 sm:$0xff] }
  0x12   : > { %722 = vmatpush3.bf16.msra.mxu0 %v784_v1  ;;  %752 = vmatpush3.bf16.msra.mxu1 %v784_v1 }
  0x13   : > { %723 = vmatprep.subr.bf16.mxu0 %v785_v2  ;;  %745 = vmatprep.subr.bf16.mxu1 %v785_v2 }
  0x16   : > { %724 = vmatpush3.bf16.msra.mxu0 %v785_v2  ;;  %753 = vmatpush3.bf16.msra.mxu1 %v785_v2 }
  0x17   : > { %725 = vmatprep.subr.bf16.mxu0 %v786_v3  ;;  %746 = vmatprep.subr.bf16.mxu1 %v786_v3 }
  0x1a   : > { %726 = vmatpush3.bf16.msra.mxu0 %v786_v3  ;;  %754 = vmatpush3.bf16.msra.mxu1 %v786_v3 }
  0x1b   : > { %727 = vmatprep.subr.bf16.mxu0 %v787_v6  ;;  %747 = vmatprep.subr.bf16.mxu1 %v787_v6 }
  0x1e   : > { %728 = vmatpush3.bf16.msra.mxu0 %v787_v6  ;;  %755 = vmatpush3.bf16.msra.mxu1 %v787_v6 }
  0x1f   : > { %729 = vmatprep.subr.bf16.mxu0 %v788_v7  ;;  %748 = vmatprep.subr.bf16.mxu1 %v788_v7 }
  0x22   : > { %730 = vmatpush3.bf16.msra.mxu0 %v788_v7  ;;  %756 = vmatpush3.bf16.msra.mxu1 %v788_v7 }
  0x23   : > { %731 = vmatprep.subr.bf16.mxu0 %v789_v8  ;;  %749 = vmatprep.subr.bf16.mxu1 %v789_v8 }
  0x26   : > { %732 = vmatpush3.bf16.msra.mxu0 %v789_v8  ;;  %757 = vmatpush3.bf16.msra.mxu1 %v789_v8 }
  0x27   : > { %733 = vmatprep.subr.bf16.mxu0 %v790_v9  ;;  %750 = vmatprep.subr.bf16.mxu1 %v790_v9 }
  0x2a   : > { %734 = vmatpush3.bf16.msra.mxu0 %v790_v9  ;;  %758 = vmatpush3.bf16.msra.mxu1 %v790_v9 }
  0x2d   : > { %736 = vmatmul.mubr.bf16.vlgmr.msra.gmra.mxu0 %v793_v10  ;;  %740 = vmatmul.mubr.bf16.vlgmr.msra.gmra.mxu1 %v794_v11 }
  0xed   : > { %v737_v13 = vpop.f32.mrf.mxu0  ;;  %v741_v14 = vpop.f32.mrf.mxu1 }
  0xee   : > { %v477_v15 = vadd.f32 %v737_v13, %v665_v12  ;;  %v481_v16 = vadd.f32 %v741_v14, %v665_v12 }
  0xef   : > { %v410_v17 = vpop.f32.mrf.mxu0  ;;  %v426_v18 = vpop.f32.mrf.mxu1 }
  0xf0   : > { %v475_v19 = vadd.f32 %v665_v12, %v410_v17  ;;  %v479_v20 = vadd.f32 %v665_v12, %v426_v18  ;;  %v485_v25 = vmax.f32 %v477_v15, 0.0  ;;  %v489_v26 = vmax.f32 %v481_v16, 0.0 }
  0xf1   : > { %v738_v21 = vpop.f32.mrf.mxu0  ;;  %v742_v22 = vpop.f32.mrf.mxu1 }
  0xf2   : > { %v478_v23 = vadd.f32 %v738_v21, %v665_v12  ;;  %v482_v24 = vadd.f32 %v742_v22, %v665_v12  ;;  %v483_v33 = vmax.f32 %v475_v19, 0.0  ;;  %v487_v34 = vmax.f32 %v479_v20, 0.0 }
  0xf3   : > { %v413_v27 = vpop.f32.mrf.mxu0  ;;  %v429_v28 = vpop.f32.mrf.mxu1 }
  0xf4   : > { %v486_v29 = vmax.f32 %v478_v23, 0.0  ;;  %v490_v30 = vmax.f32 %v482_v24, 0.0  ;;  %v476_v31 = vadd.f32 %v665_v12, %v413_v27  ;;  %v480_v32 = vadd.f32 %v665_v12, %v429_v28 }
  0xf6   : > { %v692_v35 = vpack.c.bf16 %v486_v29, %v485_v25  ;;  %v702_v36 = vpack.c.bf16 %v490_v30, %v489_v26  ;;  %v484_v37 = vmax.f32 %v476_v31, 0.0  ;;  %v488_v38 = vmax.f32 %v480_v32, 0.0 }
  0xf8   : > { %704 = vst [vmem:[%s257_s17 + $0x8] sm:$0xff] %v692_v35   ;;  %706 = vst [vmem:[%s257_s17 + $0x18] sm:$0xff] %v702_v36   ;;  %v687_v39 = vpack.c.bf16 %v484_v37, %v483_v33  ;;  %v697_v40 = vpack.c.bf16 %v488_v38, %v487_v34 }
  0xfa   : > { %688 = vst [vmem:[%s257_s17] sm:$0xff] %v687_v39   ;;  %705 = vst [vmem:[%s257_s17 + $0x10] sm:$0xff] %v697_v40  }
  0xfb PF: > { %s13_s14 = sadd.s32 1, %s817_s14   ;;  %s916_s12 = smov %s813_s13 }
  0xfc   : > { %p10_p5 = scmp.ge.s32.totalorder %s13_s14, 4   ;;  %s917_s13 = smov %s919_s15 }
  0xfe   :  { %12 = sbr.rel (!%p10_p5) target bundleno = 2 (0x2), region = 76 }

// kernel: dual_motion_gan_forward.33
= control target key start
LH: loop header
LB: loop body
LE: loop exit
PB: predicated region body
PF: predicated region fallthrough
CT: control target
= control target key end

     0   :  { %s1499_s12 = smov 0   ;;  %s1501_s13 = smov 0   ;;  %s1636_s0 = inlined_call_operand.vmem [shape: bf16[512,128], index: 0, kind: input, shape index: {}]   ;;  %s1637_s1 = inlined_call_operand.vmem [shape: bf16[128,128], index: 1, kind: input, shape index: {}]   ;;  %s1638_s2 = inlined_call_operand.vmem [shape: f32[1,128], index: 2, kind: input, shape index: {}]   ;;  %s1639_s3 = inlined_call_operand.vmem [shape: bf16[512,128], index: 3, kind: output, shape index: {}]  }
   0x1   :  { %s1503_s14 = smov 0  }
   0x2 LB: > { %s32_s15 = sadd.s32 1, %s1473_s13  ;;  %p1128_p0 = scmp.ge.s32.totalorder %s1477_s14, 1  ;;  %s1477_s14 = sphi %s1503_s14, %s13_s14   ;;  %s1473_s13 = sphi %s1501_s13, %s1641_s13   ;;  %s1469_s12 = sphi %s1499_s12, %s1640_s12  }
   0x3   : > { %p34_p1 = scmp.ge.s32.totalorder %s32_s15, 2  ;;  %p188_p2 = scmp.lt.s32.totalorder %s1477_s14, 3 }
   0x5   : > { %s1643_s15 = smov (%p34_p1, %s32_s15), 0  ;;  %p189_p3 = pnand %p1128_p0, %p188_p2 }
   0x6   : > { %s1129_s18 = sshll.u32 (!%p189_p3), %s1469_s12, 5 }
   0x7   : > { %192 = sbr.rel (%p189_p3) target bundleno = 275 (0x113), region = 32  ;;  %p230_p4 = scmp.lt.s32.totalorder (!%p189_p3), %s1129_s18, 63 }
   0xc   : > { %v1431_v0 = vld [vmem:[%s1637_s1 + $0x38] sm:$0xff]   ;;  %v1432_v1 = vld [vmem:[%s1637_s1 + $0x30] sm:$0xff]   ;;  %s1645_s18 = smov (!%p230_p4, %s1129_s18), 63  ;;  %v1433_v2 = vld [vmem:[%s1637_s1 + $0x28] sm:$0xff]  }
   0xd   : > { %1343 = vmatprep.subr.bf16.mxu0 %v1431_v0  ;;  %1391 = vmatprep.subr.bf16.mxu1 %v1431_v0  ;;  %s1130_s23 = sshll.u32 %s1645_s18, 2  ;;  %v1434_v3 = vld [vmem:[%s1637_s1 + $0x20] sm:$0xff]   ;;  %v1435_v6 = vld [vmem:[%s1637_s1 + $0x18] sm:$0xff]   ;;  %v1436_v7 = vld [vmem:[%s1637_s1 + $0x10] sm:$0xff]  }
   0xe   : > { %1344 = vmatpush3.bf16.msra.mxu0 %v1431_v0  ;;  %1399 = vmatpush3.bf16.msra.mxu1 %v1431_v0  ;;  %s1534_s26 = scalar_lea.vmem %s1636_s0, %s1130_s23  ;;  %v1437_v8 = vld [vmem:[%s1637_s1 + $0x8] sm:$0xff]   ;;  %v1438_v9 = vld [vmem:[%s1637_s1] sm:$0xff]   ;;  %s1585_s17 = scalar_lea.vmem %s1639_s3, %s1130_s23 }
   0xf   : > { %1345 = vmatprep.subr.bf16.mxu0 %v1432_v1  ;;  %1392 = vmatprep.subr.bf16.mxu1 %v1432_v1  ;;  %v1439_v4 = vld [vmem:[%s1534_s26] sm:$0xff]   ;;  %v1441_v10 = vld [vmem:[%s1534_s26 + $0x8] sm:$0xff]   ;;  %v1443_v12 = vld [vmem:[%s1534_s26 + $0x10] sm:$0xff]  }
  0x10   : > { %v1440_v5 = vld [vmem:[%s1534_s26 + $0x40] sm:$0xff]   ;;  %1359 = vmatprep.mubr.bf16.mxu0 %v1439_v4  ;;  %v1442_v11 = vld [vmem:[%s1534_s26 + $0x48] sm:$0xff]   ;;  %v1444_v13 = vld [vmem:[%s1534_s26 + $0x50] sm:$0xff]  }
  0x11   : > { %1375 = vmatprep.mubr.bf16.mxu1 %v1440_v5  ;;  %v1445_v14 = vld [vmem:[%s1534_s26 + $0x18] sm:$0xff]   ;;  %v1447_v16 = vld [vmem:[%s1534_s26 + $0x20] sm:$0xff]   ;;  %v1449_v18 = vld [vmem:[%s1534_s26 + $0x28] sm:$0xff]  }
  0x12   : > { %1346 = vmatpush3.bf16.msra.mxu0 %v1432_v1  ;;  %1400 = vmatpush3.bf16.msra.mxu1 %v1432_v1  ;;  %v1446_v15 = vld [vmem:[%s1534_s26 + $0x58] sm:$0xff]   ;;  %v1448_v17 = vld [vmem:[%s1534_s26 + $0x60] sm:$0xff]   ;;  %v1450_v19 = vld [vmem:[%s1534_s26 + $0x68] sm:$0xff]  }
  0x13   : > { %1347 = vmatprep.subr.bf16.mxu0 %v1433_v2  ;;  %1393 = vmatprep.subr.bf16.mxu1 %v1433_v2  ;;  %v1451_v20 = vld [vmem:[%s1534_s26 + $0x30] sm:$0xff]   ;;  %v1453_v22 = vld [vmem:[%s1534_s26 + $0x38] sm:$0xff]   ;;  %v1570_v24 = vld [vmem:[%s1638_s2] ss:$0 sm:$0xff] }
  0x14   : > { %v1452_v21 = vld [vmem:[%s1534_s26 + $0x70] sm:$0xff]   ;;  %v1454_v23 = vld [vmem:[%s1534_s26 + $0x78] sm:$0xff]  }
  0x16   : > { %1348 = vmatpush3.bf16.msra.mxu0 %v1433_v2  ;;  %1401 = vmatpush3.bf16.msra.mxu1 %v1433_v2 }
  0x17   : > { %1349 = vmatprep.subr.bf16.mxu0 %v1434_v3  ;;  %1394 = vmatprep.subr.bf16.mxu1 %v1434_v3 }
  0x1a   : > { %1350 = vmatpush3.bf16.msra.mxu0 %v1434_v3  ;;  %1402 = vmatpush3.bf16.msra.mxu1 %v1434_v3 }
  0x1b   : > { %1351 = vmatprep.subr.bf16.mxu0 %v1435_v6  ;;  %1395 = vmatprep.subr.bf16.mxu1 %v1435_v6 }
  0x1e   : > { %1352 = vmatpush3.bf16.msra.mxu0 %v1435_v6  ;;  %1403 = vmatpush3.bf16.msra.mxu1 %v1435_v6 }
  0x1f   : > { %1353 = vmatprep.subr.bf16.mxu0 %v1436_v7  ;;  %1396 = vmatprep.subr.bf16.mxu1 %v1436_v7 }
  0x22   : > { %1354 = vmatpush3.bf16.msra.mxu0 %v1436_v7  ;;  %1404 = vmatpush3.bf16.msra.mxu1 %v1436_v7 }
  0x23   : > { %1355 = vmatprep.subr.bf16.mxu0 %v1437_v8  ;;  %1397 = vmatprep.subr.bf16.mxu1 %v1437_v8 }
  0x26   : > { %1356 = vmatpush3.bf16.msra.mxu0 %v1437_v8  ;;  %1405 = vmatpush3.bf16.msra.mxu1 %v1437_v8 }
  0x27   : > { %1357 = vmatprep.subr.bf16.mxu0 %v1438_v9  ;;  %1398 = vmatprep.subr.bf16.mxu1 %v1438_v9 }
  0x2a   : > { %1358 = vmatpush3.bf16.msra.mxu0 %v1438_v9  ;;  %1406 = vmatpush3.bf16.msra.mxu1 %v1438_v9 }
  0x2d   : > { %1360 = vmatmul.mubr.bf16.vlgmr.msra.gmra.mxu0 %v1441_v10  ;;  %1376 = vmatmul.mubr.bf16.vlgmr.msra.gmra.mxu1 %v1442_v11 }
  0x2e   : > { %1363 = vmatprep.mubr.bf16.mxu0 %v1443_v12  ;;  %1379 = vmatprep.mubr.bf16.mxu1 %v1444_v13 }
  0x35   : > { %1364 = vmatmul.mubr.bf16.gmra.mxu0 %v1445_v14  ;;  %1380 = vmatmul.mubr.bf16.gmra.mxu1 %v1446_v15 }
  0x36   : > { %1367 = vmatprep.mubr.bf16.mxu0 %v1447_v16  ;;  %1383 = vmatprep.mubr.bf16.mxu1 %v1448_v17 }
  0x3d   : > { %1368 = vmatmul.mubr.bf16.gmra.mxu0 %v1449_v18  ;;  %1384 = vmatmul.mubr.bf16.gmra.mxu1 %v1450_v19 }
  0x3e   : > { %1371 = vmatprep.mubr.bf16.mxu0 %v1451_v20  ;;  %1387 = vmatprep.mubr.bf16.mxu1 %v1452_v21 }
  0x45   : > { %1372 = vmatmul.mubr.bf16.gmra.mxu0 %v1453_v22  ;;  %1388 = vmatmul.mubr.bf16.gmra.mxu1 %v1454_v23 }
  0xed   : > { %v1361_v25 = vpop.f32.mrf.mxu0  ;;  %v1377_v26 = vpop.f32.mrf.mxu1 }
  0xee   : > { %v789_v27 = vadd.f32 %v1361_v25, %v1570_v24  ;;  %v805_v28 = vadd.f32 %v1377_v26, %v1570_v24 }
  0xef   : > { %v554_v29 = vpop.f32.mrf.mxu0  ;;  %v618_v30 = vpop.f32.mrf.mxu1 }
  0xf0   : > { %v787_v31 = vadd.f32 %v1570_v24, %v554_v29  ;;  %v803_v32 = vadd.f32 %v1570_v24, %v618_v30  ;;  %v821_v37 = vmax.f32 %v789_v27, 0.0  ;;  %v837_v38 = vmax.f32 %v805_v28, 0.0 }
  0xf1   : > { %v1362_v33 = vpop.f32.mrf.mxu0  ;;  %v1378_v34 = vpop.f32.mrf.mxu1 }
  0xf2   : > { %v790_v35 = vadd.f32 %v1362_v33, %v1570_v24  ;;  %v806_v36 = vadd.f32 %v1378_v34, %v1570_v24  ;;  %v819_v45 = vmax.f32 %v787_v31, 0.0  ;;  %v835_v46 = vmax.f32 %v803_v32, 0.0 }
  0xf3   : > { %v557_v39 = vpop.f32.mrf.mxu0  ;;  %v621_v40 = vpop.f32.mrf.mxu1 }
  0xf4   : > { %v822_v41 = vmax.f32 %v790_v35, 0.0  ;;  %v838_v42 = vmax.f32 %v806_v36, 0.0  ;;  %v788_v43 = vadd.f32 %v1570_v24, %v557_v39  ;;  %v804_v44 = vadd.f32 %v1570_v24, %v621_v40 }
  0xf5   : > { %v1365_v47 = vpop.f32.mrf.mxu0  ;;  %v1381_v48 = vpop.f32.mrf.mxu1 }
  0xf6   : > { %v1232_v49 = vpack.c.bf16 %v822_v41, %v821_v37  ;;  %v1272_v50 = vpack.c.bf16 %v838_v42, %v837_v38  ;;  %v820_v51 = vmax.f32 %v788_v43, 0.0  ;;  %v836_v52 = vmax.f32 %v804_v44, 0.0 }
  0xf7   : > { %v793_v53 = vadd.f32 %v1365_v47, %v1570_v24  ;;  %v809_v54 = vadd.f32 %v1381_v48, %v1570_v24  ;;  %v570_v55 = vpop.f32.mrf.mxu0  ;;  %v634_v56 = vpop.f32.mrf.mxu1 }
  0xf8   : > { %1304 = vst [vmem:[%s1585_s17 + $0x8] sm:$0xff] %v1232_v49   ;;  %1312 = vst [vmem:[%s1585_s17 + $0x48] sm:$0xff] %v1272_v50   ;;  %v1227_v57 = vpack.c.bf16 %v820_v51, %v819_v45  ;;  %v1267_v58 = vpack.c.bf16 %v836_v52, %v835_v46  ;;  %v791_v59 = vadd.f32 %v1570_v24, %v570_v55 }
  0xf9   : > { %v807_v60 = vadd.f32 %v1570_v24, %v634_v56  ;;  %v1366_v61 = vpop.f32.mrf.mxu0  ;;  %v1382_v62 = vpop.f32.mrf.mxu1  ;;  %v825_v1 = vmax.f32 %v793_v53, 0.0  ;;  %v841_v2 = vmax.f32 %v809_v54, 0.0 }
  0xfa   : > { %1228 = vst [vmem:[%s1585_s17] sm:$0xff] %v1227_v57   ;;  %1311 = vst [vmem:[%s1585_s17 + $0x40] sm:$0xff] %v1267_v58   ;;  %v794_v63 = vadd.f32 %v1366_v61, %v1570_v24  ;;  %v810_v0 = vadd.f32 %v1382_v62, %v1570_v24  ;;  %v823_v9 = vmax.f32 %v791_v59, 0.0 }
  0xfb   : > { %v573_v3 = vpop.f32.mrf.mxu0  ;;  %v637_v4 = vpop.f32.mrf.mxu1  ;;  %v839_v10 = vmax.f32 %v807_v60, 0.0 }
  0xfc   : > { %v826_v5 = vmax.f32 %v794_v63, 0.0  ;;  %v842_v6 = vmax.f32 %v810_v0, 0.0  ;;  %v792_v7 = vadd.f32 %v1570_v24, %v573_v3  ;;  %v808_v8 = vadd.f32 %v1570_v24, %v637_v4 }
  0xfd   : > { %v1369_v11 = vpop.f32.mrf.mxu0  ;;  %v1385_v12 = vpop.f32.mrf.mxu1 }
  0xfe   : > { %v1242_v13 = vpack.c.bf16 %v826_v5, %v825_v1  ;;  %v1282_v14 = vpack.c.bf16 %v842_v6, %v841_v2  ;;  %v824_v15 = vmax.f32 %v792_v7, 0.0  ;;  %v840_v16 = vmax.f32 %v808_v8, 0.0 }
  0xff   : > { %v797_v17 = vadd.f32 %v1369_v11, %v1570_v24  ;;  %v813_v18 = vadd.f32 %v1385_v12, %v1570_v24  ;;  %v586_v19 = vpop.f32.mrf.mxu0  ;;  %v650_v20 = vpop.f32.mrf.mxu1 }
 0x100   : > { %1306 = vst [vmem:[%s1585_s17 + $0x18] sm:$0xff] %v1242_v13   ;;  %1314 = vst [vmem:[%s1585_s17 + $0x58] sm:$0xff] %v1282_v14   ;;  %v1237_v21 = vpack.c.bf16 %v824_v15, %v823_v9  ;;  %v1277_v22 = vpack.c.bf16 %v840_v16, %v839_v10  ;;  %v795_v23 = vadd.f32 %v1570_v24, %v586_v19 }
 0x101   : > { %v811_v25 = vadd.f32 %v1570_v24, %v650_v20  ;;  %v1370_v26 = vpop.f32.mrf.mxu0  ;;  %v1386_v27 = vpop.f32.mrf.mxu1  ;;  %v829_v30 = vmax.f32 %v797_v17, 0.0  ;;  %v845_v31 = vmax.f32 %v813_v18, 0.0 }
 0x102   : > { %1305 = vst [vmem:[%s1585_s17 + $0x10] sm:$0xff] %v1237_v21   ;;  %1313 = vst [vmem:[%s1585_s17 + $0x50] sm:$0xff] %v1277_v22   ;;  %v798_v28 = vadd.f32 %v1370_v26, %v1570_v24  ;;  %v814_v29 = vadd.f32 %v1386_v27, %v1570_v24  ;;  %v827_v38 = vmax.f32 %v795_v23, 0.0 }
 0x103   : > { %v589_v32 = vpop.f32.mrf.mxu0  ;;  %v653_v33 = vpop.f32.mrf.mxu1  ;;  %v843_v39 = vmax.f32 %v811_v25, 0.0 }
 0x104   : > { %v830_v34 = vmax.f32 %v798_v28, 0.0  ;;  %v846_v35 = vmax.f32 %v814_v29, 0.0  ;;  %v796_v36 = vadd.f32 %v1570_v24, %v589_v32  ;;  %v812_v37 = vadd.f32 %v1570_v24, %v653_v33 }
 0x105   : > { %v1373_v40 = vpop.f32.mrf.mxu0  ;;  %v1389_v41 = vpop.f32.mrf.mxu1 }
 0x106   : > { %v1252_v42 = vpack.c.bf16 %v830_v34, %v829_v30  ;;  %v1292_v43 = vpack.c.bf16 %v846_v35, %v845_v31  ;;  %v828_v44 = vmax.f32 %v796_v36, 0.0  ;;  %v844_v45 = vmax.f32 %v812_v37, 0.0 }
 0x107   : > { %v801_v46 = vadd.f32 %v1373_v40, %v1570_v24  ;;  %v817_v47 = vadd.f32 %v1389_v41, %v1570_v24  ;;  %v602_v48 = vpop.f32.mrf.mxu0  ;;  %v666_v49 = vpop.f32.mrf.mxu1 }
 0x108   : > { %1308 = vst [vmem:[%s1585_s17 + $0x28] sm:$0xff] %v1252_v42   ;;  %1316 = vst [vmem:[%s1585_s17 + $0x68] sm:$0xff] %v1292_v43   ;;  %v1247_v50 = vpack.c.bf16 %v828_v44, %v827_v38  ;;  %v1287_v51 = vpack.c.bf16 %v844_v45, %v843_v39  ;;  %v799_v52 = vadd.f32 %v1570_v24, %v602_v48 }
 0x109   : > { %v815_v53 = vadd.f32 %v1570_v24, %v666_v49  ;;  %v1374_v54 = vpop.f32.mrf.mxu0  ;;  %v1390_v55 = vpop.f32.mrf.mxu1  ;;  %v833_v58 = vmax.f32 %v801_v46, 0.0  ;;  %v849_v59 = vmax.f32 %v817_v47, 0.0 }
 0x10a   : > { %1307 = vst [vmem:[%s1585_s17 + $0x20] sm:$0xff] %v1247_v50   ;;  %1315 = vst [vmem:[%s1585_s17 + $0x60] sm:$0xff] %v1287_v51   ;;  %v802_v56 = vadd.f32 %v1374_v54, %v1570_v24  ;;  %v818_v57 = vadd.f32 %v1390_v55, %v1570_v24  ;;  %v831_v2 = vmax.f32 %v799_v52, 0.0 }
 0x10b   : > { %v605_v60 = vpop.f32.mrf.mxu0  ;;  %v669_v61 = vpop.f32.mrf.mxu1  ;;  %v847_v3 = vmax.f32 %v815_v53, 0.0 }
 0x10c   : > { %v834_v62 = vmax.f32 %v802_v56, 0.0  ;;  %v850_v63 = vmax.f32 %v818_v57, 0.0  ;;  %v800_v0 = vadd.f32 %v1570_v24, %v605_v60  ;;  %v816_v1 = vadd.f32 %v1570_v24, %v669_v61 }
 0x10e   : > { %v1262_v4 = vpack.c.bf16 %v834_v62, %v833_v58  ;;  %v1302_v5 = vpack.c.bf16 %v850_v63, %v849_v59  ;;  %v832_v6 = vmax.f32 %v800_v0, 0.0  ;;  %v848_v7 = vmax.f32 %v816_v1, 0.0 }
 0x110   : > { %1310 = vst [vmem:[%s1585_s17 + $0x38] sm:$0xff] %v1262_v4   ;;  %1318 = vst [vmem:[%s1585_s17 + $0x78] sm:$0xff] %v1302_v5   ;;  %v1257_v8 = vpack.c.bf16 %v832_v6, %v831_v2  ;;  %v1297_v9 = vpack.c.bf16 %v848_v7, %v847_v3 }
 0x112   : > { %1309 = vst [vmem:[%s1585_s17 + $0x30] sm:$0xff] %v1257_v8   ;;  %1317 = vst [vmem:[%s1585_s17 + $0x70] sm:$0xff] %v1297_v9  }
 0x113 PF: > { %s13_s14 = sadd.s32 1, %s1477_s14   ;;  %s1640_s12 = smov %s1473_s13 }
 0x114   : > { %p10_p5 = scmp.ge.s32.totalorder %s13_s14, 4   ;;  %s1641_s13 = smov %s1643_s15 }
 0x116   :  { %12 = sbr.rel (!%p10_p5) target bundleno = 2 (0x2), region = 76 }

// kernel: dual_motion_gan_forward.34
= control target key start
LH: loop header
LB: loop body
LE: loop exit
PB: predicated region body
PF: predicated region fallthrough
CT: control target
= control target key end

     0   :  { %s1932_s12 = smov 0   ;;  %s1934_s13 = smov 0   ;;  %s2162_s0 = inlined_call_operand.vmem [shape: bf16[2048,128], index: 0, kind: input, shape index: {}]   ;;  %s2163_s1 = inlined_call_operand.vmem [shape: bf16[128,128], index: 1, kind: input, shape index: {}]   ;;  %s2164_s2 = inlined_call_operand.vmem [shape: f32[1,128], index: 2, kind: input, shape index: {}]   ;;  %s2165_s3 = inlined_call_operand.vmem [shape: f32[2048,128], index: 3, kind: output, shape index: {}]  }
   0x1   :  { %s1936_s14 = smov 0  }
   0x2 LB: > { %s32_s15 = sadd.s32 1, %s1906_s13  ;;  %p1512_p0 = scmp.ge.s32.totalorder %s1910_s14, 1  ;;  %s1910_s14 = sphi %s1936_s14, %s13_s14   ;;  %s1906_s13 = sphi %s1934_s13, %s2167_s13   ;;  %s1902_s12 = sphi %s1932_s12, %s2166_s12  }
   0x3   : > { %p34_p1 = scmp.ge.s32.totalorder %s32_s15, 4  ;;  %p188_p2 = scmp.lt.s32.totalorder %s1910_s14, 5 }
   0x5   : > { %s2169_s15 = smov (%p34_p1, %s32_s15), 0  ;;  %p189_p3 = pnand %p1512_p0, %p188_p2 }
   0x6   : > { %s1513_s18 = sshll.u32 (!%p189_p3), %s1902_s12, 6 }
   0x7   : > { %192 = sbr.rel (%p189_p3) target bundleno = 318 (0x13e), region = 32  ;;  %p230_p4 = scmp.lt.s32.totalorder (!%p189_p3), %s1513_s18, 255 }
   0xc   : > { %v1720_v0 = vld [vmem:[%s2163_s1 + $0x38] sm:$0xff]   ;;  %v1721_v1 = vld [vmem:[%s2163_s1 + $0x30] sm:$0xff]   ;;  %s2171_s18 = smov (!%p230_p4, %s1513_s18), 255  ;;  %v1722_v2 = vld [vmem:[%s2163_s1 + $0x28] sm:$0xff]  }
   0xd   : > { %1600 = vmatprep.subr.bf16.mxu0 %v1720_v0  ;;  %1680 = vmatprep.subr.bf16.mxu1 %v1720_v0  ;;  %s1514_s23 = sshll.u32 %s2171_s18, 2  ;;  %v1723_v3 = vld [vmem:[%s2163_s1 + $0x20] sm:$0xff]   ;;  %v1724_v6 = vld [vmem:[%s2163_s1 + $0x18] sm:$0xff]   ;;  %v1725_v7 = vld [vmem:[%s2163_s1 + $0x10] sm:$0xff]   ;;  %s1516_s12 = sshll.u32 %s2171_s18, 3 }
   0xe   : > { %1601 = vmatpush3.bf16.msra.mxu0 %v1720_v0  ;;  %1688 = vmatpush3.bf16.msra.mxu1 %v1720_v0  ;;  %s1965_s26 = scalar_lea.vmem %s2162_s0, %s1514_s23  ;;  %v1726_v8 = vld [vmem:[%s2163_s1 + $0x8] sm:$0xff]   ;;  %v1727_v9 = vld [vmem:[%s2163_s1] sm:$0xff]   ;;  %s2037_s19 = scalar_lea.vmem %s2165_s3, %s1516_s12 }
   0xf   : > { %1602 = vmatprep.subr.bf16.mxu0 %v1721_v1  ;;  %1681 = vmatprep.subr.bf16.mxu1 %v1721_v1  ;;  %v1728_v4 = vld [vmem:[%s1965_s26] sm:$0xff]   ;;  %v1730_v10 = vld [vmem:[%s1965_s26 + $0x8] sm:$0xff]   ;;  %v1732_v12 = vld [vmem:[%s1965_s26 + $0x10] sm:$0xff]  }
  0x10   : > { %v1729_v5 = vld [vmem:[%s1965_s26 + $0x80] sm:$0xff]   ;;  %1616 = vmatprep.mubr.bf16.mxu0 %v1728_v4  ;;  %v1731_v11 = vld [vmem:[%s1965_s26 + $0x88] sm:$0xff]   ;;  %v1733_v13 = vld [vmem:[%s1965_s26 + $0x90] sm:$0xff]  }
  0x11   : > { %1648 = vmatprep.mubr.bf16.mxu1 %v1729_v5  ;;  %v1734_v14 = vld [vmem:[%s1965_s26 + $0x18] sm:$0xff]   ;;  %v1736_v16 = vld [vmem:[%s1965_s26 + $0x20] sm:$0xff]   ;;  %v1738_v18 = vld [vmem:[%s1965_s26 + $0x28] sm:$0xff]  }
  0x12   : > { %1603 = vmatpush3.bf16.msra.mxu0 %v1721_v1  ;;  %1689 = vmatpush3.bf16.msra.mxu1 %v1721_v1  ;;  %v1735_v15 = vld [vmem:[%s1965_s26 + $0x98] sm:$0xff]   ;;  %v1737_v17 = vld [vmem:[%s1965_s26 + $0xa0] sm:$0xff]   ;;  %v1739_v19 = vld [vmem:[%s1965_s26 + $0xa8] sm:$0xff]  }
  0x13   : > { %1604 = vmatprep.subr.bf16.mxu0 %v1722_v2  ;;  %1682 = vmatprep.subr.bf16.mxu1 %v1722_v2  ;;  %v1740_v20 = vld [vmem:[%s1965_s26 + $0x30] sm:$0xff]   ;;  %v1742_v22 = vld [vmem:[%s1965_s26 + $0x38] sm:$0xff]   ;;  %v1744_v24 = vld [vmem:[%s1965_s26 + $0x40] sm:$0xff]  }
  0x14   : > { %v1741_v21 = vld [vmem:[%s1965_s26 + $0xb0] sm:$0xff]   ;;  %v1743_v23 = vld [vmem:[%s1965_s26 + $0xb8] sm:$0xff]   ;;  %v1745_v25 = vld [vmem:[%s1965_s26 + $0xc0] sm:$0xff]  }
  0x15   : > { %v1746_v26 = vld [vmem:[%s1965_s26 + $0x48] sm:$0xff]   ;;  %v1748_v28 = vld [vmem:[%s1965_s26 + $0x50] sm:$0xff]   ;;  %v1750_v30 = vld [vmem:[%s1965_s26 + $0x58] sm:$0xff]  }
  0x16   : > { %1605 = vmatpush3.bf16.msra.mxu0 %v1722_v2  ;;  %1690 = vmatpush3.bf16.msra.mxu1 %v1722_v2  ;;  %v1747_v27 = vld [vmem:[%s1965_s26 + $0xc8] sm:$0xff]   ;;  %v1749_v29 = vld [vmem:[%s1965_s26 + $0xd0] sm:$0xff]   ;;  %v1751_v31 = vld [vmem:[%s1965_s26 + $0xd8] sm:$0xff]  }
  0x17   : > { %1606 = vmatprep.subr.bf16.mxu0 %v1723_v3  ;;  %1683 = vmatprep.subr.bf16.mxu1 %v1723_v3  ;;  %v1752_v32 = vld [vmem:[%s1965_s26 + $0x60] sm:$0xff]   ;;  %v1754_v34 = vld [vmem:[%s1965_s26 + $0x68] sm:$0xff]   ;;  %v1756_v36 = vld [vmem:[%s1965_s26 + $0x70] sm:$0xff]  }
  0x18   : > { %v1753_v33 = vld [vmem:[%s1965_s26 + $0xe0] sm:$0xff]   ;;  %v1755_v35 = vld [vmem:[%s1965_s26 + $0xe8] sm:$0xff]   ;;  %v1757_v37 = vld [vmem:[%s1965_s26 + $0xf0] sm:$0xff]  }
  0x19   : > { %v1758_v38 = vld [vmem:[%s1965_s26 + $0x78] sm:$0xff]   ;;  %v2017_v40 = vld [vmem:[%s2164_s2] ss:$0 sm:$0xff] }
  0x1a   : > { %1607 = vmatpush3.bf16.msra.mxu0 %v1723_v3  ;;  %1691 = vmatpush3.bf16.msra.mxu1 %v1723_v3  ;;  %v1759_v39 = vld [vmem:[%s1965_s26 + $0xf8] sm:$0xff]  }
  0x1b   : > { %1608 = vmatprep.subr.bf16.mxu0 %v1724_v6  ;;  %1684 = vmatprep.subr.bf16.mxu1 %v1724_v6 }
  0x1e   : > { %1609 = vmatpush3.bf16.msra.mxu0 %v1724_v6  ;;  %1692 = vmatpush3.bf16.msra.mxu1 %v1724_v6 }
  0x1f   : > { %1610 = vmatprep.subr.bf16.mxu0 %v1725_v7  ;;  %1685 = vmatprep.subr.bf16.mxu1 %v1725_v7 }
  0x22   : > { %1611 = vmatpush3.bf16.msra.mxu0 %v1725_v7  ;;  %1693 = vmatpush3.bf16.msra.mxu1 %v1725_v7 }
  0x23   : > { %1612 = vmatprep.subr.bf16.mxu0 %v1726_v8  ;;  %1686 = vmatprep.subr.bf16.mxu1 %v1726_v8 }
  0x26   : > { %1613 = vmatpush3.bf16.msra.mxu0 %v1726_v8  ;;  %1694 = vmatpush3.bf16.msra.mxu1 %v1726_v8 }
  0x27   : > { %1614 = vmatprep.subr.bf16.mxu0 %v1727_v9  ;;  %1687 = vmatprep.subr.bf16.mxu1 %v1727_v9 }
  0x2a   : > { %1615 = vmatpush3.bf16.msra.mxu0 %v1727_v9  ;;  %1695 = vmatpush3.bf16.msra.mxu1 %v1727_v9 }
  0x2d   : > { %1617 = vmatmul.mubr.bf16.vlgmr.msra.gmra.mxu0 %v1730_v10  ;;  %1649 = vmatmul.mubr.bf16.vlgmr.msra.gmra.mxu1 %v1731_v11 }
  0x2e   : > { %1620 = vmatprep.mubr.bf16.mxu0 %v1732_v12  ;;  %1652 = vmatprep.mubr.bf16.mxu1 %v1733_v13 }
  0x35   : > { %1621 = vmatmul.mubr.bf16.gmra.mxu0 %v1734_v14  ;;  %1653 = vmatmul.mubr.bf16.gmra.mxu1 %v1735_v15 }
  0x36   : > { %1624 = vmatprep.mubr.bf16.mxu0 %v1736_v16  ;;  %1656 = vmatprep.mubr.bf16.mxu1 %v1737_v17 }
  0x3d   : > { %1625 = vmatmul.mubr.bf16.gmra.mxu0 %v1738_v18  ;;  %1657 = vmatmul.mubr.bf16.gmra.mxu1 %v1739_v19 }
  0x3e   : > { %1628 = vmatprep.mubr.bf16.mxu0 %v1740_v20  ;;  %1660 = vmatprep.mubr.bf16.mxu1 %v1741_v21 }
  0x45   : > { %1629 = vmatmul.mubr.bf16.gmra.mxu0 %v1742_v22  ;;  %1661 = vmatmul.mubr.bf16.gmra.mxu1 %v1743_v23 }
  0x46   : > { %1632 = vmatprep.mubr.bf16.mxu0 %v1744_v24  ;;  %1664 = vmatprep.mubr.bf16.mxu1 %v1745_v25 }
  0x4d   : > { %1633 = vmatmul.mubr.bf16.gmra.mxu0 %v1746_v26  ;;  %1665 = vmatmul.mubr.bf16.gmra.mxu1 %v1747_v27 }
  0x4e   : > { %1636 = vmatprep.mubr.bf16.mxu0 %v1748_v28  ;;  %1668 = vmatprep.mubr.bf16.mxu1 %v1749_v29 }
  0x55   : > { %1637 = vmatmul.mubr.bf16.gmra.mxu0 %v1750_v30  ;;  %1669 = vmatmul.mubr.bf16.gmra.mxu1 %v1751_v31 }
  0x56   : > { %1640 = vmatprep.mubr.bf16.mxu0 %v1752_v32  ;;  %1672 = vmatprep.mubr.bf16.mxu1 %v1753_v33 }
  0x5d   : > { %1641 = vmatmul.mubr.bf16.gmra.mxu0 %v1754_v34  ;;  %1673 = vmatmul.mubr.bf16.gmra.mxu1 %v1755_v35 }
  0x5e   : > { %1644 = vmatprep.mubr.bf16.mxu0 %v1756_v36  ;;  %1676 = vmatprep.mubr.bf16.mxu1 %v1757_v37 }
  0x65   : > { %1645 = vmatmul.mubr.bf16.gmra.mxu0 %v1758_v38  ;;  %1677 = vmatmul.mubr.bf16.gmra.mxu1 %v1759_v39 }
  0xed   : > { %v1618_v41 = vpop.f32.mrf.mxu0  ;;  %v1650_v42 = vpop.f32.mrf.mxu1 }
  0xee   : > { %v1205_v43 = vadd.f32 %v1618_v41, %v2017_v40  ;;  %v1237_v44 = vadd.f32 %v1650_v42, %v2017_v40 }
  0xef   : > { %v746_v45 = vpop.f32.mrf.mxu0  ;;  %v874_v46 = vpop.f32.mrf.mxu1 }
  0xf0   : > { %1760 = vtanh.f32 %v1205_v43  ;;  %v1203_v47 = vadd.f32 %v2017_v40, %v746_v45  ;;  %v1235_v48 = vadd.f32 %v2017_v40, %v874_v46 }
  0xf1   : > { %1762 = vtanh.f32 %v1237_v44  ;;  %v1619_v49 = vpop.f32.mrf.mxu0  ;;  %v1651_v50 = vpop.f32.mrf.mxu1 }
  0xf2   : > { %1764 = vtanh.f32 %v1203_v47  ;;  %v1206_v51 = vadd.f32 %v1619_v49, %v2017_v40  ;;  %v1238_v52 = vadd.f32 %v1651_v50, %v2017_v40 }
  0xf3   : > { %1766 = vtanh.f32 %v1235_v48  ;;  %v749_v53 = vpop.f32.mrf.mxu0  ;;  %v877_v54 = vpop.f32.mrf.mxu1 }
  0xf4   : > { %1768 = vtanh.f32 %v1206_v51  ;;  %v1204_v55 = vadd.f32 %v2017_v40, %v749_v53  ;;  %v1236_v56 = vadd.f32 %v2017_v40, %v877_v54 }
  0xf5   : > { %1770 = vtanh.f32 %v1238_v52  ;;  %v1622_v57 = vpop.f32.mrf.mxu0  ;;  %v1654_v58 = vpop.f32.mrf.mxu1 }
  0xf6   : > { %1772 = vtanh.f32 %v1204_v55  ;;  %v1209_v59 = vadd.f32 %v1622_v57, %v2017_v40  ;;  %v1241_v60 = vadd.f32 %v1654_v58, %v2017_v40 }
  0xf7   : > { %1774 = vtanh.f32 %v1236_v56  ;;  %v762_v61 = vpop.f32.mrf.mxu0  ;;  %v890_v62 = vpop.f32.mrf.mxu1 }
  0xf8   : > { %1776 = vtanh.f32 %v1209_v59  ;;  %v1207_v63 = vadd.f32 %v2017_v40, %v762_v61  ;;  %v1239_v0 = vadd.f32 %v2017_v40, %v890_v62 }
  0xf9   : > { %1778 = vtanh.f32 %v1241_v60  ;;  %v1623_v1 = vpop.f32.mrf.mxu0  ;;  %v1655_v2 = vpop.f32.mrf.mxu1 }
  0xfa   : > { %1780 = vtanh.f32 %v1207_v63  ;;  %v1210_v3 = vadd.f32 %v1623_v1, %v2017_v40  ;;  %v1242_v4 = vadd.f32 %v1655_v2, %v2017_v40 }
  0xfb   : > { %1782 = vtanh.f32 %v1239_v0  ;;  %v765_v5 = vpop.f32.mrf.mxu0  ;;  %v893_v6 = vpop.f32.mrf.mxu1 }
  0xfc   : > { %1784 = vtanh.f32 %v1210_v3  ;;  %v1208_v7 = vadd.f32 %v2017_v40, %v765_v5  ;;  %v1240_v8 = vadd.f32 %v2017_v40, %v893_v6 }
  0xfd   : > { %v1761_v9 = vpop.eup %1760  ;;  %1786 = vtanh.f32 %v1242_v4  ;;  %v1626_v10 = vpop.f32.mrf.mxu0 }
  0xfe   : > { %v1658_v11 = vpop.f32.mrf.mxu1  ;;  %v1763_v12 = vpop.eup %1762  ;;  %1333 = vst [vmem:[%s2037_s19 + $0x10] sm:$0xff] %v1761_v9  ;;  %1788 = vtanh.f32 %v1208_v7  ;;  %v1213_v13 = vadd.f32 %v1626_v10, %v2017_v40 }
  0xff   : > { %v1245_v14 = vadd.f32 %v1658_v11, %v2017_v40  ;;  %v1765_v15 = vpop.eup %1764  ;;  %1365 = vst [vmem:[%s2037_s19 + $0x110] sm:$0xff] %v1763_v12  ;;  %1790 = vtanh.f32 %v1240_v8  ;;  %v778_v16 = vpop.f32.mrf.mxu0 }
 0x100   : > { %v906_v17 = vpop.f32.mrf.mxu1  ;;  %v1767_v18 = vpop.eup %1766  ;;  %1331 = vst [vmem:[%s2037_s19] sm:$0xff] %v1765_v15  ;;  %1792 = vtanh.f32 %v1213_v13  ;;  %v1211_v19 = vadd.f32 %v2017_v40, %v778_v16 }
 0x101   : > { %v1243_v20 = vadd.f32 %v2017_v40, %v906_v17  ;;  %v1769_v21 = vpop.eup %1768  ;;  %1363 = vst [vmem:[%s2037_s19 + $0x100] sm:$0xff] %v1767_v18  ;;  %1794 = vtanh.f32 %v1245_v14  ;;  %v1627_v22 = vpop.f32.mrf.mxu0 }
 0x102   : > { %v1659_v23 = vpop.f32.mrf.mxu1  ;;  %v1771_v24 = vpop.eup %1770  ;;  %1334 = vst [vmem:[%s2037_s19 + $0x18] sm:$0xff] %v1769_v21  ;;  %1796 = vtanh.f32 %v1211_v19  ;;  %v1214_v25 = vadd.f32 %v1627_v22, %v2017_v40 }
 0x103   : > { %v1246_v26 = vadd.f32 %v1659_v23, %v2017_v40  ;;  %v1773_v27 = vpop.eup %1772  ;;  %1366 = vst [vmem:[%s2037_s19 + $0x118] sm:$0xff] %v1771_v24  ;;  %1798 = vtanh.f32 %v1243_v20  ;;  %v781_v28 = vpop.f32.mrf.mxu0 }
 0x104   : > { %v909_v29 = vpop.f32.mrf.mxu1  ;;  %v1775_v30 = vpop.eup %1774  ;;  %1332 = vst [vmem:[%s2037_s19 + $0x8] sm:$0xff] %v1773_v27  ;;  %1800 = vtanh.f32 %v1214_v25  ;;  %v1212_v31 = vadd.f32 %v2017_v40, %v781_v28 }
 0x105   : > { %v1244_v32 = vadd.f32 %v2017_v40, %v909_v29  ;;  %v1777_v33 = vpop.eup %1776  ;;  %1364 = vst [vmem:[%s2037_s19 + $0x108] sm:$0xff] %v1775_v30  ;;  %1802 = vtanh.f32 %v1246_v26  ;;  %v1630_v34 = vpop.f32.mrf.mxu0 }
 0x106   : > { %v1662_v35 = vpop.f32.mrf.mxu1  ;;  %v1779_v36 = vpop.eup %1778  ;;  %1337 = vst [vmem:[%s2037_s19 + $0x30] sm:$0xff] %v1777_v33  ;;  %1804 = vtanh.f32 %v1212_v31  ;;  %v1217_v37 = vadd.f32 %v1630_v34, %v2017_v40 }
 0x107   : > { %v1249_v38 = vadd.f32 %v1662_v35, %v2017_v40  ;;  %v1781_v39 = vpop.eup %1780  ;;  %1369 = vst [vmem:[%s2037_s19 + $0x130] sm:$0xff] %v1779_v36  ;;  %1806 = vtanh.f32 %v1244_v32  ;;  %v794_v41 = vpop.f32.mrf.mxu0 }
 0x108   : > { %v922_v42 = vpop.f32.mrf.mxu1  ;;  %v1783_v43 = vpop.eup %1782  ;;  %1335 = vst [vmem:[%s2037_s19 + $0x20] sm:$0xff] %v1781_v39  ;;  %1808 = vtanh.f32 %v1217_v37  ;;  %v1215_v44 = vadd.f32 %v2017_v40, %v794_v41 }
 0x109   : > { %v1247_v45 = vadd.f32 %v2017_v40, %v922_v42  ;;  %v1785_v46 = vpop.eup %1784  ;;  %1367 = vst [vmem:[%s2037_s19 + $0x120] sm:$0xff] %v1783_v43  ;;  %1810 = vtanh.f32 %v1249_v38  ;;  %v1631_v47 = vpop.f32.mrf.mxu0 }
 0x10a   : > { %v1663_v48 = vpop.f32.mrf.mxu1  ;;  %v1787_v49 = vpop.eup %1786  ;;  %1338 = vst [vmem:[%s2037_s19 + $0x38] sm:$0xff] %v1785_v46  ;;  %1812 = vtanh.f32 %v1215_v44  ;;  %v1218_v50 = vadd.f32 %v1631_v47, %v2017_v40 }
 0x10b   : > { %v1250_v51 = vadd.f32 %v1663_v48, %v2017_v40  ;;  %v1789_v52 = vpop.eup %1788  ;;  %1370 = vst [vmem:[%s2037_s19 + $0x138] sm:$0xff] %v1787_v49  ;;  %1814 = vtanh.f32 %v1247_v45  ;;  %v797_v53 = vpop.f32.mrf.mxu0 }
 0x10c   : > { %v925_v54 = vpop.f32.mrf.mxu1  ;;  %v1791_v55 = vpop.eup %1790  ;;  %1336 = vst [vmem:[%s2037_s19 + $0x28] sm:$0xff] %v1789_v52  ;;  %1816 = vtanh.f32 %v1218_v50  ;;  %v1216_v56 = vadd.f32 %v2017_v40, %v797_v53 }
 0x10d   : > { %v1248_v57 = vadd.f32 %v2017_v40, %v925_v54  ;;  %v1793_v58 = vpop.eup %1792  ;;  %1368 = vst [vmem:[%s2037_s19 + $0x128] sm:$0xff] %v1791_v55  ;;  %1818 = vtanh.f32 %v1250_v51  ;;  %v1634_v59 = vpop.f32.mrf.mxu0 }
 0x10e   : > { %v1666_v60 = vpop.f32.mrf.mxu1  ;;  %v1795_v61 = vpop.eup %1794  ;;  %1341 = vst [vmem:[%s2037_s19 + $0x50] sm:$0xff] %v1793_v58  ;;  %1820 = vtanh.f32 %v1216_v56  ;;  %v1221_v62 = vadd.f32 %v1634_v59, %v2017_v40 }
 0x10f   : > { %v1253_v63 = vadd.f32 %v1666_v60, %v2017_v40  ;;  %v1797_v0 = vpop.eup %1796  ;;  %1373 = vst [vmem:[%s2037_s19 + $0x150] sm:$0xff] %v1795_v61  ;;  %1822 = vtanh.f32 %v1248_v57  ;;  %v810_v1 = vpop.f32.mrf.mxu0 }
 0x110   : > { %v938_v2 = vpop.f32.mrf.mxu1  ;;  %v1799_v3 = vpop.eup %1798  ;;  %1339 = vst [vmem:[%s2037_s19 + $0x40] sm:$0xff] %v1797_v0  ;;  %1824 = vtanh.f32 %v1221_v62  ;;  %v1219_v4 = vadd.f32 %v2017_v40, %v810_v1 }
 0x111   : > { %v1251_v5 = vadd.f32 %v2017_v40, %v938_v2  ;;  %v1801_v6 = vpop.eup %1800  ;;  %1371 = vst [vmem:[%s2037_s19 + $0x140] sm:$0xff] %v1799_v3  ;;  %1826 = vtanh.f32 %v1253_v63  ;;  %v1635_v7 = vpop.f32.mrf.mxu0 }
 0x112   : > { %v1667_v8 = vpop.f32.mrf.mxu1  ;;  %v1803_v9 = vpop.eup %1802  ;;  %1342 = vst [vmem:[%s2037_s19 + $0x58] sm:$0xff] %v1801_v6  ;;  %1828 = vtanh.f32 %v1219_v4  ;;  %v1222_v10 = vadd.f32 %v1635_v7, %v2017_v40 }
 0x113   : > { %v1254_v11 = vadd.f32 %v1667_v8, %v2017_v40  ;;  %v1805_v12 = vpop.eup %1804  ;;  %1374 = vst [vmem:[%s2037_s19 + $0x158] sm:$0xff] %v1803_v9  ;;  %1830 = vtanh.f32 %v1251_v5  ;;  %v813_v13 = vpop.f32.mrf.mxu0 }
 0x114   : > { %v941_v14 = vpop.f32.mrf.mxu1  ;;  %v1807_v15 = vpop.eup %1806  ;;  %1340 = vst [vmem:[%s2037_s19 + $0x48] sm:$0xff] %v1805_v12  ;;  %1832 = vtanh.f32 %v1222_v10  ;;  %v1220_v16 = vadd.f32 %v2017_v40, %v813_v13 }
 0x115   : > { %v1252_v17 = vadd.f32 %v2017_v40, %v941_v14  ;;  %v1809_v18 = vpop.eup %1808  ;;  %1372 = vst [vmem:[%s2037_s19 + $0x148] sm:$0xff] %v1807_v15  ;;  %1834 = vtanh.f32 %v1254_v11  ;;  %v1638_v19 = vpop.f32.mrf.mxu0 }
 0x116   : > { %v1670_v20 = vpop.f32.mrf.mxu1  ;;  %v1811_v21 = vpop.eup %1810  ;;  %1345 = vst [vmem:[%s2037_s19 + $0x70] sm:$0xff] %v1809_v18  ;;  %1836 = vtanh.f32 %v1220_v16  ;;  %v1225_v22 = vadd.f32 %v1638_v19, %v2017_v40 }
 0x117   : > { %v1257_v23 = vadd.f32 %v1670_v20, %v2017_v40  ;;  %v1813_v24 = vpop.eup %1812  ;;  %1377 = vst [vmem:[%s2037_s19 + $0x170] sm:$0xff] %v1811_v21  ;;  %1838 = vtanh.f32 %v1252_v17  ;;  %v826_v25 = vpop.f32.mrf.mxu0 }
 0x118   : > { %v954_v26 = vpop.f32.mrf.mxu1  ;;  %v1815_v27 = vpop.eup %1814  ;;  %1343 = vst [vmem:[%s2037_s19 + $0x60] sm:$0xff] %v1813_v24  ;;  %1840 = vtanh.f32 %v1225_v22  ;;  %v1223_v28 = vadd.f32 %v2017_v40, %v826_v25 }
 0x119   : > { %v1255_v29 = vadd.f32 %v2017_v40, %v954_v26  ;;  %v1817_v30 = vpop.eup %1816  ;;  %1375 = vst [vmem:[%s2037_s19 + $0x160] sm:$0xff] %v1815_v27  ;;  %1842 = vtanh.f32 %v1257_v23  ;;  %v1639_v31 = vpop.f32.mrf.mxu0 }
 0x11a   : > { %v1671_v32 = vpop.f32.mrf.mxu1  ;;  %v1819_v33 = vpop.eup %1818  ;;  %1346 = vst [vmem:[%s2037_s19 + $0x78] sm:$0xff] %v1817_v30  ;;  %1844 = vtanh.f32 %v1223_v28  ;;  %v1226_v34 = vadd.f32 %v1639_v31, %v2017_v40 }
 0x11b   : > { %v1258_v35 = vadd.f32 %v1671_v32, %v2017_v40  ;;  %v1821_v36 = vpop.eup %1820  ;;  %1378 = vst [vmem:[%s2037_s19 + $0x178] sm:$0xff] %v1819_v33  ;;  %1846 = vtanh.f32 %v1255_v29  ;;  %v829_v37 = vpop.f32.mrf.mxu0 }
 0x11c   : > { %v957_v38 = vpop.f32.mrf.mxu1  ;;  %v1823_v39 = vpop.eup %1822  ;;  %1344 = vst [vmem:[%s2037_s19 + $0x68] sm:$0xff] %v1821_v36  ;;  %1848 = vtanh.f32 %v1226_v34  ;;  %v1224_v41 = vadd.f32 %v2017_v40, %v829_v37 }
 0x11d   : > { %v1256_v42 = vadd.f32 %v2017_v40, %v957_v38  ;;  %v1825_v43 = vpop.eup %1824  ;;  %1376 = vst [vmem:[%s2037_s19 + $0x168] sm:$0xff] %v1823_v39  ;;  %1850 = vtanh.f32 %v1258_v35  ;;  %v1642_v44 = vpop.f32.mrf.mxu0 }
 0x11e   : > { %v1674_v45 = vpop.f32.mrf.mxu1  ;;  %v1827_v46 = vpop.eup %1826  ;;  %1349 = vst [vmem:[%s2037_s19 + $0x90] sm:$0xff] %v1825_v43  ;;  %1852 = vtanh.f32 %v1224_v41  ;;  %v1229_v47 = vadd.f32 %v1642_v44, %v2017_v40 }
 0x11f   : > { %v1261_v48 = vadd.f32 %v1674_v45, %v2017_v40  ;;  %v1829_v49 = vpop.eup %1828  ;;  %1381 = vst [vmem:[%s2037_s19 + $0x190] sm:$0xff] %v1827_v46  ;;  %1854 = vtanh.f32 %v1256_v42  ;;  %v842_v50 = vpop.f32.mrf.mxu0 }
 0x120   : > { %v970_v51 = vpop.f32.mrf.mxu1  ;;  %v1831_v52 = vpop.eup %1830  ;;  %1347 = vst [vmem:[%s2037_s19 + $0x80] sm:$0xff] %v1829_v49  ;;  %1856 = vtanh.f32 %v1229_v47  ;;  %v1227_v53 = vadd.f32 %v2017_v40, %v842_v50 }
 0x121   : > { %v1259_v54 = vadd.f32 %v2017_v40, %v970_v51  ;;  %v1833_v55 = vpop.eup %1832  ;;  %1379 = vst [vmem:[%s2037_s19 + $0x180] sm:$0xff] %v1831_v52  ;;  %1858 = vtanh.f32 %v1261_v48  ;;  %v1643_v56 = vpop.f32.mrf.mxu0 }
 0x122   : > { %v1675_v57 = vpop.f32.mrf.mxu1  ;;  %v1835_v58 = vpop.eup %1834  ;;  %1350 = vst [vmem:[%s2037_s19 + $0x98] sm:$0xff] %v1833_v55  ;;  %1860 = vtanh.f32 %v1227_v53  ;;  %v1230_v59 = vadd.f32 %v1643_v56, %v2017_v40 }
 0x123   : > { %v1262_v60 = vadd.f32 %v1675_v57, %v2017_v40  ;;  %v1837_v61 = vpop.eup %1836  ;;  %1382 = vst [vmem:[%s2037_s19 + $0x198] sm:$0xff] %v1835_v58  ;;  %1862 = vtanh.f32 %v1259_v54  ;;  %v845_v62 = vpop.f32.mrf.mxu0 }
 0x124   : > { %v973_v63 = vpop.f32.mrf.mxu1  ;;  %v1839_v0 = vpop.eup %1838  ;;  %1348 = vst [vmem:[%s2037_s19 + $0x88] sm:$0xff] %v1837_v61  ;;  %1864 = vtanh.f32 %v1230_v59  ;;  %v1228_v1 = vadd.f32 %v2017_v40, %v845_v62 }
 0x125   : > { %v1260_v2 = vadd.f32 %v2017_v40, %v973_v63  ;;  %v1841_v3 = vpop.eup %1840  ;;  %1380 = vst [vmem:[%s2037_s19 + $0x188] sm:$0xff] %v1839_v0  ;;  %1866 = vtanh.f32 %v1262_v60  ;;  %v1646_v4 = vpop.f32.mrf.mxu0 }
 0x126   : > { %v1678_v5 = vpop.f32.mrf.mxu1  ;;  %v1843_v6 = vpop.eup %1842  ;;  %1353 = vst [vmem:[%s2037_s19 + $0xb0] sm:$0xff] %v1841_v3  ;;  %1868 = vtanh.f32 %v1228_v1  ;;  %v1233_v7 = vadd.f32 %v1646_v4, %v2017_v40 }
 0x127   : > { %v1265_v8 = vadd.f32 %v1678_v5, %v2017_v40  ;;  %v1845_v9 = vpop.eup %1844  ;;  %1385 = vst [vmem:[%s2037_s19 + $0x1b0] sm:$0xff] %v1843_v6  ;;  %1870 = vtanh.f32 %v1260_v2  ;;  %v858_v10 = vpop.f32.mrf.mxu0 }
 0x128   : > { %v986_v11 = vpop.f32.mrf.mxu1  ;;  %v1847_v12 = vpop.eup %1846  ;;  %1351 = vst [vmem:[%s2037_s19 + $0xa0] sm:$0xff] %v1845_v9  ;;  %1872 = vtanh.f32 %v1233_v7  ;;  %v1231_v13 = vadd.f32 %v2017_v40, %v858_v10 }
 0x129   : > { %v1263_v14 = vadd.f32 %v2017_v40, %v986_v11  ;;  %v1849_v15 = vpop.eup %1848  ;;  %1383 = vst [vmem:[%s2037_s19 + $0x1a0] sm:$0xff] %v1847_v12  ;;  %1874 = vtanh.f32 %v1265_v8  ;;  %v1647_v16 = vpop.f32.mrf.mxu0 }
 0x12a   : > { %v1679_v17 = vpop.f32.mrf.mxu1  ;;  %v1851_v18 = vpop.eup %1850  ;;  %1354 = vst [vmem:[%s2037_s19 + $0xb8] sm:$0xff] %v1849_v15  ;;  %1876 = vtanh.f32 %v1231_v13  ;;  %v1234_v19 = vadd.f32 %v1647_v16, %v2017_v40 }
 0x12b   : > { %v1266_v20 = vadd.f32 %v1679_v17, %v2017_v40  ;;  %v1853_v21 = vpop.eup %1852  ;;  %1386 = vst [vmem:[%s2037_s19 + $0x1b8] sm:$0xff] %v1851_v18  ;;  %1878 = vtanh.f32 %v1263_v14  ;;  %v861_v22 = vpop.f32.mrf.mxu0 }
 0x12c   : > { %v989_v23 = vpop.f32.mrf.mxu1  ;;  %v1855_v24 = vpop.eup %1854  ;;  %1352 = vst [vmem:[%s2037_s19 + $0xa8] sm:$0xff] %v1853_v21  ;;  %1880 = vtanh.f32 %v1234_v19  ;;  %v1232_v25 = vadd.f32 %v2017_v40, %v861_v22 }
 0x12d   : > { %v1264_v26 = vadd.f32 %v2017_v40, %v989_v23  ;;  %v1857_v27 = vpop.eup %1856  ;;  %1384 = vst [vmem:[%s2037_s19 + $0x1a8] sm:$0xff] %v1855_v24  ;;  %1882 = vtanh.f32 %v1266_v20 }
 0x12e   : > { %v1859_v28 = vpop.eup %1858  ;;  %1357 = vst [vmem:[%s2037_s19 + $0xd0] sm:$0xff] %v1857_v27  ;;  %1884 = vtanh.f32 %v1232_v25 }
 0x12f   : > { %v1861_v29 = vpop.eup %1860  ;;  %1389 = vst [vmem:[%s2037_s19 + $0x1d0] sm:$0xff] %v1859_v28  ;;  %1886 = vtanh.f32 %v1264_v26 }
 0x130   : > { %v1863_v30 = vpop.eup %1862  ;;  %1355 = vst [vmem:[%s2037_s19 + $0xc0] sm:$0xff] %v1861_v29 }
 0x131   : > { %v1865_v31 = vpop.eup %1864  ;;  %1387 = vst [vmem:[%s2037_s19 + $0x1c0] sm:$0xff] %v1863_v30 }
 0x132   : > { %v1867_v40 = vpop.eup %1866  ;;  %1358 = vst [vmem:[%s2037_s19 + $0xd8] sm:$0xff] %v1865_v31 }
 0x133   : > { %v1869_v32 = vpop.eup %1868  ;;  %1390 = vst [vmem:[%s2037_s19 + $0x1d8] sm:$0xff] %v1867_v40 }
 0x134   : > { %v1871_v33 = vpop.eup %1870  ;;  %1356 = vst [vmem:[%s2037_s19 + $0xc8] sm:$0xff] %v1869_v32 }
 0x135   : > { %v1873_v34 = vpop.eup %1872  ;;  %1388 = vst [vmem:[%s2037_s19 + $0x1c8] sm:$0xff] %v1871_v33 }
 0x136   : > { %v1875_v35 = vpop.eup %1874  ;;  %1361 = vst [vmem:[%s2037_s19 + $0xf0] sm:$0xff] %v1873_v34 }
 0x137   : > { %v1877_v36 = vpop.eup %1876  ;;  %1393 = vst [vmem:[%s2037_s19 + $0x1f0] sm:$0xff] %v1875_v35 }
 0x138   : > { %v1879_v37 = vpop.eup %1878  ;;  %1359 = vst [vmem:[%s2037_s19 + $0xe0] sm:$0xff] %v1877_v36 }
 0x139   : > { %v1881_v38 = vpop.eup %1880  ;;  %1391 = vst [vmem:[%s2037_s19 + $0x1e0] sm:$0xff] %v1879_v37 }
 0x13a   : > { %v1883_v39 = vpop.eup %1882  ;;  %1362 = vst [vmem:[%s2037_s19 + $0xf8] sm:$0xff] %v1881_v38 }
 0x13b   : > { %v1885_v41 = vpop.eup %1884  ;;  %1394 = vst [vmem:[%s2037_s19 + $0x1f8] sm:$0xff] %v1883_v39 }
 0x13c   : > { %v1887_v42 = vpop.eup %1886  ;;  %1360 = vst [vmem:[%s2037_s19 + $0xe8] sm:$0xff] %v1885_v41 }
 0x13d   : > { %1392 = vst [vmem:[%s2037_s19 + $0x1e8] sm:$0xff] %v1887_v42 }
 0x13e PF: > { %s13_s14 = sadd.s32 1, %s1910_s14   ;;  %s2166_s12 = smov %s1906_s13 }
 0x13f   : > { %p10_p5 = scmp.ge.s32.totalorder %s13_s14, 6   ;;  %s2167_s13 = smov %s2169_s15 }
 0x141   :  { %12 = sbr.rel (!%p10_p5) target bundleno = 2 (0x2), region = 76 }

// kernel: dual_motion_gan_forward.35
= control target key start
LH: loop header
LB: loop body
LE: loop exit
PB: predicated region body
PF: predicated region fallthrough
CT: control target
= control target key end

     0   :  { %8 = vsyncpa [#allocation3], 0  ;;  %s497_s0 = inlined_call_operand.vmem [shape: f32[6,3], index: 0, kind: input, shape index: {}]   ;;  %s498_s1 = inlined_call_operand.vmem [shape: f32[3], index: 1, kind: input, shape index: {}]   ;;  %s499_s2 = inlined_call_operand.vmem [shape: f32[6,16,128], index: 2, kind: input, shape index: {}]   ;;  %s500_s3 = inlined_call_operand.vmem [shape: f32[3,16,128], index: 3, kind: output, shape index: {}]  }
   0x1   :  { %s16_s14 = sshll.u32 %s497_s0, 4  ;;  %s17_s14 = int_to_ptr.vmem [resolvable:$true] %s16_s14 }
   0x2   :  { %9 = vsyncpa [#allocation5], 0  ;;  %s26_s17 = sshll.u32 %s498_s1, 4  ;;  %s270_s18 = scalar_lea.vmem %s17_s14, 128  ;;  %s27_s17 = int_to_ptr.vmem [resolvable:$true] %s26_s17 }
   0x3   :  { %p271_p0 = scmp.ne.s32.totalorder %s17_s14, %s270_s18  ;;  %p275_p1 = scmp.lt.s32.totalorder %s17_s14, %s17_s14 }
   0x4   :  { %p276_p2 = scmp.lt.s32.totalorder %s270_s18, %s270_s18 }
   0x6   :  { %p277_p3 = por %p276_p2, %p275_p1 }
   0x8   :  { %p278_p4 = pnand %p277_p3, %p271_p0 }
   0xa   :  { %281 = shalt.err (!%p278_p4)
}
   0xb   :  { %s298_s19 = smov [#allocation2]   ;;  %s282_s20 = scalar_lea.vmem %s27_s17, 16 }
   0xc   :  { %19 = dma.vmem_to_smem %s17_s14, 128, %s298_s19, [#allocation3]  }
   0xd   :  { %p283_p5 = scmp.ne.s32.totalorder %s27_s17, %s282_s20  ;;  %p287_p6 = scmp.lt.s32.totalorder %s27_s17, %s27_s17 }
   0xe   :  { %p288_p7 = scmp.lt.s32.totalorder %s282_s20, %s282_s20 }
  0x10   :  { %p289_p8 = por %p288_p7, %p287_p6 }
  0x12   :  { %p290_p9 = pnand %p289_p8, %p283_p5 }
  0x14   :  { %293 = shalt.err (!%p290_p9)
}
  0x15   :  { %s299_s0 = smov [#allocation4]  }
  0x16   :  { %29 = dma.vmem_to_smem %s27_s17, 16, %s299_s0, [#allocation5]  }
  0x17   :  { %294 = dma.done.wait [#allocation3], 128  }
  0x18   :  { %295 = vsyncadd [#allocation3], 4294967168 }
  0x19   :  { %296 = dma.done.wait [#allocation5], 16  }
  0x1a   :  { %297 = vsyncadd [#allocation5], 4294967280 }
  0x1b   :  { %38 = sfence }
  0x1c   :  { %s326_s1 = sld [smem:[#allocation4]]  ;;  %v335_v0 = vld [vmem:[%s499_s2] sm:$0xff]  ;;  %v342_v1 = vld [vmem:[%s499_s2 + $0x8] sm:$0xff]  ;;  %v347_v2 = vld [vmem:[%s499_s2 + $0x10] sm:$0xff] }
  0x1d   :  { %s53_s21 = sld [smem:[#allocation2]]  ;;  %v354_v3 = vld [vmem:[%s499_s2 + $0x18] sm:$0xff]  ;;  %v359_v4 = vld [vmem:[%s499_s2 + $0x20] sm:$0xff]  ;;  %v367_v7 = vld [vmem:[%s499_s2 + $0x30] sm:$0xff] }
  0x1e   :  { %s215_s22 = sld [smem:[#allocation2 + $0x80]]  ;;  %v373_v10 = vld [vmem:[%s499_s2 + $0x28] sm:$0xff]  ;;  %v383_v14 = vld [vmem:[%s499_s2 + $0x38] sm:$0xff]  ;;  %v391_v16 = vld [vmem:[%s499_s2 + $0x40] sm:$0xff] }
  0x1f   :  { %s328_s23 = sld [smem:[#allocation2 + $0x100]]  ;;  %v396_v17 = vld [vmem:[%s499_s2 + $0x50] sm:$0xff]  ;;  %v403_v21 = vld [vmem:[%s499_s2 + $0x48] sm:$0xff]  ;;  %v416_v28 = vld [vmem:[%s499_s2 + $0x58] sm:$0xff] }
  0x20   :  { %s330_s24 = sld [smem:[#allocation2 + $0x180]] }
  0x21   :  { %s337_s27 = sld [smem:[#allocation2 + $0x200]] }
  0x22   :  { %s349_s5 = sld [smem:[#allocation2 + $0x280]]  ;;  %v52_v5 = vstv %s326_s1 }
  0x23   :  { %v54_v6 = vstv %s53_s21  ;;  %s362_s10 = sld [smem:[#allocation4 + $0x1]] }
  0x24   :  { %v55_v8 = vmul.f32 %v54_v6, %v335_v0  ;;  %v60_v9 = vstv %s215_s22  ;;  %v56_v11 = vmul.f32 %v54_v6, %v342_v1  ;;  %s376_s15 = sld [smem:[#allocation2 + $0x1]] }
  0x25   :  { %v61_v12 = vmul.f32 %v60_v9, %v347_v2  ;;  %v66_v13 = vstv %s328_s23  ;;  %v62_v15 = vmul.f32 %v60_v9, %v354_v3  ;;  %s386_s18 = sld [smem:[#allocation2 + $0x81]] }
  0x26   :  { %v57_v18 = vadd.f32 %v55_v8, %v52_v5  ;;  %v67_v19 = vmul.f32 %v66_v13, %v359_v4  ;;  %v72_v20 = vstv %s330_s24  ;;  %v58_v22 = vadd.f32 %v56_v11, %v52_v5  ;;  %s405_s23 = sld [smem:[#allocation2 + $0x101]] }
  0x27   :  { %v73_v23 = vmul.f32 %v72_v20, %v367_v7  ;;  %v78_v24 = vstv %s337_s27  ;;  %v68_v25 = vmul.f32 %v66_v13, %v373_v10  ;;  %s410_s25 = sld [smem:[#allocation2 + $0x181]]  ;;  %v74_v30 = vmul.f32 %v72_v20, %v383_v14 }
  0x28   :  { %v63_v26 = vadd.f32 %v61_v12, %v57_v18  ;;  %v84_v27 = vstv %s349_s5  ;;  %v64_v29 = vadd.f32 %v62_v15, %v58_v22  ;;  %s419_s28 = sld [smem:[#allocation2 + $0x201]]  ;;  %v79_v31 = vmul.f32 %v78_v24, %v391_v16 }
  0x29   :  { %v85_v32 = vmul.f32 %v84_v27, %v396_v17  ;;  %v80_v33 = vmul.f32 %v78_v24, %v403_v21  ;;  %s424_s27 = sld [smem:[#allocation2 + $0x281]]  ;;  %v104_v36 = vstv %s362_s10  ;;  %v86_v38 = vmul.f32 %v84_v27, %v416_v28 }
  0x2a   :  { %v69_v34 = vadd.f32 %v67_v19, %v63_v26  ;;  %v70_v35 = vadd.f32 %v68_v25, %v64_v29  ;;  %v106_v37 = vstv %s376_s15  ;;  %s428_s2 = sld [smem:[#allocation4 + $0x2]] }
  0x2b   :  { %v107_v39 = vmul.f32 %v106_v37, %v335_v0  ;;  %v112_v40 = vstv %s386_s18  ;;  %v108_v41 = vmul.f32 %v106_v37, %v342_v1  ;;  %s434_s29 = sld [smem:[#allocation2 + $0x2]] }
  0x2c   :  { %v75_v42 = vadd.f32 %v73_v23, %v69_v34  ;;  %v76_v43 = vadd.f32 %v74_v30, %v70_v35  ;;  %v113_v44 = vmul.f32 %v112_v40, %v347_v2  ;;  %v118_v45 = vstv %s405_s23  ;;  %s438_s30 = sld [smem:[#allocation2 + $0x82]] }
  0x2d   :  { %v109_v46 = vadd.f32 %v107_v39, %v104_v36  ;;  %v119_v47 = vmul.f32 %v118_v45, %v359_v4  ;;  %v124_v48 = vstv %s410_s25  ;;  %v110_v49 = vadd.f32 %v108_v41, %v104_v36  ;;  %s442_s4 = sld [smem:[#allocation2 + $0x102]] }
  0x2e   :  { %v81_v50 = vadd.f32 %v79_v31, %v75_v42  ;;  %v82_v51 = vadd.f32 %v80_v33, %v76_v43  ;;  %v130_v52 = vstv %s419_s28  ;;  %s445_s5 = sld [smem:[#allocation2 + $0x182]]  ;;  %v125_v54 = vmul.f32 %v124_v48, %v367_v7 }
  0x2f   :  { %v115_v53 = vadd.f32 %v113_v44, %v109_v46  ;;  %v136_v55 = vstv %s424_s27  ;;  %v114_v56 = vmul.f32 %v112_v40, %v354_v3  ;;  %s450_s6 = sld [smem:[#allocation2 + $0x202]]  ;;  %v131_v59 = vmul.f32 %v130_v52, %v391_v16 }
  0x30   :  { %v87_v57 = vadd.f32 %v85_v32, %v81_v50  ;;  %v88_v58 = vadd.f32 %v86_v38, %v82_v51  ;;  %v120_v60 = vmul.f32 %v118_v45, %v373_v10  ;;  %v137_v62 = vmul.f32 %v136_v55, %v396_v17  ;;  %s456_s7 = sld [smem:[#allocation2 + $0x282]] }
  0x31   :  { %v121_v61 = vadd.f32 %v119_v47, %v115_v53  ;;  %v116_v63 = vadd.f32 %v114_v56, %v110_v49  ;;  %v126_v5 = vmul.f32 %v124_v48, %v383_v14  ;;  %v132_v9 = vmul.f32 %v130_v52, %v403_v21 }
  0x32   :  { %v220_v6 = vmul.f32 -1.442695, %v87_v57  ;;  %v221_v8 = vmul.f32 -1.442695, %v88_v58  ;;  %v157_v11 = vstv %s428_s2  ;;  %v159_v15 = vstv %s434_s29 }
  0x33   :  { %v127_v12 = vadd.f32 %v125_v54, %v121_v61  ;;  %v122_v13 = vadd.f32 %v120_v60, %v116_v63  ;;  %v165_v18 = vstv %s438_s30  ;;  %v160_v19 = vmul.f32 %v159_v15, %v335_v0 }
  0x34   :  { %246 = vpow2.f32 %v220_v6  ;;  %v166_v20 = vmul.f32 %v165_v18, %v347_v2  ;;  %v171_v22 = vstv %s442_s4  ;;  %v138_v25 = vmul.f32 %v136_v55, %v416_v28 }
  0x35   :  { %248 = vpow2.f32 %v221_v8  ;;  %v133_v23 = vadd.f32 %v131_v59, %v127_v12  ;;  %v128_v24 = vadd.f32 %v126_v5, %v122_v13  ;;  %v162_v26 = vadd.f32 %v160_v19, %v157_v11 }
  0x36   :  { %v172_v27 = vmul.f32 %v171_v22, %v359_v4  ;;  %v177_v29 = vstv %s445_s5  ;;  %v183_v32 = vstv %s450_s6  ;;  %v161_v0 = vmul.f32 %v159_v15, %v342_v1 }
  0x37   :  { %v139_v30 = vadd.f32 %v137_v62, %v133_v23  ;;  %v134_v31 = vadd.f32 %v132_v9, %v128_v24  ;;  %v168_v33 = vadd.f32 %v166_v20, %v162_v26  ;;  %v178_v34 = vmul.f32 %v177_v29, %v367_v7 }
  0x38   :  { %v167_v2 = vmul.f32 %v165_v18, %v354_v3  ;;  %v189_v37 = vstv %s456_s7  ;;  %v184_v39 = vmul.f32 %v183_v32, %v391_v16  ;;  %v163_v40 = vadd.f32 %v161_v0, %v157_v11 }
  0x39   :  { %v229_v35 = vmul.f32 -1.442695, %v139_v30  ;;  %v140_v36 = vadd.f32 %v138_v25, %v134_v31  ;;  %v174_v38 = vadd.f32 %v172_v27, %v168_v33  ;;  %v173_v4 = vmul.f32 %v171_v22, %v373_v10 }
  0x3a   :  { %v190_v43 = vmul.f32 %v189_v37, %v396_v17  ;;  %v169_v44 = vadd.f32 %v167_v2, %v163_v40  ;;  %v179_v7 = vmul.f32 %v177_v29, %v383_v14  ;;  %v185_v45 = vmul.f32 %v183_v32, %v403_v21 }
  0x3b   :  { %250 = vpow2.f32 %v229_v35  ;;  %v230_v41 = vmul.f32 -1.442695, %v140_v36  ;;  %v180_v42 = vadd.f32 %v178_v34, %v174_v38  ;;  %v191_v16 = vmul.f32 %v189_v37, %v416_v28 }
  0x3c   :  { %v175_v3 = vadd.f32 %v173_v4, %v169_v44 }
  0x3d   :  { %252 = vpow2.f32 %v230_v41  ;;  %v186_v1 = vadd.f32 %v184_v39, %v180_v42 }
  0x3e   :  { %v181_v47 = vadd.f32 %v179_v7, %v175_v3 }
  0x3f   :  { %v192_v46 = vadd.f32 %v190_v43, %v186_v1 }
  0x40   :  { %v187_v51 = vadd.f32 %v185_v45, %v181_v47 }
  0x41   :  { %v247_v48 = vpop.eup %246  ;;  %v240_v50 = vmul.f32 -1.442695, %v192_v46 }
  0x42   :  { %v249_v49 = vpop.eup %248  ;;  %v95_v10 = vadd.f32 1.0, %v247_v48  ;;  %v193_v17 = vadd.f32 %v191_v16, %v187_v51 }
  0x43   :  { %v96_v52 = vadd.f32 1.0, %v249_v49 }
  0x44   :  { %254 = vrcp.f32 %v95_v10  ;;  %v241_v14 = vmul.f32 -1.442695, %v193_v17 }
  0x45   :  { %256 = vrcp.f32 %v96_v52 }
  0x46   :  { %258 = vpow2.f32 %v240_v50 }
  0x47   :  { %260 = vpow2.f32 %v241_v14 }
  0x48   :  { %v251_v53 = vpop.eup %250 }
  0x49   :  { %v147_v54 = vadd.f32 1.0, %v251_v53 }
  0x4a   :  { %v253_v55 = vpop.eup %252 }
  0x4b   :  { %262 = vrcp.f32 %v147_v54  ;;  %v148_v21 = vadd.f32 1.0, %v253_v55 }
  0x4d   :  { %264 = vrcp.f32 %v148_v21 }
  0x51   :  { %v255_v56 = vpop.eup %254 }
  0x52   :  { %v257_v28 = vpop.eup %256  ;;  %101 = vst [vmem:[%s500_s3] sm:$0xff] %v255_v56 }
  0x53   :  { %v259_v57 = vpop.eup %258  ;;  %102 = vst [vmem:[%s500_s3 + $0x8] sm:$0xff] %v257_v28 }
  0x54   :  { %v200_v58 = vadd.f32 1.0, %v259_v57  ;;  %v261_v59 = vpop.eup %260 }
  0x55   :  { %v201_v60 = vadd.f32 1.0, %v261_v59 }
  0x56   :  { %266 = vrcp.f32 %v200_v58 }
  0x57   :  { %268 = vrcp.f32 %v201_v60 }
  0x58   :  { %v263_v61 = vpop.eup %262 }
  0x59   :  { %231 = vst [vmem:[%s500_s3 + $0x10] sm:$0xff] %v263_v61 }
  0x5a   :  { %v265_v62 = vpop.eup %264 }
  0x5b   :  { %232 = vst [vmem:[%s500_s3 + $0x18] sm:$0xff] %v265_v62 }
  0x63   :  { %v267_v63 = vpop.eup %266 }
  0x64   :  { %242 = vst [vmem:[%s500_s3 + $0x20] sm:$0xff] %v267_v63  ;;  %v269_v5 = vpop.eup %268 }
  0x65   :  { %243 = vst [vmem:[%s500_s3 + $0x28] sm:$0xff] %v269_v5 }
  0x66   :  { %213 = vsyncpa [#allocation3], 1 }
  0x67   :  { %214 = vsyncpa [#allocation5], 1 }

// kernel: dual_motion_gan_forward.29
= control target key start
LH: loop header
LB: loop body
LE: loop exit
PB: predicated region body
PF: predicated region fallthrough
CT: control target
= control target key end

     0   :  { %s2444_s12 = smov 0   ;;  %s2446_s13 = smov 0   ;;  %s2686_s0 = inlined_call_operand.vmem [shape: bf16[2048,128], index: 0, kind: input, shape index: {}]   ;;  %s2687_s1 = inlined_call_operand.vmem [shape: bf16[128,128], index: 1, kind: input, shape index: {}]   ;;  %s2688_s2 = inlined_call_operand.vmem [shape: f32[1,128], index: 2, kind: input, shape index: {}]   ;;  %s2689_s3 = inlined_call_operand.vmem [shape: f32[2048,128], index: 3, kind: output, shape index: {}]  }
   0x1   :  { %s2448_s14 = smov 0  }
   0x2 LB: > { %s32_s15 = sadd.s32 1, %s2418_s13  ;;  %p1832_p0 = scmp.ge.s32.totalorder %s2422_s14, 1  ;;  %s2422_s14 = sphi %s2448_s14, %s13_s14   ;;  %s2418_s13 = sphi %s2446_s13, %s2691_s13   ;;  %s2414_s12 = sphi %s2444_s12, %s2690_s12  }
   0x3   : > { %p34_p1 = scmp.ge.s32.totalorder %s32_s15, 4  ;;  %p188_p2 = scmp.lt.s32.totalorder %s2422_s14, 5 }
   0x5   : > { %s2693_s15 = smov (%p34_p1, %s32_s15), 0  ;;  %p189_p3 = pnand %p1832_p0, %p188_p2 }
   0x6   : > { %s1833_s18 = sshll.u32 (!%p189_p3), %s2414_s12, 6 }
   0x7   : > { %192 = sbr.rel (%p189_p3) target bundleno = 384 (0x180), region = 32  ;;  %p230_p4 = scmp.lt.s32.totalorder (!%p189_p3), %s1833_s18, 255 }
   0xc   : > { %v2104_v0 = vld [vmem:[%s2687_s1 + $0x38] sm:$0xff]   ;;  %v2105_v1 = vld [vmem:[%s2687_s1 + $0x30] sm:$0xff]   ;;  %s2695_s18 = smov (!%p230_p4, %s1833_s18), 255  ;;  %v2106_v2 = vld [vmem:[%s2687_s1 + $0x28] sm:$0xff]  }
   0xd   : > { %1984 = vmatprep.subr.bf16.mxu0 %v2104_v0  ;;  %2064 = vmatprep.subr.bf16.mxu1 %v2104_v0  ;;  %s1834_s23 = sshll.u32 %s2695_s18, 2  ;;  %v2107_v3 = vld [vmem:[%s2687_s1 + $0x20] sm:$0xff]   ;;  %v2108_v6 = vld [vmem:[%s2687_s1 + $0x18] sm:$0xff]   ;;  %v2109_v7 = vld [vmem:[%s2687_s1 + $0x10] sm:$0xff]   ;;  %s1836_s12 = sshll.u32 %s2695_s18, 3 }
   0xe   : > { %1985 = vmatpush3.bf16.msra.mxu0 %v2104_v0  ;;  %2072 = vmatpush3.bf16.msra.mxu1 %v2104_v0  ;;  %s2477_s26 = scalar_lea.vmem %s2686_s0, %s1834_s23  ;;  %v2110_v8 = vld [vmem:[%s2687_s1 + $0x8] sm:$0xff]   ;;  %v2111_v9 = vld [vmem:[%s2687_s1] sm:$0xff]   ;;  %s2554_s18 = scalar_lea.vmem %s2689_s3, %s1836_s12 }
   0xf   : > { %1986 = vmatprep.subr.bf16.mxu0 %v2105_v1  ;;  %2065 = vmatprep.subr.bf16.mxu1 %v2105_v1  ;;  %v2112_v4 = vld [vmem:[%s2477_s26] sm:$0xff]   ;;  %v2114_v10 = vld [vmem:[%s2477_s26 + $0x8] sm:$0xff]   ;;  %v2116_v12 = vld [vmem:[%s2477_s26 + $0x10] sm:$0xff]  }
  0x10   : > { %v2113_v5 = vld [vmem:[%s2477_s26 + $0x80] sm:$0xff]   ;;  %2000 = vmatprep.mubr.bf16.mxu0 %v2112_v4  ;;  %v2115_v11 = vld [vmem:[%s2477_s26 + $0x88] sm:$0xff]   ;;  %v2117_v13 = vld [vmem:[%s2477_s26 + $0x90] sm:$0xff]  }
  0x11   : > { %2032 = vmatprep.mubr.bf16.mxu1 %v2113_v5  ;;  %v2118_v14 = vld [vmem:[%s2477_s26 + $0x18] sm:$0xff]   ;;  %v2120_v16 = vld [vmem:[%s2477_s26 + $0x20] sm:$0xff]   ;;  %v2122_v18 = vld [vmem:[%s2477_s26 + $0x28] sm:$0xff]  }
  0x12   : > { %1987 = vmatpush3.bf16.msra.mxu0 %v2105_v1  ;;  %2073 = vmatpush3.bf16.msra.mxu1 %v2105_v1  ;;  %v2119_v15 = vld [vmem:[%s2477_s26 + $0x98] sm:$0xff]   ;;  %v2121_v17 = vld [vmem:[%s2477_s26 + $0xa0] sm:$0xff]   ;;  %v2123_v19 = vld [vmem:[%s2477_s26 + $0xa8] sm:$0xff]  }
  0x13   : > { %1988 = vmatprep.subr.bf16.mxu0 %v2106_v2  ;;  %2066 = vmatprep.subr.bf16.mxu1 %v2106_v2  ;;  %v2124_v20 = vld [vmem:[%s2477_s26 + $0x30] sm:$0xff]   ;;  %v2126_v22 = vld [vmem:[%s2477_s26 + $0x38] sm:$0xff]   ;;  %v2128_v24 = vld [vmem:[%s2477_s26 + $0x40] sm:$0xff]  }
  0x14   : > { %v2125_v21 = vld [vmem:[%s2477_s26 + $0xb0] sm:$0xff]   ;;  %v2127_v23 = vld [vmem:[%s2477_s26 + $0xb8] sm:$0xff]   ;;  %v2129_v25 = vld [vmem:[%s2477_s26 + $0xc0] sm:$0xff]  }
  0x15   : > { %v2130_v26 = vld [vmem:[%s2477_s26 + $0x48] sm:$0xff]   ;;  %v2132_v28 = vld [vmem:[%s2477_s26 + $0x50] sm:$0xff]   ;;  %v2134_v30 = vld [vmem:[%s2477_s26 + $0x58] sm:$0xff]  }
  0x16   : > { %1989 = vmatpush3.bf16.msra.mxu0 %v2106_v2  ;;  %2074 = vmatpush3.bf16.msra.mxu1 %v2106_v2  ;;  %v2131_v27 = vld [vmem:[%s2477_s26 + $0xc8] sm:$0xff]   ;;  %v2133_v29 = vld [vmem:[%s2477_s26 + $0xd0] sm:$0xff]   ;;  %v2135_v31 = vld [vmem:[%s2477_s26 + $0xd8] sm:$0xff]  }
  0x17   : > { %1990 = vmatprep.subr.bf16.mxu0 %v2107_v3  ;;  %2067 = vmatprep.subr.bf16.mxu1 %v2107_v3  ;;  %v2136_v32 = vld [vmem:[%s2477_s26 + $0x60] sm:$0xff]   ;;  %v2138_v34 = vld [vmem:[%s2477_s26 + $0x68] sm:$0xff]   ;;  %v2140_v36 = vld [vmem:[%s2477_s26 + $0x70] sm:$0xff]  }
  0x18   : > { %v2137_v33 = vld [vmem:[%s2477_s26 + $0xe0] sm:$0xff]   ;;  %v2139_v35 = vld [vmem:[%s2477_s26 + $0xe8] sm:$0xff]   ;;  %v2141_v37 = vld [vmem:[%s2477_s26 + $0xf0] sm:$0xff]  }
  0x19   : > { %v2142_v38 = vld [vmem:[%s2477_s26 + $0x78] sm:$0xff]   ;;  %v2529_v40 = vld [vmem:[%s2688_s2] ss:$0 sm:$0xff] }
  0x1a   : > { %1991 = vmatpush3.bf16.msra.mxu0 %v2107_v3  ;;  %2075 = vmatpush3.bf16.msra.mxu1 %v2107_v3  ;;  %v2143_v39 = vld [vmem:[%s2477_s26 + $0xf8] sm:$0xff]  }
  0x1b   : > { %1992 = vmatprep.subr.bf16.mxu0 %v2108_v6  ;;  %2068 = vmatprep.subr.bf16.mxu1 %v2108_v6 }
  0x1e   : > { %1993 = vmatpush3.bf16.msra.mxu0 %v2108_v6  ;;  %2076 = vmatpush3.bf16.msra.mxu1 %v2108_v6 }
  0x1f   : > { %1994 = vmatprep.subr.bf16.mxu0 %v2109_v7  ;;  %2069 = vmatprep.subr.bf16.mxu1 %v2109_v7 }
  0x22   : > { %1995 = vmatpush3.bf16.msra.mxu0 %v2109_v7  ;;  %2077 = vmatpush3.bf16.msra.mxu1 %v2109_v7 }
  0x23   : > { %1996 = vmatprep.subr.bf16.mxu0 %v2110_v8  ;;  %2070 = vmatprep.subr.bf16.mxu1 %v2110_v8 }
  0x26   : > { %1997 = vmatpush3.bf16.msra.mxu0 %v2110_v8  ;;  %2078 = vmatpush3.bf16.msra.mxu1 %v2110_v8 }
  0x27   : > { %1998 = vmatprep.subr.bf16.mxu0 %v2111_v9  ;;  %2071 = vmatprep.subr.bf16.mxu1 %v2111_v9 }
  0x2a   : > { %1999 = vmatpush3.bf16.msra.mxu0 %v2111_v9  ;;  %2079 = vmatpush3.bf16.msra.mxu1 %v2111_v9 }
  0x2d   : > { %2001 = vmatmul.mubr.bf16.vlgmr.msra.gmra.mxu0 %v2114_v10  ;;  %2033 = vmatmul.mubr.bf16.vlgmr.msra.gmra.mxu1 %v2115_v11 }
  0x2e   : > { %2004 = vmatprep.mubr.bf16.mxu0 %v2116_v12  ;;  %2036 = vmatprep.mubr.bf16.mxu1 %v2117_v13 }
  0x35   : > { %2005 = vmatmul.mubr.bf16.gmra.mxu0 %v2118_v14  ;;  %2037 = vmatmul.mubr.bf16.gmra.mxu1 %v2119_v15 }
  0x36   : > { %2008 = vmatprep.mubr.bf16.mxu0 %v2120_v16  ;;  %2040 = vmatprep.mubr.bf16.mxu1 %v2121_v17 }
  0x3d   : > { %2009 = vmatmul.mubr.bf16.gmra.mxu0 %v2122_v18  ;;  %2041 = vmatmul.mubr.bf16.gmra.mxu1 %v2123_v19 }
  0x3e   : > { %2012 = vmatprep.mubr.bf16.mxu0 %v2124_v20  ;;  %2044 = vmatprep.mubr.bf16.mxu1 %v2125_v21 }
  0x45   : > { %2013 = vmatmul.mubr.bf16.gmra.mxu0 %v2126_v22  ;;  %2045 = vmatmul.mubr.bf16.gmra.mxu1 %v2127_v23 }
  0x46   : > { %2016 = vmatprep.mubr.bf16.mxu0 %v2128_v24  ;;  %2048 = vmatprep.mubr.bf16.mxu1 %v2129_v25 }
  0x4d   : > { %2017 = vmatmul.mubr.bf16.gmra.mxu0 %v2130_v26  ;;  %2049 = vmatmul.mubr.bf16.gmra.mxu1 %v2131_v27 }
  0x4e   : > { %2020 = vmatprep.mubr.bf16.mxu0 %v2132_v28  ;;  %2052 = vmatprep.mubr.bf16.mxu1 %v2133_v29 }
  0x55   : > { %2021 = vmatmul.mubr.bf16.gmra.mxu0 %v2134_v30  ;;  %2053 = vmatmul.mubr.bf16.gmra.mxu1 %v2135_v31 }
  0x56   : > { %2024 = vmatprep.mubr.bf16.mxu0 %v2136_v32  ;;  %2056 = vmatprep.mubr.bf16.mxu1 %v2137_v33 }
  0x5d   : > { %2025 = vmatmul.mubr.bf16.gmra.mxu0 %v2138_v34  ;;  %2057 = vmatmul.mubr.bf16.gmra.mxu1 %v2139_v35 }
  0x5e   : > { %2028 = vmatprep.mubr.bf16.mxu0 %v2140_v36  ;;  %2060 = vmatprep.mubr.bf16.mxu1 %v2141_v37 }
  0x65   : > { %2029 = vmatmul.mubr.bf16.gmra.mxu0 %v2142_v38  ;;  %2061 = vmatmul.mubr.bf16.gmra.mxu1 %v2143_v39 }
  0xed   : > { %v2002_v41 = vpop.f32.mrf.mxu0  ;;  %v2034_v42 = vpop.f32.mrf.mxu1 }
  0xee   : > { %v1205_v43 = vadd.f32 %v2002_v41, %v2529_v40  ;;  %v1237_v44 = vadd.f32 %v2034_v42, %v2529_v40 }
  0xef   : > { %v746_v45 = vpop.f32.mrf.mxu0  ;;  %v874_v46 = vpop.f32.mrf.mxu1 }
  0xf0   : > { %v1880_v47 = vmul.f32 -1.442695, %v1205_v43  ;;  %v1912_v48 = vmul.f32 -1.442695, %v1237_v44  ;;  %v1203_v49 = vadd.f32 %v2529_v40, %v746_v45  ;;  %v1235_v50 = vadd.f32 %v2529_v40, %v874_v46 }
  0xf1   : > { %v2003_v51 = vpop.f32.mrf.mxu0  ;;  %v2035_v52 = vpop.f32.mrf.mxu1 }
  0xf2   : > { %2144 = vpow2.f32 %v1880_v47  ;;  %v1878_v53 = vmul.f32 -1.442695, %v1203_v49  ;;  %v1910_v54 = vmul.f32 -1.442695, %v1235_v50  ;;  %v1206_v55 = vadd.f32 %v2003_v51, %v2529_v40 }
  0xf3   : > { %2146 = vpow2.f32 %v1912_v48  ;;  %v1238_v56 = vadd.f32 %v2035_v52, %v2529_v40  ;;  %v749_v57 = vpop.f32.mrf.mxu0  ;;  %v877_v58 = vpop.f32.mrf.mxu1 }
  0xf4   : > { %2148 = vpow2.f32 %v1878_v53  ;;  %v1881_v59 = vmul.f32 -1.442695, %v1206_v55  ;;  %v1204_v60 = vadd.f32 %v2529_v40, %v749_v57  ;;  %v1236_v61 = vadd.f32 %v2529_v40, %v877_v58 }
  0xf5   : > { %2150 = vpow2.f32 %v1910_v54  ;;  %v1913_v62 = vmul.f32 -1.442695, %v1238_v56  ;;  %v2006_v63 = vpop.f32.mrf.mxu0  ;;  %v2038_v0 = vpop.f32.mrf.mxu1 }
  0xf6   : > { %2152 = vpow2.f32 %v1881_v59  ;;  %v1879_v1 = vmul.f32 -1.442695, %v1204_v60  ;;  %v1911_v2 = vmul.f32 -1.442695, %v1236_v61  ;;  %v1209_v3 = vadd.f32 %v2006_v63, %v2529_v40 }
  0xf7   : > { %2154 = vpow2.f32 %v1913_v62  ;;  %v1241_v4 = vadd.f32 %v2038_v0, %v2529_v40  ;;  %v762_v5 = vpop.f32.mrf.mxu0  ;;  %v890_v6 = vpop.f32.mrf.mxu1 }
  0xf8   : > { %2156 = vpow2.f32 %v1879_v1  ;;  %v1884_v7 = vmul.f32 -1.442695, %v1209_v3  ;;  %v1207_v8 = vadd.f32 %v2529_v40, %v762_v5  ;;  %v1239_v9 = vadd.f32 %v2529_v40, %v890_v6 }
  0xf9   : > { %2158 = vpow2.f32 %v1911_v2  ;;  %v1916_v10 = vmul.f32 -1.442695, %v1241_v4  ;;  %v2007_v11 = vpop.f32.mrf.mxu0  ;;  %v2039_v12 = vpop.f32.mrf.mxu1 }
  0xfa   : > { %2160 = vpow2.f32 %v1884_v7  ;;  %v1882_v13 = vmul.f32 -1.442695, %v1207_v8  ;;  %v1914_v14 = vmul.f32 -1.442695, %v1239_v9  ;;  %v1210_v15 = vadd.f32 %v2007_v11, %v2529_v40 }
  0xfb   : > { %2162 = vpow2.f32 %v1916_v10  ;;  %v1242_v16 = vadd.f32 %v2039_v12, %v2529_v40  ;;  %v765_v17 = vpop.f32.mrf.mxu0  ;;  %v893_v18 = vpop.f32.mrf.mxu1 }
  0xfc   : > { %2164 = vpow2.f32 %v1882_v13  ;;  %v1885_v19 = vmul.f32 -1.442695, %v1210_v15  ;;  %v1208_v20 = vadd.f32 %v2529_v40, %v765_v17  ;;  %v1240_v21 = vadd.f32 %v2529_v40, %v893_v18 }
  0xfd   : > { %2166 = vpow2.f32 %v1914_v14  ;;  %v1917_v22 = vmul.f32 -1.442695, %v1242_v16  ;;  %v2010_v23 = vpop.f32.mrf.mxu0  ;;  %v2042_v24 = vpop.f32.mrf.mxu1 }
  0xfe   : > { %2168 = vpow2.f32 %v1885_v19  ;;  %v1883_v25 = vmul.f32 -1.442695, %v1208_v20  ;;  %v1915_v26 = vmul.f32 -1.442695, %v1240_v21  ;;  %v1213_v58 = vadd.f32 %v2010_v23, %v2529_v40 }
  0xff   : > { %v2145_v27 = vpop.eup %2144  ;;  %2170 = vpow2.f32 %v1917_v22  ;;  %v778_v28 = vpop.f32.mrf.mxu0  ;;  %v1245_v62 = vadd.f32 %v2042_v24, %v2529_v40 }
 0x100   : > { %v906_v29 = vpop.f32.mrf.mxu1  ;;  %v2147_v30 = vpop.eup %2146  ;;  %v1461_v31 = vadd.f32 1.0, %v2145_v27  ;;  %2172 = vpow2.f32 %v1883_v25  ;;  %v1211_v1 = vadd.f32 %v2529_v40, %v778_v28  ;;  %v1888_v8 = vmul.f32 -1.442695, %v1213_v58 }
 0x101   : > { %v2149_v32 = vpop.eup %2148  ;;  %v1493_v33 = vadd.f32 1.0, %v2147_v30  ;;  %2174 = vpow2.f32 %v1915_v26  ;;  %v2011_v34 = vpop.f32.mrf.mxu0  ;;  %v1243_v4 = vadd.f32 %v2529_v40, %v906_v29  ;;  %v1920_v13 = vmul.f32 -1.442695, %v1245_v62 }
 0x102   : > { %v2151_v35 = vpop.eup %2150  ;;  %2176 = vrcp.f32 %v1461_v31  ;;  %v1459_v36 = vadd.f32 1.0, %v2149_v32  ;;  %v2043_v37 = vpop.f32.mrf.mxu1  ;;  %v1214_v9 = vadd.f32 %v2011_v34, %v2529_v40  ;;  %v1886_v16 = vmul.f32 -1.442695, %v1211_v1 }
 0x103   : > { %v2153_v38 = vpop.eup %2152  ;;  %2178 = vrcp.f32 %v1493_v33  ;;  %v1491_v39 = vadd.f32 1.0, %v2151_v35  ;;  %v781_v45 = vpop.f32.mrf.mxu0  ;;  %v1246_v14 = vadd.f32 %v2043_v37, %v2529_v40  ;;  %v1918_v19 = vmul.f32 -1.442695, %v1243_v4 }
 0x104   : > { %v2155_v41 = vpop.eup %2154  ;;  %2180 = vrcp.f32 %v1459_v36  ;;  %v1462_v42 = vadd.f32 1.0, %v2153_v38  ;;  %v909_v48 = vpop.f32.mrf.mxu1  ;;  %v1212_v17 = vadd.f32 %v2529_v40, %v781_v45  ;;  %v1889_v23 = vmul.f32 -1.442695, %v1214_v9 }
 0x105   : > { %v2157_v43 = vpop.eup %2156  ;;  %2182 = vrcp.f32 %v1491_v39  ;;  %v1494_v44 = vadd.f32 1.0, %v2155_v41  ;;  %v2014_v55 = vpop.f32.mrf.mxu0  ;;  %v1244_v20 = vadd.f32 %v2529_v40, %v909_v48  ;;  %v1921_v27 = vmul.f32 -1.442695, %v1246_v14 }
 0x106   : > { %v2159_v46 = vpop.eup %2158  ;;  %2184 = vrcp.f32 %v1462_v42  ;;  %v1460_v47 = vadd.f32 1.0, %v2157_v43  ;;  %v2046_v59 = vpop.f32.mrf.mxu1  ;;  %v1217_v24 = vadd.f32 %v2014_v55, %v2529_v40  ;;  %v1887_v30 = vmul.f32 -1.442695, %v1212_v17 }
 0x107   : > { %v2161_v49 = vpop.eup %2160  ;;  %2186 = vrcp.f32 %v1494_v44  ;;  %v1492_v50 = vadd.f32 1.0, %v2159_v46  ;;  %v794_v5 = vpop.f32.mrf.mxu0  ;;  %v1249_v28 = vadd.f32 %v2046_v59, %v2529_v40  ;;  %v1919_v33 = vmul.f32 -1.442695, %v1244_v20 }
 0x108   : > { %v2163_v51 = vpop.eup %2162  ;;  %2188 = vrcp.f32 %v1460_v47  ;;  %v1465_v52 = vadd.f32 1.0, %v2161_v49  ;;  %v922_v10 = vpop.f32.mrf.mxu1  ;;  %v1215_v31 = vadd.f32 %v2529_v40, %v794_v5  ;;  %v1892_v37 = vmul.f32 -1.442695, %v1217_v24 }
 0x109   : > { %v2165_v53 = vpop.eup %2164  ;;  %2190 = vrcp.f32 %v1492_v50  ;;  %v1497_v54 = vadd.f32 1.0, %v2163_v51  ;;  %v2015_v21 = vpop.f32.mrf.mxu0  ;;  %v1247_v34 = vadd.f32 %v2529_v40, %v922_v10  ;;  %v1924_v42 = vmul.f32 -1.442695, %v1249_v28 }
 0x10a   : > { %v2167_v56 = vpop.eup %2166  ;;  %2192 = vrcp.f32 %v1465_v52  ;;  %v1463_v57 = vadd.f32 1.0, %v2165_v53  ;;  %v2047_v25 = vpop.f32.mrf.mxu1  ;;  %v1218_v38 = vadd.f32 %v2015_v21, %v2529_v40  ;;  %v1890_v45 = vmul.f32 -1.442695, %v1215_v31 }
 0x10b   : > { %v2169_v60 = vpop.eup %2168  ;;  %2194 = vrcp.f32 %v1497_v54  ;;  %v1495_v61 = vadd.f32 1.0, %v2167_v56  ;;  %v797_v35 = vpop.f32.mrf.mxu0  ;;  %v1250_v43 = vadd.f32 %v2047_v25, %v2529_v40  ;;  %v1922_v48 = vmul.f32 -1.442695, %v1247_v34 }
 0x10c   : > { %v2171_v63 = vpop.eup %2170  ;;  %2196 = vrcp.f32 %v1463_v57  ;;  %v1466_v0 = vadd.f32 1.0, %v2169_v60  ;;  %v925_v39 = vpop.f32.mrf.mxu1  ;;  %v1216_v46 = vadd.f32 %v2529_v40, %v797_v35  ;;  %v1893_v52 = vmul.f32 -1.442695, %v1218_v38 }
 0x10d   : > { %v2173_v2 = vpop.eup %2172  ;;  %2198 = vrcp.f32 %v1495_v61  ;;  %v1498_v3 = vadd.f32 1.0, %v2171_v63  ;;  %v1248_v49 = vadd.f32 %v2529_v40, %v925_v39  ;;  %v2579_v50 = vpop.f32.mrf.mxu0  ;;  %v1925_v55 = vmul.f32 -1.442695, %v1250_v43 }
 0x10e   : > { %v2175_v6 = vpop.eup %2174  ;;  %2200 = vrcp.f32 %v1466_v0  ;;  %v1464_v7 = vadd.f32 1.0, %v2173_v2  ;;  %v2582_v53 = vpop.f32.mrf.mxu1  ;;  %v1891_v57 = vmul.f32 -1.442695, %v1216_v46 }
 0x10f   : > { %v2177_v11 = vpop.eup %2176  ;;  %2202 = vrcp.f32 %v1498_v3  ;;  %v1496_v12 = vadd.f32 1.0, %v2175_v6  ;;  %v1923_v59 = vmul.f32 -1.442695, %v1248_v49  ;;  %v810_v60 = vpop.f32.mrf.mxu0  ;;  %v1253_v31 = vadd.f32 %v2582_v53, %v2529_v40 }
 0x110   : > { %v2179_v15 = vpop.eup %2178  ;;  %1653 = vst [vmem:[%s2554_s18 + $0x10] sm:$0xff] %v2177_v11  ;;  %2204 = vrcp.f32 %v1464_v7  ;;  %v938_v62 = vpop.f32.mrf.mxu1  ;;  %v1219_v34 = vadd.f32 %v2529_v40, %v810_v60 }
 0x111   : > { %v2181_v18 = vpop.eup %2180  ;;  %1685 = vst [vmem:[%s2554_s18 + $0x110] sm:$0xff] %v2179_v15  ;;  %2206 = vrcp.f32 %v1496_v12  ;;  %v2019_v4 = vpop.f32.mrf.mxu0 }
 0x112   : > { %v2183_v22 = vpop.eup %2182  ;;  %1651 = vst [vmem:[%s2554_s18] sm:$0xff] %v2181_v18  ;;  %2208 = vpow2.f32 %v1888_v8  ;;  %v2051_v7 = vpop.f32.mrf.mxu1  ;;  %v1222_v43 = vadd.f32 %v2019_v4, %v2529_v40 }
 0x113   : > { %v2185_v26 = vpop.eup %2184  ;;  %1683 = vst [vmem:[%s2554_s18 + $0x100] sm:$0xff] %v2183_v22  ;;  %2210 = vpow2.f32 %v1920_v13  ;;  %v813_v14 = vpop.f32.mrf.mxu0 }
 0x114   : > { %v2187_v29 = vpop.eup %2186  ;;  %1654 = vst [vmem:[%s2554_s18 + $0x18] sm:$0xff] %v2185_v26  ;;  %2212 = vpow2.f32 %v1886_v16  ;;  %v941_v17 = vpop.f32.mrf.mxu1 }
 0x115   : > { %v2189_v32 = vpop.eup %2188  ;;  %1686 = vst [vmem:[%s2554_s18 + $0x118] sm:$0xff] %v2187_v29  ;;  %2214 = vpow2.f32 %v1918_v19  ;;  %v2022_v24 = vpop.f32.mrf.mxu0 }
 0x116   : > { %v2191_v36 = vpop.eup %2190  ;;  %1652 = vst [vmem:[%s2554_s18 + $0x8] sm:$0xff] %v2189_v32  ;;  %2216 = vpow2.f32 %v1889_v23  ;;  %v2054_v28 = vpop.f32.mrf.mxu1 }
 0x117   : > { %v2193_v41 = vpop.eup %2192  ;;  %1684 = vst [vmem:[%s2554_s18 + $0x108] sm:$0xff] %v2191_v36  ;;  %2218 = vpow2.f32 %v1921_v27  ;;  %v1221_v27 = vadd.f32 %v2579_v50, %v2529_v40  ;;  %v826_v38 = vpop.f32.mrf.mxu0  ;;  %v1894_v50 = vmul.f32 -1.442695, %v1219_v34 }
 0x118   : > { %v2195_v44 = vpop.eup %2194  ;;  %1657 = vst [vmem:[%s2554_s18 + $0x30] sm:$0xff] %v2193_v41  ;;  %2220 = vpow2.f32 %v1887_v30 }
 0x119   : > { %v2197_v47 = vpop.eup %2196  ;;  %1689 = vst [vmem:[%s2554_s18 + $0x130] sm:$0xff] %v2195_v44  ;;  %2222 = vpow2.f32 %v1919_v33  ;;  %v954_v44 = vpop.f32.mrf.mxu1 }
 0x11a   : > { %v2199_v51 = vpop.eup %2198  ;;  %1655 = vst [vmem:[%s2554_s18 + $0x20] sm:$0xff] %v2197_v47  ;;  %2224 = vpow2.f32 %v1892_v37  ;;  %v1251_v37 = vadd.f32 %v2529_v40, %v938_v62  ;;  %v1928_v47 = vmul.f32 -1.442695, %v1253_v31  ;;  %v1257_v62 = vadd.f32 %v2054_v28, %v2529_v40 }
 0x11b   : > { %v2201_v54 = vpop.eup %2200  ;;  %1687 = vst [vmem:[%s2554_s18 + $0x120] sm:$0xff] %v2199_v51  ;;  %2226 = vpow2.f32 %v1924_v42  ;;  %v1896_v42 = vmul.f32 -1.442695, %v1221_v27  ;;  %v1220_v51 = vadd.f32 %v2529_v40, %v813_v14  ;;  %v1255_v4 = vadd.f32 %v2529_v40, %v954_v44 }
 0x11c   : > { %v2203_v56 = vpop.eup %2202  ;;  %1658 = vst [vmem:[%s2554_s18 + $0x38] sm:$0xff] %v2201_v54  ;;  %2228 = vpow2.f32 %v1890_v45  ;;  %v1926_v53 = vmul.f32 -1.442695, %v1251_v37  ;;  %v1252_v54 = vadd.f32 %v2529_v40, %v941_v17 }
 0x11d   : > { %v2205_v58 = vpop.eup %2204  ;;  %1690 = vst [vmem:[%s2554_s18 + $0x138] sm:$0xff] %v2203_v56  ;;  %2230 = vpow2.f32 %v1922_v48  ;;  %v1254_v48 = vadd.f32 %v2051_v7, %v2529_v40  ;;  %v1930_v17 = vmul.f32 -1.442695, %v1255_v4 }
 0x11e   : > { %v2207_v61 = vpop.eup %2206  ;;  %1656 = vst [vmem:[%s2554_s18 + $0x28] sm:$0xff] %v2205_v58  ;;  %2232 = vpow2.f32 %v1893_v52  ;;  %v1225_v58 = vadd.f32 %v2022_v24, %v2529_v40 }
 0x11f   : > { %v2209_v63 = vpop.eup %2208  ;;  %1688 = vst [vmem:[%s2554_s18 + $0x128] sm:$0xff] %v2207_v61  ;;  %2234 = vpow2.f32 %v1925_v55  ;;  %v2023_v55 = vpop.f32.mrf.mxu0  ;;  %v1929_v61 = vmul.f32 -1.442695, %v1254_v48 }
 0x120   : > { %v2211_v0 = vpop.eup %2210  ;;  %v1469_v1 = vadd.f32 1.0, %v2209_v63  ;;  %2236 = vpow2.f32 %v1891_v57  ;;  %v1897_v57 = vmul.f32 -1.442695, %v1222_v43  ;;  %v1900_v7 = vmul.f32 -1.442695, %v1225_v58 }
 0x121   : > { %v2213_v2 = vpop.eup %2212  ;;  %v1501_v3 = vadd.f32 1.0, %v2211_v0  ;;  %2238 = vpow2.f32 %v1923_v59  ;;  %v2055_v59 = vpop.f32.mrf.mxu1  ;;  %v1895_v0 = vmul.f32 -1.442695, %v1220_v51 }
 0x122   : > { %v2215_v5 = vpop.eup %2214  ;;  %2240 = vrcp.f32 %v1469_v1  ;;  %v1467_v6 = vadd.f32 1.0, %v2213_v2  ;;  %v1223_v1 = vadd.f32 %v2529_v40, %v826_v38 }
 0x123   : > { %v2217_v8 = vpop.eup %2216  ;;  %2242 = vrcp.f32 %v1501_v3  ;;  %v1499_v9 = vadd.f32 1.0, %v2215_v5  ;;  %v1927_v3 = vmul.f32 -1.442695, %v1252_v54  ;;  %v829_v5 = vpop.f32.mrf.mxu0 }
 0x124   : > { %v2219_v10 = vpop.eup %2218  ;;  %2244 = vrcp.f32 %v1467_v6  ;;  %v1470_v11 = vadd.f32 1.0, %v2217_v8  ;;  %v1226_v8 = vadd.f32 %v2023_v55, %v2529_v40  ;;  %v1898_v14 = vmul.f32 -1.442695, %v1223_v1 }
 0x125   : > { %v2221_v12 = vpop.eup %2220  ;;  %2246 = vrcp.f32 %v1499_v9  ;;  %v1502_v13 = vadd.f32 1.0, %v2219_v10  ;;  %v957_v9 = vpop.f32.mrf.mxu1 }
 0x126   : > { %v2223_v15 = vpop.eup %2222  ;;  %2248 = vrcp.f32 %v1470_v11  ;;  %v1468_v16 = vadd.f32 1.0, %v2221_v12  ;;  %v1932_v11 = vmul.f32 -1.442695, %v1257_v62  ;;  %v1258_v12 = vadd.f32 %v2055_v59, %v2529_v40 }
 0x127   : > { %v2225_v18 = vpop.eup %2224  ;;  %2250 = vrcp.f32 %v1502_v13  ;;  %v1500_v19 = vadd.f32 1.0, %v2223_v15  ;;  %v1224_v15 = vadd.f32 %v2529_v40, %v829_v5 }
 0x128   : > { %v2227_v20 = vpop.eup %2226  ;;  %2252 = vrcp.f32 %v1468_v16  ;;  %v1473_v21 = vadd.f32 1.0, %v2225_v18  ;;  %v1256_v18 = vadd.f32 %v2529_v40, %v957_v9  ;;  %v1933_v24 = vmul.f32 -1.442695, %v1258_v12 }
 0x129   : > { %v2229_v22 = vpop.eup %2228  ;;  %2254 = vrcp.f32 %v1500_v19  ;;  %v1505_v23 = vadd.f32 1.0, %v2227_v20  ;;  %v2617_v19 = vpop.f32.mrf.mxu0 }
 0x12a   : > { %v2231_v25 = vpop.eup %2230  ;;  %2256 = vrcp.f32 %v1473_v21  ;;  %v1471_v26 = vadd.f32 1.0, %v2229_v22  ;;  %v1901_v21 = vmul.f32 -1.442695, %v1226_v8  ;;  %v2620_v22 = vpop.f32.mrf.mxu1  ;;  %v1931_v28 = vmul.f32 -1.442695, %v1256_v18 }
 0x12b   : > { %v2233_v29 = vpop.eup %2232  ;;  %2258 = vrcp.f32 %v1505_v23  ;;  %v1503_v30 = vadd.f32 1.0, %v2231_v25  ;;  %v1261_v1 = vadd.f32 %v2620_v22, %v2529_v40 }
 0x12c   : > { %v2235_v32 = vpop.eup %2234  ;;  %2260 = vrcp.f32 %v1471_v26  ;;  %v1474_v33 = vadd.f32 1.0, %v2233_v29  ;;  %v1899_v26 = vmul.f32 -1.442695, %v1224_v15  ;;  %v842_v29 = vpop.f32.mrf.mxu0 }
 0x12d   : > { %v2237_v35 = vpop.eup %2236  ;;  %2262 = vrcp.f32 %v1503_v30  ;;  %v1506_v36 = vadd.f32 1.0, %v2235_v32  ;;  %v970_v31 = vpop.f32.mrf.mxu1  ;;  %v1227_v4 = vadd.f32 %v2529_v40, %v842_v29 }
 0x12e   : > { %v2239_v39 = vpop.eup %2238  ;;  %2264 = vrcp.f32 %v1474_v33  ;;  %v1472_v41 = vadd.f32 1.0, %v2237_v35  ;;  %v2027_v37 = vpop.f32.mrf.mxu0 }
 0x12f   : > { %v2241_v45 = vpop.eup %2240  ;;  %2266 = vrcp.f32 %v1506_v36  ;;  %v1504_v46 = vadd.f32 1.0, %v2239_v39  ;;  %v1230_v12 = vadd.f32 %v2027_v37, %v2529_v40 }
 0x130   : > { %v2243_v49 = vpop.eup %2242  ;;  %1661 = vst [vmem:[%s2554_s18 + $0x50] sm:$0xff] %v2241_v45  ;;  %2268 = vrcp.f32 %v1472_v41  ;;  %v2059_v41 = vpop.f32.mrf.mxu1 }
 0x131   : > { %v2245_v52 = vpop.eup %2244  ;;  %1693 = vst [vmem:[%s2554_s18 + $0x150] sm:$0xff] %v2243_v49  ;;  %2270 = vrcp.f32 %v1504_v46  ;;  %v845_v48 = vpop.f32.mrf.mxu0 }
 0x132   : > { %v2247_v56 = vpop.eup %2246  ;;  %1659 = vst [vmem:[%s2554_s18 + $0x40] sm:$0xff] %v2245_v52  ;;  %2272 = vpow2.f32 %v1896_v42  ;;  %v973_v51 = vpop.f32.mrf.mxu1 }
 0x133   : > { %v2249_v60 = vpop.eup %2248  ;;  %1691 = vst [vmem:[%s2554_s18 + $0x140] sm:$0xff] %v2247_v56  ;;  %2274 = vpow2.f32 %v1928_v47  ;;  %v2030_v58 = vpop.f32.mrf.mxu0 }
 0x134   : > { %v2251_v63 = vpop.eup %2250  ;;  %1662 = vst [vmem:[%s2554_s18 + $0x58] sm:$0xff] %v2249_v60  ;;  %2276 = vpow2.f32 %v1894_v50  ;;  %v2062_v62 = vpop.f32.mrf.mxu1 }
 0x135   : > { %v2253_v2 = vpop.eup %2252  ;;  %1694 = vst [vmem:[%s2554_s18 + $0x158] sm:$0xff] %v2251_v63  ;;  %2278 = vpow2.f32 %v1926_v53  ;;  %v858_v8 = vpop.f32.mrf.mxu0 }
 0x136   : > { %v2255_v6 = vpop.eup %2254  ;;  %1660 = vst [vmem:[%s2554_s18 + $0x48] sm:$0xff] %v2253_v2  ;;  %2280 = vpow2.f32 %v1897_v57 }
 0x137   : > { %v2257_v10 = vpop.eup %2256  ;;  %1692 = vst [vmem:[%s2554_s18 + $0x148] sm:$0xff] %v2255_v6  ;;  %2282 = vpow2.f32 %v1929_v61  ;;  %v1229_v61 = vadd.f32 %v2617_v19, %v2529_v40  ;;  %v1902_v19 = vmul.f32 -1.442695, %v1227_v4 }
 0x138   : > { %v2259_v13 = vpop.eup %2258  ;;  %1665 = vst [vmem:[%s2554_s18 + $0x70] sm:$0xff] %v2257_v10  ;;  %2284 = vpow2.f32 %v1895_v0 }
 0x139   : > { %v2261_v16 = vpop.eup %2260  ;;  %1697 = vst [vmem:[%s2554_s18 + $0x170] sm:$0xff] %v2259_v13  ;;  %2286 = vpow2.f32 %v1927_v3  ;;  %v986_v13 = vpop.f32.mrf.mxu1 }
 0x13a   : > { %v2263_v20 = vpop.eup %2262  ;;  %1663 = vst [vmem:[%s2554_s18 + $0x60] sm:$0xff] %v2261_v16  ;;  %2288 = vpow2.f32 %v1900_v7  ;;  %v1259_v7 = vadd.f32 %v2529_v40, %v970_v31  ;;  %v1936_v16 = vmul.f32 -1.442695, %v1261_v1  ;;  %v1265_v31 = vadd.f32 %v2062_v62, %v2529_v40 }
 0x13b   : > { %v2265_v23 = vpop.eup %2264  ;;  %1695 = vst [vmem:[%s2554_s18 + $0x160] sm:$0xff] %v2263_v20  ;;  %2290 = vpow2.f32 %v1932_v11  ;;  %v1904_v11 = vmul.f32 -1.442695, %v1229_v61  ;;  %v1228_v20 = vadd.f32 %v2529_v40, %v845_v48  ;;  %v1263_v37 = vadd.f32 %v2529_v40, %v986_v13 }
 0x13c   : > { %v2267_v25 = vpop.eup %2266  ;;  %1666 = vst [vmem:[%s2554_s18 + $0x78] sm:$0xff] %v2265_v23  ;;  %2292 = vpow2.f32 %v1898_v14  ;;  %v1934_v22 = vmul.f32 -1.442695, %v1259_v7  ;;  %v1260_v23 = vadd.f32 %v2529_v40, %v973_v51 }
 0x13d   : > { %v2269_v27 = vpop.eup %2268  ;;  %1698 = vst [vmem:[%s2554_s18 + $0x178] sm:$0xff] %v2267_v25  ;;  %2294 = vpow2.f32 %v1930_v17  ;;  %v1262_v17 = vadd.f32 %v2059_v41, %v2529_v40  ;;  %v1938_v51 = vmul.f32 -1.442695, %v1263_v37 }
 0x13e   : > { %v2271_v30 = vpop.eup %2270  ;;  %1664 = vst [vmem:[%s2554_s18 + $0x68] sm:$0xff] %v2269_v27  ;;  %2296 = vpow2.f32 %v1901_v21  ;;  %v1233_v27 = vadd.f32 %v2030_v58, %v2529_v40 }
 0x13f   : > { %v2273_v32 = vpop.eup %2272  ;;  %1696 = vst [vmem:[%s2554_s18 + $0x168] sm:$0xff] %v2271_v30  ;;  %2298 = vpow2.f32 %v1933_v24  ;;  %v2031_v24 = vpop.f32.mrf.mxu0  ;;  %v1937_v30 = vmul.f32 -1.442695, %v1262_v17 }
 0x140   : > { %v2275_v33 = vpop.eup %2274  ;;  %v1477_v34 = vadd.f32 1.0, %v2273_v32  ;;  %2300 = vpow2.f32 %v1899_v26  ;;  %v1905_v26 = vmul.f32 -1.442695, %v1230_v12  ;;  %v1908_v41 = vmul.f32 -1.442695, %v1233_v27 }
 0x141   : > { %v2277_v35 = vpop.eup %2276  ;;  %v1509_v36 = vadd.f32 1.0, %v2275_v33  ;;  %2302 = vpow2.f32 %v1931_v28  ;;  %v2063_v28 = vpop.f32.mrf.mxu1  ;;  %v1903_v33 = vmul.f32 -1.442695, %v1228_v20 }
 0x142   : > { %v2279_v38 = vpop.eup %2278  ;;  %2304 = vrcp.f32 %v1477_v34  ;;  %v1475_v39 = vadd.f32 1.0, %v2277_v35  ;;  %v1231_v34 = vadd.f32 %v2529_v40, %v858_v8 }
 0x143   : > { %v2281_v42 = vpop.eup %2280  ;;  %2306 = vrcp.f32 %v1509_v36  ;;  %v1507_v43 = vadd.f32 1.0, %v2279_v38  ;;  %v1935_v36 = vmul.f32 -1.442695, %v1260_v23  ;;  %v861_v38 = vpop.f32.mrf.mxu0 }
 0x144   : > { %v2283_v44 = vpop.eup %2282  ;;  %2308 = vrcp.f32 %v1475_v39  ;;  %v1478_v45 = vadd.f32 1.0, %v2281_v42  ;;  %v1234_v42 = vadd.f32 %v2031_v24, %v2529_v40  ;;  %v1906_v48 = vmul.f32 -1.442695, %v1231_v34 }
 0x145   : > { %v2285_v46 = vpop.eup %2284  ;;  %2310 = vrcp.f32 %v1507_v43  ;;  %v1510_v47 = vadd.f32 1.0, %v2283_v44  ;;  %v989_v43 = vpop.f32.mrf.mxu1 }
 0x146   : > { %v2287_v49 = vpop.eup %2286  ;;  %2312 = vrcp.f32 %v1478_v45  ;;  %v1476_v50 = vadd.f32 1.0, %v2285_v46  ;;  %v1940_v45 = vmul.f32 -1.442695, %v1265_v31  ;;  %v1266_v46 = vadd.f32 %v2063_v28, %v2529_v40 }
 0x147   : > { %v2289_v52 = vpop.eup %2288  ;;  %2314 = vrcp.f32 %v1510_v47  ;;  %v1508_v53 = vadd.f32 1.0, %v2287_v49  ;;  %v1232_v49 = vadd.f32 %v2529_v40, %v861_v38 }
 0x148   : > { %v2291_v54 = vpop.eup %2290  ;;  %2316 = vrcp.f32 %v1476_v50  ;;  %v1481_v55 = vadd.f32 1.0, %v2289_v52  ;;  %v1264_v52 = vadd.f32 %v2529_v40, %v989_v43 }
 0x149   : > { %v2293_v56 = vpop.eup %2292  ;;  %2318 = vrcp.f32 %v1508_v53  ;;  %v1513_v57 = vadd.f32 1.0, %v2291_v54  ;;  %v1909_v54 = vmul.f32 -1.442695, %v1234_v42  ;;  %v1907_v58 = vmul.f32 -1.442695, %v1232_v49 }
 0x14a   : > { %v2295_v59 = vpop.eup %2294  ;;  %2320 = vrcp.f32 %v1481_v55  ;;  %v1479_v60 = vadd.f32 1.0, %v2293_v56  ;;  %v1941_v56 = vmul.f32 -1.442695, %v1266_v46 }
 0x14b   : > { %v2297_v63 = vpop.eup %2296  ;;  %2322 = vrcp.f32 %v1513_v57  ;;  %v1511_v0 = vadd.f32 1.0, %v2295_v59 }
 0x14c   : > { %v2299_v2 = vpop.eup %2298  ;;  %2324 = vrcp.f32 %v1479_v60  ;;  %v1482_v3 = vadd.f32 1.0, %v2297_v63  ;;  %v1939_v60 = vmul.f32 -1.442695, %v1264_v52 }
 0x14d   : > { %v2301_v5 = vpop.eup %2300  ;;  %2326 = vrcp.f32 %v1511_v0  ;;  %v1514_v6 = vadd.f32 1.0, %v2299_v2 }
 0x14e   : > { %v2303_v9 = vpop.eup %2302  ;;  %2328 = vrcp.f32 %v1482_v3  ;;  %v1480_v10 = vadd.f32 1.0, %v2301_v5 }
 0x14f   : > { %v2305_v14 = vpop.eup %2304  ;;  %2330 = vrcp.f32 %v1514_v6  ;;  %v1512_v15 = vadd.f32 1.0, %v2303_v9 }
 0x150   : > { %v2307_v18 = vpop.eup %2306  ;;  %1669 = vst [vmem:[%s2554_s18 + $0x90] sm:$0xff] %v2305_v14  ;;  %2332 = vrcp.f32 %v1480_v10 }
 0x151   : > { %v2309_v21 = vpop.eup %2308  ;;  %1701 = vst [vmem:[%s2554_s18 + $0x190] sm:$0xff] %v2307_v18  ;;  %2334 = vrcp.f32 %v1512_v15 }
 0x152   : > { %v2311_v25 = vpop.eup %2310  ;;  %1667 = vst [vmem:[%s2554_s18 + $0x80] sm:$0xff] %v2309_v21  ;;  %2336 = vpow2.f32 %v1904_v11 }
 0x153   : > { %v2313_v29 = vpop.eup %2312  ;;  %1699 = vst [vmem:[%s2554_s18 + $0x180] sm:$0xff] %v2311_v25  ;;  %2338 = vpow2.f32 %v1936_v16 }
 0x154   : > { %v2315_v32 = vpop.eup %2314  ;;  %1670 = vst [vmem:[%s2554_s18 + $0x98] sm:$0xff] %v2313_v29  ;;  %2340 = vpow2.f32 %v1902_v19 }
 0x155   : > { %v2317_v35 = vpop.eup %2316  ;;  %1702 = vst [vmem:[%s2554_s18 + $0x198] sm:$0xff] %v2315_v32  ;;  %2342 = vpow2.f32 %v1934_v22 }
 0x156   : > { %v2319_v39 = vpop.eup %2318  ;;  %1668 = vst [vmem:[%s2554_s18 + $0x88] sm:$0xff] %v2317_v35  ;;  %2344 = vpow2.f32 %v1905_v26 }
 0x157   : > { %v2321_v44 = vpop.eup %2320  ;;  %1700 = vst [vmem:[%s2554_s18 + $0x188] sm:$0xff] %v2319_v39  ;;  %2346 = vpow2.f32 %v1937_v30 }
 0x158   : > { %v2323_v47 = vpop.eup %2322  ;;  %1673 = vst [vmem:[%s2554_s18 + $0xb0] sm:$0xff] %v2321_v44  ;;  %2348 = vpow2.f32 %v1903_v33 }
 0x159   : > { %v2325_v50 = vpop.eup %2324  ;;  %1705 = vst [vmem:[%s2554_s18 + $0x1b0] sm:$0xff] %v2323_v47  ;;  %2350 = vpow2.f32 %v1935_v36 }
 0x15a   : > { %v2327_v53 = vpop.eup %2326  ;;  %1671 = vst [vmem:[%s2554_s18 + $0xa0] sm:$0xff] %v2325_v50  ;;  %2352 = vpow2.f32 %v1908_v41 }
 0x15b   : > { %v2329_v55 = vpop.eup %2328  ;;  %1703 = vst [vmem:[%s2554_s18 + $0x1a0] sm:$0xff] %v2327_v53  ;;  %2354 = vpow2.f32 %v1940_v45 }
 0x15c   : > { %v2331_v57 = vpop.eup %2330  ;;  %1674 = vst [vmem:[%s2554_s18 + $0xb8] sm:$0xff] %v2329_v55  ;;  %2356 = vpow2.f32 %v1906_v48 }
 0x15d   : > { %v2333_v59 = vpop.eup %2332  ;;  %1706 = vst [vmem:[%s2554_s18 + $0x1b8] sm:$0xff] %v2331_v57  ;;  %2358 = vpow2.f32 %v1938_v51 }
 0x15e   : > { %v2335_v61 = vpop.eup %2334  ;;  %1672 = vst [vmem:[%s2554_s18 + $0xa8] sm:$0xff] %v2333_v59  ;;  %2360 = vpow2.f32 %v1909_v54 }
 0x15f   : > { %v2337_v40 = vpop.eup %2336  ;;  %1704 = vst [vmem:[%s2554_s18 + $0x1a8] sm:$0xff] %v2335_v61  ;;  %2362 = vpow2.f32 %v1941_v56 }
 0x160   : > { %v2339_v62 = vpop.eup %2338  ;;  %v1485_v63 = vadd.f32 1.0, %v2337_v40  ;;  %2364 = vpow2.f32 %v1907_v58 }
 0x161   : > { %v2341_v0 = vpop.eup %2340  ;;  %v1517_v1 = vadd.f32 1.0, %v2339_v62  ;;  %2366 = vpow2.f32 %v1939_v60 }
 0x162   : > { %v2343_v2 = vpop.eup %2342  ;;  %2368 = vrcp.f32 %v1485_v63  ;;  %v1483_v3 = vadd.f32 1.0, %v2341_v0 }
 0x163   : > { %v2345_v4 = vpop.eup %2344  ;;  %2370 = vrcp.f32 %v1517_v1  ;;  %v1515_v5 = vadd.f32 1.0, %v2343_v2 }
 0x164   : > { %v2347_v6 = vpop.eup %2346  ;;  %2372 = vrcp.f32 %v1483_v3  ;;  %v1486_v7 = vadd.f32 1.0, %v2345_v4 }
 0x165   : > { %v2349_v8 = vpop.eup %2348  ;;  %2374 = vrcp.f32 %v1515_v5  ;;  %v1518_v9 = vadd.f32 1.0, %v2347_v6 }
 0x166   : > { %v2351_v10 = vpop.eup %2350  ;;  %2376 = vrcp.f32 %v1486_v7  ;;  %v1484_v11 = vadd.f32 1.0, %v2349_v8 }
 0x167   : > { %v2353_v12 = vpop.eup %2352  ;;  %2378 = vrcp.f32 %v1518_v9  ;;  %v1516_v13 = vadd.f32 1.0, %v2351_v10 }
 0x168   : > { %v2355_v14 = vpop.eup %2354  ;;  %2380 = vrcp.f32 %v1484_v11  ;;  %v1489_v15 = vadd.f32 1.0, %v2353_v12 }
 0x169   : > { %v2357_v16 = vpop.eup %2356  ;;  %2382 = vrcp.f32 %v1516_v13  ;;  %v1521_v17 = vadd.f32 1.0, %v2355_v14 }
 0x16a   : > { %v2359_v18 = vpop.eup %2358  ;;  %2384 = vrcp.f32 %v1489_v15  ;;  %v1487_v19 = vadd.f32 1.0, %v2357_v16 }
 0x16b   : > { %v2361_v20 = vpop.eup %2360  ;;  %2386 = vrcp.f32 %v1521_v17  ;;  %v1519_v21 = vadd.f32 1.0, %v2359_v18 }
 0x16c   : > { %v2363_v22 = vpop.eup %2362  ;;  %2388 = vrcp.f32 %v1487_v19  ;;  %v1490_v23 = vadd.f32 1.0, %v2361_v20 }
 0x16d   : > { %v2365_v24 = vpop.eup %2364  ;;  %2390 = vrcp.f32 %v1519_v21  ;;  %v1522_v25 = vadd.f32 1.0, %v2363_v22 }
 0x16e   : > { %v2367_v26 = vpop.eup %2366  ;;  %2392 = vrcp.f32 %v1490_v23  ;;  %v1488_v27 = vadd.f32 1.0, %v2365_v24 }
 0x16f   : > { %v2369_v28 = vpop.eup %2368  ;;  %2394 = vrcp.f32 %v1522_v25  ;;  %v1520_v29 = vadd.f32 1.0, %v2367_v26 }
 0x170   : > { %v2371_v30 = vpop.eup %2370  ;;  %1677 = vst [vmem:[%s2554_s18 + $0xd0] sm:$0xff] %v2369_v28  ;;  %2396 = vrcp.f32 %v1488_v27 }
 0x171   : > { %v2373_v31 = vpop.eup %2372  ;;  %1709 = vst [vmem:[%s2554_s18 + $0x1d0] sm:$0xff] %v2371_v30  ;;  %2398 = vrcp.f32 %v1520_v29 }
 0x172   : > { %v2375_v32 = vpop.eup %2374  ;;  %1675 = vst [vmem:[%s2554_s18 + $0xc0] sm:$0xff] %v2373_v31 }
 0x173   : > { %v2377_v33 = vpop.eup %2376  ;;  %1707 = vst [vmem:[%s2554_s18 + $0x1c0] sm:$0xff] %v2375_v32 }
 0x174   : > { %v2379_v34 = vpop.eup %2378  ;;  %1678 = vst [vmem:[%s2554_s18 + $0xd8] sm:$0xff] %v2377_v33 }
 0x175   : > { %v2381_v35 = vpop.eup %2380  ;;  %1710 = vst [vmem:[%s2554_s18 + $0x1d8] sm:$0xff] %v2379_v34 }
 0x176   : > { %v2383_v36 = vpop.eup %2382  ;;  %1676 = vst [vmem:[%s2554_s18 + $0xc8] sm:$0xff] %v2381_v35 }
 0x177   : > { %v2385_v37 = vpop.eup %2384  ;;  %1708 = vst [vmem:[%s2554_s18 + $0x1c8] sm:$0xff] %v2383_v36 }
 0x178   : > { %v2387_v38 = vpop.eup %2386  ;;  %1681 = vst [vmem:[%s2554_s18 + $0xf0] sm:$0xff] %v2385_v37 }
 0x179   : > { %v2389_v39 = vpop.eup %2388  ;;  %1713 = vst [vmem:[%s2554_s18 + $0x1f0] sm:$0xff] %v2387_v38 }
 0x17a   : > { %v2391_v41 = vpop.eup %2390  ;;  %1679 = vst [vmem:[%s2554_s18 + $0xe0] sm:$0xff] %v2389_v39 }
 0x17b   : > { %v2393_v42 = vpop.eup %2392  ;;  %1711 = vst [vmem:[%s2554_s18 + $0x1e0] sm:$0xff] %v2391_v41 }
 0x17c   : > { %v2395_v43 = vpop.eup %2394  ;;  %1682 = vst [vmem:[%s2554_s18 + $0xf8] sm:$0xff] %v2393_v42 }
 0x17d   : > { %v2397_v44 = vpop.eup %2396  ;;  %1714 = vst [vmem:[%s2554_s18 + $0x1f8] sm:$0xff] %v2395_v43 }
 0x17e   : > { %v2399_v45 = vpop.eup %2398  ;;  %1680 = vst [vmem:[%s2554_s18 + $0xe8] sm:$0xff] %v2397_v44 }
 0x17f   : > { %1712 = vst [vmem:[%s2554_s18 + $0x1e8] sm:$0xff] %v2399_v45 }
 0x180 PF: > { %s13_s14 = sadd.s32 1, %s2422_s14   ;;  %s2690_s12 = smov %s2418_s13 }
 0x181   : > { %p10_p5 = scmp.ge.s32.totalorder %s13_s14, 6   ;;  %s2691_s13 = smov %s2693_s15 }
 0x183   :  { %12 = sbr.rel (!%p10_p5) target bundleno = 2 (0x2), region = 76 }

</bundles_post_ra>
